<compile_context>
chip_gen: v5e
topology: v5e:2x2
jax: 0.10.0
libtpu: 0.0.40
codegen_flags: <defaults>
</compile_context>

<pallas_src>
import functools

import jax
import jax.numpy as jnp
from jax.experimental import pallas as pl
from jax.experimental.pallas import tpu as pltpu

EPS = 1e-5
_VMEM_LIMIT = 32 * 1024 * 1024


# ------------------------------ Pallas kernels -------------------------------

def _conv1_fused_kernel(xph_ref, s1_ref, b1_ref, w_ref, s2_ref, b2_ref, o_ref,
                        *, stride, Ho, Wo):
    """relu(bn1(x)) -> conv1 (3x3/stride, pad 1) -> relu(bn2(.)), per image.

    xph_ref : (stride*stride, Hq, Wq, Cin) phase-split, halo-padded input (f32)
    s1/b1   : (1, Cin)  BN1 scale / bias (f32)
    w_ref   : (9, Cin, Cout) conv1 taps (bf16), tap index = kh*3 + kw
    s2/b2   : (1, Cout) BN2 scale / bias (f32)
    o_ref   : (Ho*Wo, Cout) bf16 output (post-BN2/ReLU activation)
    """
    s = stride
    cin = xph_ref.shape[-1]
    cout = w_ref.shape[-1]
    scale1 = s1_ref[...]
    bias1 = b1_ref[...]
    acc = jnp.zeros((Ho * Wo, cout), jnp.float32)
    for kh in range(3):
        p_r, r0 = kh % s, kh // s
        for kw in range(3):
            p_c, c0 = kw % s, kw // s
            xw = xph_ref[p_r * s + p_c, r0:r0 + Ho, c0:c0 + Wo, :]  # (Ho,Wo,Cin)
            a1 = jnp.maximum(xw * scale1 + bias1, 0.0)              # BN1+ReLU f32
            lhs = a1.reshape(Ho * Wo, cin).astype(jnp.bfloat16)
            acc = acc + jnp.dot(lhs, w_ref[kh * 3 + kw],
                                preferred_element_type=jnp.float32)
    y = jnp.maximum(acc * s2_ref[...] + b2_ref[...], 0.0)           # BN2+ReLU f32
    o_ref[...] = y.astype(o_ref.dtype)


def _conv2_add_kernel(a2_ref, w2_ref, sc_ref, o_ref, *, Ho, Wo):
    """conv2 (3x3/1, pad 1) over zero-padded act2 + identity residual."""
    cout = w2_ref.shape[-1]
    acc = sc_ref[...].astype(jnp.float32)              # (Ho*Wo, Cout) residual
    for kh in range(3):
        for kw in range(3):
            win = a2_ref[kh:kh + Ho, kw:kw + Wo, :]    # (Ho, Wo, Cout) bf16
            acc = acc + jnp.dot(win.reshape(Ho * Wo, cout), w2_ref[kh * 3 + kw],
                                preferred_element_type=jnp.float32)
    o_ref[...] = acc.astype(o_ref.dtype)


def _conv2_scconv_kernel(a2_ref, w2_ref, xsc_ref, s1_ref, b1_ref, wsc_ref, o_ref,
                         *, Ho, Wo):
    """conv2 (3x3/1) + fused 1x1/stride shortcut conv on relu(bn1(x)) + add."""
    cout = w2_ref.shape[-1]
    a1 = jnp.maximum(xsc_ref[...] * s1_ref[...] + b1_ref[...], 0.0)  # (M, Cin)
    acc = jnp.dot(a1.astype(jnp.bfloat16), wsc_ref[...],
                  preferred_element_type=jnp.float32)
    for kh in range(3):
        for kw in range(3):
            win = a2_ref[kh:kh + Ho, kw:kw + Wo, :]
            acc = acc + jnp.dot(win.reshape(Ho * Wo, cout), w2_ref[kh * 3 + kw],
                                preferred_element_type=jnp.float32)
    o_ref[...] = acc.astype(o_ref.dtype)


# ----------------------------- pallas_call wrappers ---------------------------

def _compiler_params():
    return pltpu.CompilerParams(dimension_semantics=("parallel",),
                                vmem_limit_bytes=_VMEM_LIMIT)


def _conv1_call(xph, s1, b1, w1, s2, b2, *, stride, Ho, Wo):
    N, P, Hq, Wq, Cin = xph.shape
    Cout = w1.shape[-1]
    M = Ho * Wo
    flops = 2 * N * M * 9 * Cin * Cout
    bytes_accessed = (xph.size * 4 + w1.size * 2
                      + (s1.size + b1.size + s2.size + b2.size) * 4
                      + N * M * Cout * 2)
    return pl.pallas_call(
        functools.partial(_conv1_fused_kernel, stride=stride, Ho=Ho, Wo=Wo),
        out_shape=jax.ShapeDtypeStruct((N, M, Cout), jnp.bfloat16),
        grid=(N,),
        in_specs=[
            pl.BlockSpec((None, P, Hq, Wq, Cin), lambda n: (n, 0, 0, 0, 0)),
            pl.BlockSpec((1, Cin), lambda n: (0, 0)),
            pl.BlockSpec((1, Cin), lambda n: (0, 0)),
            pl.BlockSpec((9, Cin, Cout), lambda n: (0, 0, 0)),
            pl.BlockSpec((1, Cout), lambda n: (0, 0)),
            pl.BlockSpec((1, Cout), lambda n: (0, 0)),
        ],
        out_specs=pl.BlockSpec((None, M, Cout), lambda n: (n, 0, 0)),
        compiler_params=_compiler_params(),
        cost_estimate=pl.CostEstimate(flops=flops, transcendentals=0,
                                      bytes_accessed=bytes_accessed),
    )(xph, s1, b1, w1, s2, b2)


def _conv2_identity_call(a2p, w2, sc, *, Ho, Wo):
    N = a2p.shape[0]
    Cout = w2.shape[-1]
    M = Ho * Wo
    flops = 2 * N * M * 9 * Cout * Cout
    bytes_accessed = a2p.size * 2 + w2.size * 2 + sc.size * 4 + N * M * Cout * 4
    return pl.pallas_call(
        functools.partial(_conv2_add_kernel, Ho=Ho, Wo=Wo),
        out_shape=jax.ShapeDtypeStruct((N, M, Cout), jnp.float32),
        grid=(N,),
        in_specs=[
            pl.BlockSpec((None, Ho + 2, Wo + 2, Cout), lambda n: (n, 0, 0, 0)),
            pl.BlockSpec((9, Cout, Cout), lambda n: (0, 0, 0)),
            pl.BlockSpec((None, M, Cout), lambda n: (n, 0, 0)),
        ],
        out_specs=pl.BlockSpec((None, M, Cout), lambda n: (n, 0, 0)),
        compiler_params=_compiler_params(),
        cost_estimate=pl.CostEstimate(flops=flops, transcendentals=0,
                                      bytes_accessed=bytes_accessed),
    )(a2p, w2, sc)


def _conv2_shortcut_call(a2p, w2, xsc, s1, b1, wsc, *, Ho, Wo):
    N = a2p.shape[0]
    Cout = w2.shape[-1]
    Cin = xsc.shape[-1]
    M = Ho * Wo
    flops = 2 * N * M * (9 * Cout + Cin) * Cout
    bytes_accessed = (a2p.size * 2 + w2.size * 2 + xsc.size * 4
                      + (s1.size + b1.size) * 4 + wsc.size * 2 + N * M * Cout * 4)
    return pl.pallas_call(
        functools.partial(_conv2_scconv_kernel, Ho=Ho, Wo=Wo),
        out_shape=jax.ShapeDtypeStruct((N, M, Cout), jnp.float32),
        grid=(N,),
        in_specs=[
            pl.BlockSpec((None, Ho + 2, Wo + 2, Cout), lambda n: (n, 0, 0, 0)),
            pl.BlockSpec((9, Cout, Cout), lambda n: (0, 0, 0)),
            pl.BlockSpec((None, M, Cin), lambda n: (n, 0, 0)),
            pl.BlockSpec((1, Cin), lambda n: (0, 0)),
            pl.BlockSpec((1, Cin), lambda n: (0, 0)),
            pl.BlockSpec((Cin, Cout), lambda n: (0, 0)),
        ],
        out_specs=pl.BlockSpec((None, M, Cout), lambda n: (n, 0, 0)),
        compiler_params=_compiler_params(),
        cost_estimate=pl.CostEstimate(flops=flops, transcendentals=0,
                                      bytes_accessed=bytes_accessed),
    )(a2p, w2, xsc, s1, b1, wsc)


# --------------------------------- host glue ----------------------------------

def _bn_affine(gamma, beta, mean, var):
    scale = gamma / jnp.sqrt(var + EPS)
    bias = beta - mean * scale
    return scale, bias


def _flatten_3x3(w_oihw):
    """(Cout, Cin, 3, 3) -> (9, Cin, Cout) bf16, tap index = kh*3 + kw."""
    cout, cin = w_oihw.shape[:2]
    return (jnp.transpose(w_oihw, (2, 3, 1, 0))
            .reshape(9, cin, cout).astype(jnp.bfloat16))


def _phase_split_padded(x_nhwc, fill_c, stride):
    """Pad H/W by 1 with per-channel fill, split into stride^2 spatial phases.

    Returns (N, stride*stride, Hq, Wq, C) such that every tap (kh, kw) of the
    strided 3x3 conv becomes a static unit-stride window of one phase:
    padded-x[s*ho+kh, s*wo+kw] == phase[(kh%s)*s + kw%s][ho + kh//s, wo + kw//s].
    """
    N, H, W, C = x_nhwc.shape
    s = stride
    Hp = -(-(H + 2) // s) * s
    Wp = -(-(W + 2) // s) * s
    base = jnp.broadcast_to(fill_c[None, None, None, :], (N, Hp, Wp, C))
    xpad = base.at[:, 1:H + 1, 1:W + 1, :].set(x_nhwc)
    Hq, Wq = Hp // s, Wp // s
    xph = xpad.reshape(N, Hq, s, Wq, s, C).transpose(0, 2, 4, 1, 3, 5)
    return xph.reshape(N, s * s, Hq, Wq, C)


def basic_block_forward(x_nhwc, p, stride, in_planes, out_planes):
    """Pre-activation WideResNet BasicBlock (eval-mode BN), NHWC in/out."""
    N, H, W, Cin = x_nhwc.shape
    assert Cin == in_planes
    equal_in_out = in_planes == out_planes
    if equal_in_out and stride != 1:
        raise ValueError("identity shortcut requires stride == 1")

    scale1, bias1 = _bn_affine(p["bn1_gamma"], p["bn1_beta"],
                               p["bn1_mean"], p["bn1_var"])
    scale2, bias2 = _bn_affine(p["bn2_gamma"], p["bn2_beta"],
                               p["bn2_mean"], p["bn2_var"])
    Ho = (H - 1) // stride + 1
    Wo = (W - 1) // stride + 1

    # Pad value chosen so that relu(bn1(pad)) == 0, i.e. equivalent to
    # zero-padding the pre-activated input as in the reference.
    # (Degenerate gamma == 0 channels are not handled by this fused path.)
    safe_scale = jnp.where(scale1 == 0, 1.0, scale1)
    fill1 = jnp.where(scale1 == 0, 0.0, -bias1 / safe_scale)

    # -- kernel 1: relu(bn1) -> conv1 (3x3, stride, pad 1) -> relu(bn2) -------
    xph = _phase_split_padded(x_nhwc, fill1, stride)
    act2 = _conv1_call(xph, scale1[None], bias1[None],
                       _flatten_3x3(p["conv1_w"]),
                       scale2[None], bias2[None],
                       stride=stride, Ho=Ho, Wo=Wo)
    # TODO(synk): F.dropout between relu2 and conv2 (dropRate > 0) is not
    # implemented; NetworkBlock default dropRate = 0.0 / eval mode.

    # zero-pad act2 for conv2 (3x3, stride 1, pad 1)
    a2p = jnp.pad(act2.reshape(N, Ho, Wo, out_planes),
                  ((0, 0), (1, 1), (1, 1), (0, 0)))
    w2 = _flatten_3x3(p["conv2_w"])

    # -- kernel 2: conv2 + (identity | 1x1-stride shortcut conv) + residual ---
    if equal_in_out:
        sc = x_nhwc.reshape(N, Ho * Wo, out_planes)
        out = _conv2_identity_call(a2p, w2, sc, Ho=Ho, Wo=Wo)
    else:
        xsc = x_nhwc[:, ::stride, ::stride, :].reshape(N, Ho * Wo, in_planes)
        wsc = jnp.transpose(p["convsc_w"].reshape(out_planes, in_planes)
                            ).astype(jnp.bfloat16)
        out = _conv2_shortcut_call(a2p, w2, xsc, scale1[None], bias1[None], wsc,
                                   Ho=Ho, Wo=Wo)
    return out.reshape(N, Ho, Wo, out_planes)


def network_block_forward(x_nchw, params_list, in_planes, out_planes, stride):
    """NetworkBlock.forward: nb_layers sequential BasicBlocks (NCHW in/out)."""
    x = jnp.transpose(x_nchw, (0, 2, 3, 1)).astype(jnp.float32)   # NCHW -> NHWC
    for i, p in enumerate(params_list):
        cin = in_planes if i == 0 else out_planes
        s = stride if i == 0 else 1
        x = basic_block_forward(x, p, s, cin, out_planes)
    return jnp.transpose(x, (0, 3, 1, 2))                          # back to NCHW


# ----------------------------- pure-JAX reference -----------------------------

def _ref_bn_relu(x_nchw, g, b, m, v):
    xn = (x_nchw - m[None, :, None, None]) / jnp.sqrt(v[None, :, None, None] + EPS)
    return jax.nn.relu(xn * g[None, :, None, None] + b[None, :, None, None])


def _ref_conv(x_nchw, w_oihw, stride, pad):
    return jax.lax.conv_general_dilated(
        x_nchw, w_oihw, (stride, stride), [(pad, pad), (pad, pad)],
        dimension_numbers=("NCHW", "OIHW", "NCHW"))


def ref_basic_block(x, p, stride, in_planes, out_planes):
    equal_in_out = in_planes == out_planes
    a1 = _ref_bn_relu(x, p["bn1_gamma"], p["bn1_beta"], p["bn1_mean"], p["bn1_var"])
    out = _ref_conv(a1, p["conv1_w"], stride, 1)
    out = _ref_bn_relu(out, p["bn2_gamma"], p["bn2_beta"], p["bn2_mean"], p["bn2_var"])
    out = _ref_conv(out, p["conv2_w"], 1, 1)
    shortcut = x if equal_in_out else _ref_conv(a1, p["convsc_w"], stride, 0)
    return shortcut + out


def ref_network_block(x, params_list, in_planes, out_planes, stride):
    for i, p in enumerate(params_list):
        cin = in_planes if i == 0 else out_planes
        s = stride if i == 0 else 1
        x = ref_basic_block(x, p, s, cin, out_planes)
    return x


# ------------------------------------ main ------------------------------------

def init_params(key, in_planes, out_planes, equal_in_out):
    ks = jax.random.split(key, 11)
    p = {
        "bn1_gamma": jax.random.uniform(ks[0], (in_planes,), jnp.float32, 0.5, 1.5),
        "bn1_beta":  0.1 * jax.random.normal(ks[1], (in_planes,), jnp.float32),
        "bn1_mean":  0.1 * jax.random.normal(ks[2], (in_planes,), jnp.float32),
        "bn1_var":   jax.random.uniform(ks[3], (in_planes,), jnp.float32, 0.5, 1.5),
        "conv1_w":   0.1 * jax.random.normal(ks[4], (out_planes, in_planes, 3, 3), jnp.float32),
        "bn2_gamma": jax.random.uniform(ks[5], (out_planes,), jnp.float32, 0.5, 1.5),
        "bn2_beta":  0.1 * jax.random.normal(ks[6], (out_planes,), jnp.float32),
        "bn2_mean":  0.1 * jax.random.normal(ks[7], (out_planes,), jnp.float32),
        "bn2_var":   jax.random.uniform(ks[8], (out_planes,), jnp.float32, 0.5, 1.5),
        "conv2_w":   0.1 * jax.random.normal(ks[9], (out_planes, out_planes, 3, 3), jnp.float32),
    }
    if not equal_in_out:
        p["convsc_w"] = 0.1 * jax.random.normal(
            ks[10], (out_planes, in_planes, 1, 1), jnp.float32)
    return p


if __name__ == "__main__":
    key = jax.random.PRNGKey(0)
    nb_layers, in_planes, out_planes, stride = 2, 4, 8, 2
    N, H, W = 2, 16, 16

    kx, kp0, kp1 = jax.random.split(key, 3)
    x = jax.random.normal(kx, (N, in_planes, H, W), jnp.float32)
    params = [
        init_params(kp0, in_planes, out_planes, in_planes == out_planes),  # stride-2, conv shortcut
        init_params(kp1, out_planes, out_planes, True),                    # stride-1, identity shortcut
    ]

    fwd = jax.jit(functools.partial(network_block_forward, in_planes=in_planes,
                                    out_planes=out_planes, stride=stride))
    out = jax.block_until_ready(fwd(x, params))

    ref = jax.block_until_ready(
        ref_network_block(x, params, in_planes, out_planes, stride))
    assert out.shape == ref.shape, (out.shape, ref.shape)
    max_err = float(jnp.max(jnp.abs(out - ref)))
    # bf16 MXU operands (f32 accumulation) vs f32 reference -> relaxed tolerance.
    assert jnp.allclose(out, ref, atol=1e-1, rtol=1e-1), max_err
    print("KERNEL_OK")
</pallas_src>

<mosaic_0001>
module attributes {stable_mosaic.version = 11 : i64} {
  func.func @_conv1_fused_kernel(%arg0: i32, %arg1: memref<1x4x9x9x4xf32, #tpu.memory_space<vmem>>, %arg2: memref<1x4xf32, #tpu.memory_space<vmem>>, %arg3: memref<1x4xf32, #tpu.memory_space<vmem>>, %arg4: memref<9x4x8xbf16, #tpu.memory_space<vmem>>, %arg5: memref<1x8xf32, #tpu.memory_space<vmem>>, %arg6: memref<1x8xf32, #tpu.memory_space<vmem>>, %arg7: memref<1x64x8xbf16, #tpu.memory_space<vmem>>) attributes {dimension_semantics = [#tpu.dimension_semantics<parallel>], iteration_bounds = array<i64: 2>, scalar_prefetch = 0 : i64, scratch_operands = 0 : i64, tpu.core_type = #tpu.core_type<tc>, window_params = [{transform_indices = @transform_0, window_bounds = array<i64: 1, 4, 9, 9, 4>}, {pipeline_mode = #tpu.pipeline_mode<synchronous>, transform_indices = @transform_1, window_bounds = array<i64: 1, 4>}, {pipeline_mode = #tpu.pipeline_mode<synchronous>, transform_indices = @transform_2, window_bounds = array<i64: 1, 4>}, {pipeline_mode = #tpu.pipeline_mode<synchronous>, transform_indices = @transform_3, window_bounds = array<i64: 9, 4, 8>}, {pipeline_mode = #tpu.pipeline_mode<synchronous>, transform_indices = @transform_4, window_bounds = array<i64: 1, 8>}, {pipeline_mode = #tpu.pipeline_mode<synchronous>, transform_indices = @transform_5, window_bounds = array<i64: 1, 8>}, {transform_indices = @transform_6, window_bounds = array<i64: 1, 64, 8>}]} {
    %c0 = arith.constant 0 : index
    %c0_0 = arith.constant 0 : index
    %0 = vector.load %arg2[%c0, %c0_0] : memref<1x4xf32, #tpu.memory_space<vmem>>, vector<1x4xf32>
    %c0_1 = arith.constant 0 : index
    %c0_2 = arith.constant 0 : index
    %1 = vector.load %arg3[%c0_1, %c0_2] : memref<1x4xf32, #tpu.memory_space<vmem>>, vector<1x4xf32>
    %cst = arith.constant 0.000000e+00 : f32
    %2 = vector.broadcast %cst : f32 to vector<64x8xf32>
    %c0_3 = arith.constant 0 : index
    %c0_4 = arith.constant 0 : index
    %c0_5 = arith.constant 0 : index
    %c0_6 = arith.constant 0 : index
    %c0_7 = arith.constant 0 : index
    %3 = vector.load %arg1[%c0_3, %c0_4, %c0_5, %c0_6, %c0_7] : memref<1x4x9x9x4xf32, #tpu.memory_space<vmem>>, vector<1x1x8x8x4xf32>
    %4 = vector.shape_cast %3 : vector<1x1x8x8x4xf32> to vector<8x8x4xf32>
    %5 = vector.shape_cast %0 : vector<1x4xf32> to vector<1x1x4xf32>
    %6 = vector.broadcast %5 : vector<1x1x4xf32> to vector<8x8x4xf32>
    %7 = arith.mulf %4, %6 : vector<8x8x4xf32>
    %8 = vector.shape_cast %1 : vector<1x4xf32> to vector<1x1x4xf32>
    %9 = vector.broadcast %8 : vector<1x1x4xf32> to vector<8x8x4xf32>
    %10 = arith.addf %7, %9 : vector<8x8x4xf32>
    %cst_8 = arith.constant 0.000000e+00 : f32
    %11 = vector.broadcast %cst_8 : f32 to vector<8x8x4xf32>
    %12 = arith.maximumf %10, %11 : vector<8x8x4xf32>
    %13 = vector.shape_cast %12 : vector<8x8x4xf32> to vector<64x4xf32>
    %14 = arith.truncf %13 : vector<64x4xf32> to vector<64x4xbf16>
    %c0_9 = arith.constant 0 : index
    %c0_10 = arith.constant 0 : index
    %c0_11 = arith.constant 0 : index
    %15 = vector.load %arg4[%c0_9, %c0_10, %c0_11] : memref<9x4x8xbf16, #tpu.memory_space<vmem>>, vector<1x4x8xbf16>
    %16 = vector.shape_cast %15 : vector<1x4x8xbf16> to vector<4x8xbf16>
    %cst_12 = arith.constant dense<0.000000e+00> : vector<64x8xf32>
    %17 = tpu.matmul %14, %16, %cst_12 {dimension_numbers = #tpu.dot_dimension_numbers<[1], [0], [0], [1], [0, 0, 1, 1], [], []>} : vector<64x4xbf16>, vector<4x8xbf16>, vector<64x8xf32> -> vector<64x8xf32>
    %18 = arith.addf %2, %17 : vector<64x8xf32>
    %c0_13 = arith.constant 0 : index
    %c1 = arith.constant 1 : index
    %c0_14 = arith.constant 0 : index
    %c0_15 = arith.constant 0 : index
    %c0_16 = arith.constant 0 : index
    %19 = vector.load %arg1[%c0_13, %c1, %c0_14, %c0_15, %c0_16] : memref<1x4x9x9x4xf32, #tpu.memory_space<vmem>>, vector<1x1x8x8x4xf32>
    %20 = vector.shape_cast %19 : vector<1x1x8x8x4xf32> to vector<8x8x4xf32>
    %21 = vector.shape_cast %0 : vector<1x4xf32> to vector<1x1x4xf32>
    %22 = vector.broadcast %21 : vector<1x1x4xf32> to vector<8x8x4xf32>
    %23 = arith.mulf %20, %22 : vector<8x8x4xf32>
    %24 = vector.shape_cast %1 : vector<1x4xf32> to vector<1x1x4xf32>
    %25 = vector.broadcast %24 : vector<1x1x4xf32> to vector<8x8x4xf32>
    %26 = arith.addf %23, %25 : vector<8x8x4xf32>
    %cst_17 = arith.constant 0.000000e+00 : f32
    %27 = vector.broadcast %cst_17 : f32 to vector<8x8x4xf32>
    %28 = arith.maximumf %26, %27 : vector<8x8x4xf32>
    %29 = vector.shape_cast %28 : vector<8x8x4xf32> to vector<64x4xf32>
    %30 = arith.truncf %29 : vector<64x4xf32> to vector<64x4xbf16>
    %c1_18 = arith.constant 1 : index
    %c0_19 = arith.constant 0 : index
    %c0_20 = arith.constant 0 : index
    %31 = vector.load %arg4[%c1_18, %c0_19, %c0_20] : memref<9x4x8xbf16, #tpu.memory_space<vmem>>, vector<1x4x8xbf16>
    %32 = vector.shape_cast %31 : vector<1x4x8xbf16> to vector<4x8xbf16>
    %cst_21 = arith.constant dense<0.000000e+00> : vector<64x8xf32>
    %33 = tpu.matmul %30, %32, %cst_21 {dimension_numbers = #tpu.dot_dimension_numbers<[1], [0], [0], [1], [0, 0, 1, 1], [], []>} : vector<64x4xbf16>, vector<4x8xbf16>, vector<64x8xf32> -> vector<64x8xf32>
    %34 = arith.addf %18, %33 : vector<64x8xf32>
    %c0_22 = arith.constant 0 : index
    %c0_23 = arith.constant 0 : index
    %c0_24 = arith.constant 0 : index
    %c1_25 = arith.constant 1 : index
    %c0_26 = arith.constant 0 : index
    %35 = vector.load %arg1[%c0_22, %c0_23, %c0_24, %c1_25, %c0_26] : memref<1x4x9x9x4xf32, #tpu.memory_space<vmem>>, vector<1x1x8x8x4xf32>
    %36 = vector.shape_cast %35 : vector<1x1x8x8x4xf32> to vector<8x8x4xf32>
    %37 = vector.shape_cast %0 : vector<1x4xf32> to vector<1x1x4xf32>
    %38 = vector.broadcast %37 : vector<1x1x4xf32> to vector<8x8x4xf32>
    %39 = arith.mulf %36, %38 : vector<8x8x4xf32>
    %40 = vector.shape_cast %1 : vector<1x4xf32> to vector<1x1x4xf32>
    %41 = vector.broadcast %40 : vector<1x1x4xf32> to vector<8x8x4xf32>
    %42 = arith.addf %39, %41 : vector<8x8x4xf32>
    %cst_27 = arith.constant 0.000000e+00 : f32
    %43 = vector.broadcast %cst_27 : f32 to vector<8x8x4xf32>
    %44 = arith.maximumf %42, %43 : vector<8x8x4xf32>
    %45 = vector.shape_cast %44 : vector<8x8x4xf32> to vector<64x4xf32>
    %46 = arith.truncf %45 : vector<64x4xf32> to vector<64x4xbf16>
    %c2 = arith.constant 2 : index
    %c0_28 = arith.constant 0 : index
    %c0_29 = arith.constant 0 : index
    %47 = vector.load %arg4[%c2, %c0_28, %c0_29] : memref<9x4x8xbf16, #tpu.memory_space<vmem>>, vector<1x4x8xbf16>
    %48 = vector.shape_cast %47 : vector<1x4x8xbf16> to vector<4x8xbf16>
    %cst_30 = arith.constant dense<0.000000e+00> : vector<64x8xf32>
    %49 = tpu.matmul %46, %48, %cst_30 {dimension_numbers = #tpu.dot_dimension_numbers<[1], [0], [0], [1], [0, 0, 1, 1], [], []>} : vector<64x4xbf16>, vector<4x8xbf16>, vector<64x8xf32> -> vector<64x8xf32>
    %50 = arith.addf %34, %49 : vector<64x8xf32>
    %c0_31 = arith.constant 0 : index
    %c2_32 = arith.constant 2 : index
    %c0_33 = arith.constant 0 : index
    %c0_34 = arith.constant 0 : index
    %c0_35 = arith.constant 0 : index
    %51 = vector.load %arg1[%c0_31, %c2_32, %c0_33, %c0_34, %c0_35] : memref<1x4x9x9x4xf32, #tpu.memory_space<vmem>>, vector<1x1x8x8x4xf32>
    %52 = vector.shape_cast %51 : vector<1x1x8x8x4xf32> to vector<8x8x4xf32>
    %53 = vector.shape_cast %0 : vector<1x4xf32> to vector<1x1x4xf32>
    %54 = vector.broadcast %53 : vector<1x1x4xf32> to vector<8x8x4xf32>
    %55 = arith.mulf %52, %54 : vector<8x8x4xf32>
    %56 = vector.shape_cast %1 : vector<1x4xf32> to vector<1x1x4xf32>
    %57 = vector.broadcast %56 : vector<1x1x4xf32> to vector<8x8x4xf32>
    %58 = arith.addf %55, %57 : vector<8x8x4xf32>
    %cst_36 = arith.constant 0.000000e+00 : f32
    %59 = vector.broadcast %cst_36 : f32 to vector<8x8x4xf32>
    %60 = arith.maximumf %58, %59 : vector<8x8x4xf32>
    %61 = vector.shape_cast %60 : vector<8x8x4xf32> to vector<64x4xf32>
    %62 = arith.truncf %61 : vector<64x4xf32> to vector<64x4xbf16>
    %c3 = arith.constant 3 : index
    %c0_37 = arith.constant 0 : index
    %c0_38 = arith.constant 0 : index
    %63 = vector.load %arg4[%c3, %c0_37, %c0_38] : memref<9x4x8xbf16, #tpu.memory_space<vmem>>, vector<1x4x8xbf16>
    %64 = vector.shape_cast %63 : vector<1x4x8xbf16> to vector<4x8xbf16>
    %cst_39 = arith.constant dense<0.000000e+00> : vector<64x8xf32>
    %65 = tpu.matmul %62, %64, %cst_39 {dimension_numbers = #tpu.dot_dimension_numbers<[1], [0], [0], [1], [0, 0, 1, 1], [], []>} : vector<64x4xbf16>, vector<4x8xbf16>, vector<64x8xf32> -> vector<64x8xf32>
    %66 = arith.addf %50, %65 : vector<64x8xf32>
    %c0_40 = arith.constant 0 : index
    %c3_41 = arith.constant 3 : index
    %c0_42 = arith.constant 0 : index
    %c0_43 = arith.constant 0 : index
    %c0_44 = arith.constant 0 : index
    %67 = vector.load %arg1[%c0_40, %c3_41, %c0_42, %c0_43, %c0_44] : memref<1x4x9x9x4xf32, #tpu.memory_space<vmem>>, vector<1x1x8x8x4xf32>
    %68 = vector.shape_cast %67 : vector<1x1x8x8x4xf32> to vector<8x8x4xf32>
    %69 = vector.shape_cast %0 : vector<1x4xf32> to vector<1x1x4xf32>
    %70 = vector.broadcast %69 : vector<1x1x4xf32> to vector<8x8x4xf32>
    %71 = arith.mulf %68, %70 : vector<8x8x4xf32>
    %72 = vector.shape_cast %1 : vector<1x4xf32> to vector<1x1x4xf32>
    %73 = vector.broadcast %72 : vector<1x1x4xf32> to vector<8x8x4xf32>
    %74 = arith.addf %71, %73 : vector<8x8x4xf32>
    %cst_45 = arith.constant 0.000000e+00 : f32
    %75 = vector.broadcast %cst_45 : f32 to vector<8x8x4xf32>
    %76 = arith.maximumf %74, %75 : vector<8x8x4xf32>
    %77 = vector.shape_cast %76 : vector<8x8x4xf32> to vector<64x4xf32>
    %78 = arith.truncf %77 : vector<64x4xf32> to vector<64x4xbf16>
    %c4 = arith.constant 4 : index
    %c0_46 = arith.constant 0 : index
    %c0_47 = arith.constant 0 : index
    %79 = vector.load %arg4[%c4, %c0_46, %c0_47] : memref<9x4x8xbf16, #tpu.memory_space<vmem>>, vector<1x4x8xbf16>
    %80 = vector.shape_cast %79 : vector<1x4x8xbf16> to vector<4x8xbf16>
    %cst_48 = arith.constant dense<0.000000e+00> : vector<64x8xf32>
    %81 = tpu.matmul %78, %80, %cst_48 {dimension_numbers = #tpu.dot_dimension_numbers<[1], [0], [0], [1], [0, 0, 1, 1], [], []>} : vector<64x4xbf16>, vector<4x8xbf16>, vector<64x8xf32> -> vector<64x8xf32>
    %82 = arith.addf %66, %81 : vector<64x8xf32>
    %c0_49 = arith.constant 0 : index
    %c2_50 = arith.constant 2 : index
    %c0_51 = arith.constant 0 : index
    %c1_52 = arith.constant 1 : index
    %c0_53 = arith.constant 0 : index
    %83 = vector.load %arg1[%c0_49, %c2_50, %c0_51, %c1_52, %c0_53] : memref<1x4x9x9x4xf32, #tpu.memory_space<vmem>>, vector<1x1x8x8x4xf32>
    %84 = vector.shape_cast %83 : vector<1x1x8x8x4xf32> to vector<8x8x4xf32>
    %85 = vector.shape_cast %0 : vector<1x4xf32> to vector<1x1x4xf32>
    %86 = vector.broadcast %85 : vector<1x1x4xf32> to vector<8x8x4xf32>
    %87 = arith.mulf %84, %86 : vector<8x8x4xf32>
    %88 = vector.shape_cast %1 : vector<1x4xf32> to vector<1x1x4xf32>
    %89 = vector.broadcast %88 : vector<1x1x4xf32> to vector<8x8x4xf32>
    %90 = arith.addf %87, %89 : vector<8x8x4xf32>
    %cst_54 = arith.constant 0.000000e+00 : f32
    %91 = vector.broadcast %cst_54 : f32 to vector<8x8x4xf32>
    %92 = arith.maximumf %90, %91 : vector<8x8x4xf32>
    %93 = vector.shape_cast %92 : vector<8x8x4xf32> to vector<64x4xf32>
    %94 = arith.truncf %93 : vector<64x4xf32> to vector<64x4xbf16>
    %c5 = arith.constant 5 : index
    %c0_55 = arith.constant 0 : index
    %c0_56 = arith.constant 0 : index
    %95 = vector.load %arg4[%c5, %c0_55, %c0_56] : memref<9x4x8xbf16, #tpu.memory_space<vmem>>, vector<1x4x8xbf16>
    %96 = vector.shape_cast %95 : vector<1x4x8xbf16> to vector<4x8xbf16>
    %cst_57 = arith.constant dense<0.000000e+00> : vector<64x8xf32>
    %97 = tpu.matmul %94, %96, %cst_57 {dimension_numbers = #tpu.dot_dimension_numbers<[1], [0], [0], [1], [0, 0, 1, 1], [], []>} : vector<64x4xbf16>, vector<4x8xbf16>, vector<64x8xf32> -> vector<64x8xf32>
    %98 = arith.addf %82, %97 : vector<64x8xf32>
    %c0_58 = arith.constant 0 : index
    %c0_59 = arith.constant 0 : index
    %c1_60 = arith.constant 1 : index
    %c0_61 = arith.constant 0 : index
    %c0_62 = arith.constant 0 : index
    %99 = vector.load %arg1[%c0_58, %c0_59, %c1_60, %c0_61, %c0_62] : memref<1x4x9x9x4xf32, #tpu.memory_space<vmem>>, vector<1x1x8x8x4xf32>
    %100 = vector.shape_cast %99 : vector<1x1x8x8x4xf32> to vector<8x8x4xf32>
    %101 = vector.shape_cast %0 : vector<1x4xf32> to vector<1x1x4xf32>
    %102 = vector.broadcast %101 : vector<1x1x4xf32> to vector<8x8x4xf32>
    %103 = arith.mulf %100, %102 : vector<8x8x4xf32>
    %104 = vector.shape_cast %1 : vector<1x4xf32> to vector<1x1x4xf32>
    %105 = vector.broadcast %104 : vector<1x1x4xf32> to vector<8x8x4xf32>
    %106 = arith.addf %103, %105 : vector<8x8x4xf32>
    %cst_63 = arith.constant 0.000000e+00 : f32
    %107 = vector.broadcast %cst_63 : f32 to vector<8x8x4xf32>
    %108 = arith.maximumf %106, %107 : vector<8x8x4xf32>
    %109 = vector.shape_cast %108 : vector<8x8x4xf32> to vector<64x4xf32>
    %110 = arith.truncf %109 : vector<64x4xf32> to vector<64x4xbf16>
    %c6 = arith.constant 6 : index
    %c0_64 = arith.constant 0 : index
    %c0_65 = arith.constant 0 : index
    %111 = vector.load %arg4[%c6, %c0_64, %c0_65] : memref<9x4x8xbf16, #tpu.memory_space<vmem>>, vector<1x4x8xbf16>
    %112 = vector.shape_cast %111 : vector<1x4x8xbf16> to vector<4x8xbf16>
    %cst_66 = arith.constant dense<0.000000e+00> : vector<64x8xf32>
    %113 = tpu.matmul %110, %112, %cst_66 {dimension_numbers = #tpu.dot_dimension_numbers<[1], [0], [0], [1], [0, 0, 1, 1], [], []>} : vector<64x4xbf16>, vector<4x8xbf16>, vector<64x8xf32> -> vector<64x8xf32>
    %114 = arith.addf %98, %113 : vector<64x8xf32>
    %c0_67 = arith.constant 0 : index
    %c1_68 = arith.constant 1 : index
    %c1_69 = arith.constant 1 : index
    %c0_70 = arith.constant 0 : index
    %c0_71 = arith.constant 0 : index
    %115 = vector.load %arg1[%c0_67, %c1_68, %c1_69, %c0_70, %c0_71] : memref<1x4x9x9x4xf32, #tpu.memory_space<vmem>>, vector<1x1x8x8x4xf32>
    %116 = vector.shape_cast %115 : vector<1x1x8x8x4xf32> to vector<8x8x4xf32>
    %117 = vector.shape_cast %0 : vector<1x4xf32> to vector<1x1x4xf32>
    %118 = vector.broadcast %117 : vector<1x1x4xf32> to vector<8x8x4xf32>
    %119 = arith.mulf %116, %118 : vector<8x8x4xf32>
    %120 = vector.shape_cast %1 : vector<1x4xf32> to vector<1x1x4xf32>
    %121 = vector.broadcast %120 : vector<1x1x4xf32> to vector<8x8x4xf32>
    %122 = arith.addf %119, %121 : vector<8x8x4xf32>
    %cst_72 = arith.constant 0.000000e+00 : f32
    %123 = vector.broadcast %cst_72 : f32 to vector<8x8x4xf32>
    %124 = arith.maximumf %122, %123 : vector<8x8x4xf32>
    %125 = vector.shape_cast %124 : vector<8x8x4xf32> to vector<64x4xf32>
    %126 = arith.truncf %125 : vector<64x4xf32> to vector<64x4xbf16>
    %c7 = arith.constant 7 : index
    %c0_73 = arith.constant 0 : index
    %c0_74 = arith.constant 0 : index
    %127 = vector.load %arg4[%c7, %c0_73, %c0_74] : memref<9x4x8xbf16, #tpu.memory_space<vmem>>, vector<1x4x8xbf16>
    %128 = vector.shape_cast %127 : vector<1x4x8xbf16> to vector<4x8xbf16>
    %cst_75 = arith.constant dense<0.000000e+00> : vector<64x8xf32>
    %129 = tpu.matmul %126, %128, %cst_75 {dimension_numbers = #tpu.dot_dimension_numbers<[1], [0], [0], [1], [0, 0, 1, 1], [], []>} : vector<64x4xbf16>, vector<4x8xbf16>, vector<64x8xf32> -> vector<64x8xf32>
    %130 = arith.addf %114, %129 : vector<64x8xf32>
    %c0_76 = arith.constant 0 : index
    %c0_77 = arith.constant 0 : index
    %c1_78 = arith.constant 1 : index
    %c1_79 = arith.constant 1 : index
    %c0_80 = arith.constant 0 : index
    %131 = vector.load %arg1[%c0_76, %c0_77, %c1_78, %c1_79, %c0_80] : memref<1x4x9x9x4xf32, #tpu.memory_space<vmem>>, vector<1x1x8x8x4xf32>
    %132 = vector.shape_cast %131 : vector<1x1x8x8x4xf32> to vector<8x8x4xf32>
    %133 = vector.shape_cast %0 : vector<1x4xf32> to vector<1x1x4xf32>
    %134 = vector.broadcast %133 : vector<1x1x4xf32> to vector<8x8x4xf32>
    %135 = arith.mulf %132, %134 : vector<8x8x4xf32>
    %136 = vector.shape_cast %1 : vector<1x4xf32> to vector<1x1x4xf32>
    %137 = vector.broadcast %136 : vector<1x1x4xf32> to vector<8x8x4xf32>
    %138 = arith.addf %135, %137 : vector<8x8x4xf32>
    %cst_81 = arith.constant 0.000000e+00 : f32
    %139 = vector.broadcast %cst_81 : f32 to vector<8x8x4xf32>
    %140 = arith.maximumf %138, %139 : vector<8x8x4xf32>
    %141 = vector.shape_cast %140 : vector<8x8x4xf32> to vector<64x4xf32>
    %142 = arith.truncf %141 : vector<64x4xf32> to vector<64x4xbf16>
    %c8 = arith.constant 8 : index
    %c0_82 = arith.constant 0 : index
    %c0_83 = arith.constant 0 : index
    %143 = vector.load %arg4[%c8, %c0_82, %c0_83] : memref<9x4x8xbf16, #tpu.memory_space<vmem>>, vector<1x4x8xbf16>
    %144 = vector.shape_cast %143 : vector<1x4x8xbf16> to vector<4x8xbf16>
    %cst_84 = arith.constant dense<0.000000e+00> : vector<64x8xf32>
    %145 = tpu.matmul %142, %144, %cst_84 {dimension_numbers = #tpu.dot_dimension_numbers<[1], [0], [0], [1], [0, 0, 1, 1], [], []>} : vector<64x4xbf16>, vector<4x8xbf16>, vector<64x8xf32> -> vector<64x8xf32>
    %146 = arith.addf %130, %145 : vector<64x8xf32>
    %c0_85 = arith.constant 0 : index
    %c0_86 = arith.constant 0 : index
    %147 = vector.load %arg5[%c0_85, %c0_86] : memref<1x8xf32, #tpu.memory_space<vmem>>, vector<1x8xf32>
    %148 = vector.broadcast %147 : vector<1x8xf32> to vector<64x8xf32>
    %149 = arith.mulf %146, %148 : vector<64x8xf32>
    %c0_87 = arith.constant 0 : index
    %c0_88 = arith.constant 0 : index
    %150 = vector.load %arg6[%c0_87, %c0_88] : memref<1x8xf32, #tpu.memory_space<vmem>>, vector<1x8xf32>
    %151 = vector.broadcast %150 : vector<1x8xf32> to vector<64x8xf32>
    %152 = arith.addf %149, %151 : vector<64x8xf32>
    %cst_89 = arith.constant 0.000000e+00 : f32
    %153 = vector.broadcast %cst_89 : f32 to vector<64x8xf32>
    %154 = arith.maximumf %152, %153 : vector<64x8xf32>
    %155 = arith.truncf %154 : vector<64x8xf32> to vector<64x8xbf16>
    %c0_90 = arith.constant 0 : index
    %c0_91 = arith.constant 0 : index
    %c0_92 = arith.constant 0 : index
    %156 = vector.load %arg7[%c0_90, %c0_91, %c0_92] : memref<1x64x8xbf16, #tpu.memory_space<vmem>>, vector<1x64x8xbf16>
    %157 = vector.shape_cast %156 : vector<1x64x8xbf16> to vector<64x8xbf16>
    %158 = vector.shape_cast %155 : vector<64x8xbf16> to vector<1x64x8xbf16>
    tpu.vector_store %arg7[%c0_90, %c0_91, %c0_92], %158 {strides = array<i32>} : memref<1x64x8xbf16, #tpu.memory_space<vmem>>, vector<1x64x8xbf16>,
    return
  }
  func.func @transform_0(%arg0: i32) -> (i32, i32, i32, i32, i32) {
    %c0_i32 = arith.constant 0 : i32
    %c0_i32_0 = arith.constant 0 : i32
    %c0_i32_1 = arith.constant 0 : i32
    %c0_i32_2 = arith.constant 0 : i32
    %c0_i32_3 = arith.constant 0 : i32
    return %arg0, %c0_i32, %c0_i32_0, %c0_i32_1, %c0_i32_2 : i32, i32, i32, i32, i32
  }
  func.func @transform_1(%arg0: i32) -> (i32, i32) {
    %c0_i32 = arith.constant 0 : i32
    %c0_i32_0 = arith.constant 0 : i32
    %c0_i32_1 = arith.constant 0 : i32
    return %c0_i32, %c0_i32_0 : i32, i32
  }
  func.func @transform_2(%arg0: i32) -> (i32, i32) {
    %c0_i32 = arith.constant 0 : i32
    %c0_i32_0 = arith.constant 0 : i32
    %c0_i32_1 = arith.constant 0 : i32
    return %c0_i32, %c0_i32_0 : i32, i32
  }
  func.func @transform_3(%arg0: i32) -> (i32, i32, i32) {
    %c0_i32 = arith.constant 0 : i32
    %c0_i32_0 = arith.constant 0 : i32
    %c0_i32_1 = arith.constant 0 : i32
    %c0_i32_2 = arith.constant 0 : i32
    return %c0_i32, %c0_i32_0, %c0_i32_1 : i32, i32, i32
  }
  func.func @transform_4(%arg0: i32) -> (i32, i32) {
    %c0_i32 = arith.constant 0 : i32
    %c0_i32_0 = arith.constant 0 : i32
    %c0_i32_1 = arith.constant 0 : i32
    return %c0_i32, %c0_i32_0 : i32, i32
  }
  func.func @transform_5(%arg0: i32) -> (i32, i32) {
    %c0_i32 = arith.constant 0 : i32
    %c0_i32_0 = arith.constant 0 : i32
    %c0_i32_1 = arith.constant 0 : i32
    return %c0_i32, %c0_i32_0 : i32, i32
  }
  func.func @transform_6(%arg0: i32) -> (i32, i32, i32) {
    %c0_i32 = arith.constant 0 : i32
    %c0_i32_0 = arith.constant 0 : i32
    %c0_i32_1 = arith.constant 0 : i32
    return %arg0, %c0_i32, %c0_i32_0 : i32, i32, i32
  }
}

module attributes {stable_mosaic.version = 11 : i64} {
  func.func @_conv2_scconv_kernel(%arg0: i32, %arg1: memref<1x10x10x8xbf16, #tpu.memory_space<vmem>>, %arg2: memref<9x8x8xbf16, #tpu.memory_space<vmem>>, %arg3: memref<1x64x4xf32, #tpu.memory_space<vmem>>, %arg4: memref<1x4xf32, #tpu.memory_space<vmem>>, %arg5: memref<1x4xf32, #tpu.memory_space<vmem>>, %arg6: memref<4x8xbf16, #tpu.memory_space<vmem>>, %arg7: memref<1x64x8xf32, #tpu.memory_space<vmem>>) attributes {dimension_semantics = [#tpu.dimension_semantics<parallel>], iteration_bounds = array<i64: 2>, scalar_prefetch = 0 : i64, scratch_operands = 0 : i64, tpu.core_type = #tpu.core_type<tc>, window_params = [{transform_indices = @transform_0, window_bounds = array<i64: 1, 10, 10, 8>}, {pipeline_mode = #tpu.pipeline_mode<synchronous>, transform_indices = @transform_1, window_bounds = array<i64: 9, 8, 8>}, {transform_indices = @transform_2, window_bounds = array<i64: 1, 64, 4>}, {pipeline_mode = #tpu.pipeline_mode<synchronous>, transform_indices = @transform_3, window_bounds = array<i64: 1, 4>}, {pipeline_mode = #tpu.pipeline_mode<synchronous>, transform_indices = @transform_4, window_bounds = array<i64: 1, 4>}, {pipeline_mode = #tpu.pipeline_mode<synchronous>, transform_indices = @transform_5, window_bounds = array<i64: 4, 8>}, {transform_indices = @transform_6, window_bounds = array<i64: 1, 64, 8>}]} {
    %c0 = arith.constant 0 : index
    %c0_0 = arith.constant 0 : index
    %c0_1 = arith.constant 0 : index
    %0 = vector.load %arg3[%c0, %c0_0, %c0_1] : memref<1x64x4xf32, #tpu.memory_space<vmem>>, vector<1x64x4xf32>
    %1 = vector.shape_cast %0 : vector<1x64x4xf32> to vector<64x4xf32>
    %c0_2 = arith.constant 0 : index
    %c0_3 = arith.constant 0 : index
    %2 = vector.load %arg4[%c0_2, %c0_3] : memref<1x4xf32, #tpu.memory_space<vmem>>, vector<1x4xf32>
    %3 = vector.broadcast %2 : vector<1x4xf32> to vector<64x4xf32>
    %4 = arith.mulf %1, %3 : vector<64x4xf32>
    %c0_4 = arith.constant 0 : index
    %c0_5 = arith.constant 0 : index
    %5 = vector.load %arg5[%c0_4, %c0_5] : memref<1x4xf32, #tpu.memory_space<vmem>>, vector<1x4xf32>
    %6 = vector.broadcast %5 : vector<1x4xf32> to vector<64x4xf32>
    %7 = arith.addf %4, %6 : vector<64x4xf32>
    %cst = arith.constant 0.000000e+00 : f32
    %8 = vector.broadcast %cst : f32 to vector<64x4xf32>
    %9 = arith.maximumf %7, %8 : vector<64x4xf32>
    %10 = arith.truncf %9 : vector<64x4xf32> to vector<64x4xbf16>
    %c0_6 = arith.constant 0 : index
    %c0_7 = arith.constant 0 : index
    %11 = vector.load %arg6[%c0_6, %c0_7] : memref<4x8xbf16, #tpu.memory_space<vmem>>, vector<4x8xbf16>
    %cst_8 = arith.constant dense<0.000000e+00> : vector<64x8xf32>
    %12 = tpu.matmul %10, %11, %cst_8 {dimension_numbers = #tpu.dot_dimension_numbers<[1], [0], [0], [1], [0, 0, 1, 1], [], []>} : vector<64x4xbf16>, vector<4x8xbf16>, vector<64x8xf32> -> vector<64x8xf32>
    %c0_9 = arith.constant 0 : index
    %c0_10 = arith.constant 0 : index
    %c0_11 = arith.constant 0 : index
    %c0_12 = arith.constant 0 : index
    %13 = vector.load %arg1[%c0_9, %c0_10, %c0_11, %c0_12] : memref<1x10x10x8xbf16, #tpu.memory_space<vmem>>, vector<1x8x8x8xbf16>
    %14 = vector.shape_cast %13 : vector<1x8x8x8xbf16> to vector<8x8x8xbf16>
    %15 = vector.shape_cast %14 : vector<8x8x8xbf16> to vector<64x8xbf16>
    %c0_13 = arith.constant 0 : index
    %c0_14 = arith.constant 0 : index
    %c0_15 = arith.constant 0 : index
    %16 = vector.load %arg2[%c0_13, %c0_14, %c0_15] : memref<9x8x8xbf16, #tpu.memory_space<vmem>>, vector<1x8x8xbf16>
    %17 = vector.shape_cast %16 : vector<1x8x8xbf16> to vector<8x8xbf16>
    %cst_16 = arith.constant dense<0.000000e+00> : vector<64x8xf32>
    %18 = tpu.matmul %15, %17, %cst_16 {dimension_numbers = #tpu.dot_dimension_numbers<[1], [0], [0], [1], [0, 0, 1, 1], [], []>} : vector<64x8xbf16>, vector<8x8xbf16>, vector<64x8xf32> -> vector<64x8xf32>
    %19 = arith.addf %12, %18 : vector<64x8xf32>
    %c0_17 = arith.constant 0 : index
    %c0_18 = arith.constant 0 : index
    %c1 = arith.constant 1 : index
    %c0_19 = arith.constant 0 : index
    %20 = vector.load %arg1[%c0_17, %c0_18, %c1, %c0_19] : memref<1x10x10x8xbf16, #tpu.memory_space<vmem>>, vector<1x8x8x8xbf16>
    %21 = vector.shape_cast %20 : vector<1x8x8x8xbf16> to vector<8x8x8xbf16>
    %22 = vector.shape_cast %21 : vector<8x8x8xbf16> to vector<64x8xbf16>
    %c1_20 = arith.constant 1 : index
    %c0_21 = arith.constant 0 : index
    %c0_22 = arith.constant 0 : index
    %23 = vector.load %arg2[%c1_20, %c0_21, %c0_22] : memref<9x8x8xbf16, #tpu.memory_space<vmem>>, vector<1x8x8xbf16>
    %24 = vector.shape_cast %23 : vector<1x8x8xbf16> to vector<8x8xbf16>
    %cst_23 = arith.constant dense<0.000000e+00> : vector<64x8xf32>
    %25 = tpu.matmul %22, %24, %cst_23 {dimension_numbers = #tpu.dot_dimension_numbers<[1], [0], [0], [1], [0, 0, 1, 1], [], []>} : vector<64x8xbf16>, vector<8x8xbf16>, vector<64x8xf32> -> vector<64x8xf32>
    %26 = arith.addf %19, %25 : vector<64x8xf32>
    %c0_24 = arith.constant 0 : index
    %c0_25 = arith.constant 0 : index
    %c2 = arith.constant 2 : index
    %c0_26 = arith.constant 0 : index
    %27 = vector.load %arg1[%c0_24, %c0_25, %c2, %c0_26] : memref<1x10x10x8xbf16, #tpu.memory_space<vmem>>, vector<1x8x8x8xbf16>
    %28 = vector.shape_cast %27 : vector<1x8x8x8xbf16> to vector<8x8x8xbf16>
    %29 = vector.shape_cast %28 : vector<8x8x8xbf16> to vector<64x8xbf16>
    %c2_27 = arith.constant 2 : index
    %c0_28 = arith.constant 0 : index
    %c0_29 = arith.constant 0 : index
    %30 = vector.load %arg2[%c2_27, %c0_28, %c0_29] : memref<9x8x8xbf16, #tpu.memory_space<vmem>>, vector<1x8x8xbf16>
    %31 = vector.shape_cast %30 : vector<1x8x8xbf16> to vector<8x8xbf16>
    %cst_30 = arith.constant dense<0.000000e+00> : vector<64x8xf32>
    %32 = tpu.matmul %29, %31, %cst_30 {dimension_numbers = #tpu.dot_dimension_numbers<[1], [0], [0], [1], [0, 0, 1, 1], [], []>} : vector<64x8xbf16>, vector<8x8xbf16>, vector<64x8xf32> -> vector<64x8xf32>
    %33 = arith.addf %26, %32 : vector<64x8xf32>
    %c0_31 = arith.constant 0 : index
    %c1_32 = arith.constant 1 : index
    %c0_33 = arith.constant 0 : index
    %c0_34 = arith.constant 0 : index
    %34 = vector.load %arg1[%c0_31, %c1_32, %c0_33, %c0_34] : memref<1x10x10x8xbf16, #tpu.memory_space<vmem>>, vector<1x8x8x8xbf16>
    %35 = vector.shape_cast %34 : vector<1x8x8x8xbf16> to vector<8x8x8xbf16>
    %36 = vector.shape_cast %35 : vector<8x8x8xbf16> to vector<64x8xbf16>
    %c3 = arith.constant 3 : index
    %c0_35 = arith.constant 0 : index
    %c0_36 = arith.constant 0 : index
    %37 = vector.load %arg2[%c3, %c0_35, %c0_36] : memref<9x8x8xbf16, #tpu.memory_space<vmem>>, vector<1x8x8xbf16>
    %38 = vector.shape_cast %37 : vector<1x8x8xbf16> to vector<8x8xbf16>
    %cst_37 = arith.constant dense<0.000000e+00> : vector<64x8xf32>
    %39 = tpu.matmul %36, %38, %cst_37 {dimension_numbers = #tpu.dot_dimension_numbers<[1], [0], [0], [1], [0, 0, 1, 1], [], []>} : vector<64x8xbf16>, vector<8x8xbf16>, vector<64x8xf32> -> vector<64x8xf32>
    %40 = arith.addf %33, %39 : vector<64x8xf32>
    %c0_38 = arith.constant 0 : index
    %c1_39 = arith.constant 1 : index
    %c1_40 = arith.constant 1 : index
    %c0_41 = arith.constant 0 : index
    %41 = vector.load %arg1[%c0_38, %c1_39, %c1_40, %c0_41] : memref<1x10x10x8xbf16, #tpu.memory_space<vmem>>, vector<1x8x8x8xbf16>
    %42 = vector.shape_cast %41 : vector<1x8x8x8xbf16> to vector<8x8x8xbf16>
    %43 = vector.shape_cast %42 : vector<8x8x8xbf16> to vector<64x8xbf16>
    %c4 = arith.constant 4 : index
    %c0_42 = arith.constant 0 : index
    %c0_43 = arith.constant 0 : index
    %44 = vector.load %arg2[%c4, %c0_42, %c0_43] : memref<9x8x8xbf16, #tpu.memory_space<vmem>>, vector<1x8x8xbf16>
    %45 = vector.shape_cast %44 : vector<1x8x8xbf16> to vector<8x8xbf16>
    %cst_44 = arith.constant dense<0.000000e+00> : vector<64x8xf32>
    %46 = tpu.matmul %43, %45, %cst_44 {dimension_numbers = #tpu.dot_dimension_numbers<[1], [0], [0], [1], [0, 0, 1, 1], [], []>} : vector<64x8xbf16>, vector<8x8xbf16>, vector<64x8xf32> -> vector<64x8xf32>
    %47 = arith.addf %40, %46 : vector<64x8xf32>
    %c0_45 = arith.constant 0 : index
    %c1_46 = arith.constant 1 : index
    %c2_47 = arith.constant 2 : index
    %c0_48 = arith.constant 0 : index
    %48 = vector.load %arg1[%c0_45, %c1_46, %c2_47, %c0_48] : memref<1x10x10x8xbf16, #tpu.memory_space<vmem>>, vector<1x8x8x8xbf16>
    %49 = vector.shape_cast %48 : vector<1x8x8x8xbf16> to vector<8x8x8xbf16>
    %50 = vector.shape_cast %49 : vector<8x8x8xbf16> to vector<64x8xbf16>
    %c5 = arith.constant 5 : index
    %c0_49 = arith.constant 0 : index
    %c0_50 = arith.constant 0 : index
    %51 = vector.load %arg2[%c5, %c0_49, %c0_50] : memref<9x8x8xbf16, #tpu.memory_space<vmem>>, vector<1x8x8xbf16>
    %52 = vector.shape_cast %51 : vector<1x8x8xbf16> to vector<8x8xbf16>
    %cst_51 = arith.constant dense<0.000000e+00> : vector<64x8xf32>
    %53 = tpu.matmul %50, %52, %cst_51 {dimension_numbers = #tpu.dot_dimension_numbers<[1], [0], [0], [1], [0, 0, 1, 1], [], []>} : vector<64x8xbf16>, vector<8x8xbf16>, vector<64x8xf32> -> vector<64x8xf32>
    %54 = arith.addf %47, %53 : vector<64x8xf32>
    %c0_52 = arith.constant 0 : index
    %c2_53 = arith.constant 2 : index
    %c0_54 = arith.constant 0 : index
    %c0_55 = arith.constant 0 : index
    %55 = vector.load %arg1[%c0_52, %c2_53, %c0_54, %c0_55] : memref<1x10x10x8xbf16, #tpu.memory_space<vmem>>, vector<1x8x8x8xbf16>
    %56 = vector.shape_cast %55 : vector<1x8x8x8xbf16> to vector<8x8x8xbf16>
    %57 = vector.shape_cast %56 : vector<8x8x8xbf16> to vector<64x8xbf16>
    %c6 = arith.constant 6 : index
    %c0_56 = arith.constant 0 : index
    %c0_57 = arith.constant 0 : index
    %58 = vector.load %arg2[%c6, %c0_56, %c0_57] : memref<9x8x8xbf16, #tpu.memory_space<vmem>>, vector<1x8x8xbf16>
    %59 = vector.shape_cast %58 : vector<1x8x8xbf16> to vector<8x8xbf16>
    %cst_58 = arith.constant dense<0.000000e+00> : vector<64x8xf32>
    %60 = tpu.matmul %57, %59, %cst_58 {dimension_numbers = #tpu.dot_dimension_numbers<[1], [0], [0], [1], [0, 0, 1, 1], [], []>} : vector<64x8xbf16>, vector<8x8xbf16>, vector<64x8xf32> -> vector<64x8xf32>
    %61 = arith.addf %54, %60 : vector<64x8xf32>
    %c0_59 = arith.constant 0 : index
    %c2_60 = arith.constant 2 : index
    %c1_61 = arith.constant 1 : index
    %c0_62 = arith.constant 0 : index
    %62 = vector.load %arg1[%c0_59, %c2_60, %c1_61, %c0_62] : memref<1x10x10x8xbf16, #tpu.memory_space<vmem>>, vector<1x8x8x8xbf16>
    %63 = vector.shape_cast %62 : vector<1x8x8x8xbf16> to vector<8x8x8xbf16>
    %64 = vector.shape_cast %63 : vector<8x8x8xbf16> to vector<64x8xbf16>
    %c7 = arith.constant 7 : index
    %c0_63 = arith.constant 0 : index
    %c0_64 = arith.constant 0 : index
    %65 = vector.load %arg2[%c7, %c0_63, %c0_64] : memref<9x8x8xbf16, #tpu.memory_space<vmem>>, vector<1x8x8xbf16>
    %66 = vector.shape_cast %65 : vector<1x8x8xbf16> to vector<8x8xbf16>
    %cst_65 = arith.constant dense<0.000000e+00> : vector<64x8xf32>
    %67 = tpu.matmul %64, %66, %cst_65 {dimension_numbers = #tpu.dot_dimension_numbers<[1], [0], [0], [1], [0, 0, 1, 1], [], []>} : vector<64x8xbf16>, vector<8x8xbf16>, vector<64x8xf32> -> vector<64x8xf32>
    %68 = arith.addf %61, %67 : vector<64x8xf32>
    %c0_66 = arith.constant 0 : index
    %c2_67 = arith.constant 2 : index
    %c2_68 = arith.constant 2 : index
    %c0_69 = arith.constant 0 : index
    %69 = vector.load %arg1[%c0_66, %c2_67, %c2_68, %c0_69] : memref<1x10x10x8xbf16, #tpu.memory_space<vmem>>, vector<1x8x8x8xbf16>
    %70 = vector.shape_cast %69 : vector<1x8x8x8xbf16> to vector<8x8x8xbf16>
    %71 = vector.shape_cast %70 : vector<8x8x8xbf16> to vector<64x8xbf16>
    %c8 = arith.constant 8 : index
    %c0_70 = arith.constant 0 : index
    %c0_71 = arith.constant 0 : index
    %72 = vector.load %arg2[%c8, %c0_70, %c0_71] : memref<9x8x8xbf16, #tpu.memory_space<vmem>>, vector<1x8x8xbf16>
    %73 = vector.shape_cast %72 : vector<1x8x8xbf16> to vector<8x8xbf16>
    %cst_72 = arith.constant dense<0.000000e+00> : vector<64x8xf32>
    %74 = tpu.matmul %71, %73, %cst_72 {dimension_numbers = #tpu.dot_dimension_numbers<[1], [0], [0], [1], [0, 0, 1, 1], [], []>} : vector<64x8xbf16>, vector<8x8xbf16>, vector<64x8xf32> -> vector<64x8xf32>
    %75 = arith.addf %68, %74 : vector<64x8xf32>
    %c0_73 = arith.constant 0 : index
    %c0_74 = arith.constant 0 : index
    %c0_75 = arith.constant 0 : index
    %76 = vector.load %arg7[%c0_73, %c0_74, %c0_75] : memref<1x64x8xf32, #tpu.memory_space<vmem>>, vector<1x64x8xf32>
    %77 = vector.shape_cast %76 : vector<1x64x8xf32> to vector<64x8xf32>
    %78 = vector.shape_cast %75 : vector<64x8xf32> to vector<1x64x8xf32>
    tpu.vector_store %arg7[%c0_73, %c0_74, %c0_75], %78 {strides = array<i32>} : memref<1x64x8xf32, #tpu.memory_space<vmem>>, vector<1x64x8xf32>,
    return
  }
  func.func @transform_0(%arg0: i32) -> (i32, i32, i32, i32) {
    %c0_i32 = arith.constant 0 : i32
    %c0_i32_0 = arith.constant 0 : i32
    %c0_i32_1 = arith.constant 0 : i32
    %c0_i32_2 = arith.constant 0 : i32
    return %arg0, %c0_i32, %c0_i32_0, %c0_i32_1 : i32, i32, i32, i32
  }
  func.func @transform_1(%arg0: i32) -> (i32, i32, i32) {
    %c0_i32 = arith.constant 0 : i32
    %c0_i32_0 = arith.constant 0 : i32
    %c0_i32_1 = arith.constant 0 : i32
    %c0_i32_2 = arith.constant 0 : i32
    return %c0_i32, %c0_i32_0, %c0_i32_1 : i32, i32, i32
  }
  func.func @transform_2(%arg0: i32) -> (i32, i32, i32) {
    %c0_i32 = arith.constant 0 : i32
    %c0_i32_0 = arith.constant 0 : i32
    %c0_i32_1 = arith.constant 0 : i32
    return %arg0, %c0_i32, %c0_i32_0 : i32, i32, i32
  }
  func.func @transform_3(%arg0: i32) -> (i32, i32) {
    %c0_i32 = arith.constant 0 : i32
    %c0_i32_0 = arith.constant 0 : i32
    %c0_i32_1 = arith.constant 0 : i32
    return %c0_i32, %c0_i32_0 : i32, i32
  }
  func.func @transform_4(%arg0: i32) -> (i32, i32) {
    %c0_i32 = arith.constant 0 : i32
    %c0_i32_0 = arith.constant 0 : i32
    %c0_i32_1 = arith.constant 0 : i32
    return %c0_i32, %c0_i32_0 : i32, i32
  }
  func.func @transform_5(%arg0: i32) -> (i32, i32) {
    %c0_i32 = arith.constant 0 : i32
    %c0_i32_0 = arith.constant 0 : i32
    %c0_i32_1 = arith.constant 0 : i32
    return %c0_i32, %c0_i32_0 : i32, i32
  }
  func.func @transform_6(%arg0: i32) -> (i32, i32, i32) {
    %c0_i32 = arith.constant 0 : i32
    %c0_i32_0 = arith.constant 0 : i32
    %c0_i32_1 = arith.constant 0 : i32
    return %arg0, %c0_i32, %c0_i32_0 : i32, i32, i32
  }
}

module attributes {stable_mosaic.version = 11 : i64} {
  func.func @_conv1_fused_kernel(%arg0: i32, %arg1: memref<1x1x10x10x8xf32, #tpu.memory_space<vmem>>, %arg2: memref<1x8xf32, #tpu.memory_space<vmem>>, %arg3: memref<1x8xf32, #tpu.memory_space<vmem>>, %arg4: memref<9x8x8xbf16, #tpu.memory_space<vmem>>, %arg5: memref<1x8xf32, #tpu.memory_space<vmem>>, %arg6: memref<1x8xf32, #tpu.memory_space<vmem>>, %arg7: memref<1x64x8xbf16, #tpu.memory_space<vmem>>) attributes {dimension_semantics = [#tpu.dimension_semantics<parallel>], iteration_bounds = array<i64: 2>, scalar_prefetch = 0 : i64, scratch_operands = 0 : i64, tpu.core_type = #tpu.core_type<tc>, window_params = [{transform_indices = @transform_0, window_bounds = array<i64: 1, 1, 10, 10, 8>}, {pipeline_mode = #tpu.pipeline_mode<synchronous>, transform_indices = @transform_1, window_bounds = array<i64: 1, 8>}, {pipeline_mode = #tpu.pipeline_mode<synchronous>, transform_indices = @transform_2, window_bounds = array<i64: 1, 8>}, {pipeline_mode = #tpu.pipeline_mode<synchronous>, transform_indices = @transform_3, window_bounds = array<i64: 9, 8, 8>}, {pipeline_mode = #tpu.pipeline_mode<synchronous>, transform_indices = @transform_4, window_bounds = array<i64: 1, 8>}, {pipeline_mode = #tpu.pipeline_mode<synchronous>, transform_indices = @transform_5, window_bounds = array<i64: 1, 8>}, {transform_indices = @transform_6, window_bounds = array<i64: 1, 64, 8>}]} {
    %c0 = arith.constant 0 : index
    %c0_0 = arith.constant 0 : index
    %0 = vector.load %arg2[%c0, %c0_0] : memref<1x8xf32, #tpu.memory_space<vmem>>, vector<1x8xf32>
    %c0_1 = arith.constant 0 : index
    %c0_2 = arith.constant 0 : index
    %1 = vector.load %arg3[%c0_1, %c0_2] : memref<1x8xf32, #tpu.memory_space<vmem>>, vector<1x8xf32>
    %cst = arith.constant 0.000000e+00 : f32
    %2 = vector.broadcast %cst : f32 to vector<64x8xf32>
    %c0_3 = arith.constant 0 : index
    %c0_4 = arith.constant 0 : index
    %c0_5 = arith.constant 0 : index
    %c0_6 = arith.constant 0 : index
    %c0_7 = arith.constant 0 : index
    %3 = vector.load %arg1[%c0_3, %c0_4, %c0_5, %c0_6, %c0_7] : memref<1x1x10x10x8xf32, #tpu.memory_space<vmem>>, vector<1x1x8x8x8xf32>
    %4 = vector.shape_cast %3 : vector<1x1x8x8x8xf32> to vector<8x8x8xf32>
    %5 = vector.shape_cast %0 : vector<1x8xf32> to vector<1x1x8xf32>
    %6 = vector.broadcast %5 : vector<1x1x8xf32> to vector<8x8x8xf32>
    %7 = arith.mulf %4, %6 : vector<8x8x8xf32>
    %8 = vector.shape_cast %1 : vector<1x8xf32> to vector<1x1x8xf32>
    %9 = vector.broadcast %8 : vector<1x1x8xf32> to vector<8x8x8xf32>
    %10 = arith.addf %7, %9 : vector<8x8x8xf32>
    %cst_8 = arith.constant 0.000000e+00 : f32
    %11 = vector.broadcast %cst_8 : f32 to vector<8x8x8xf32>
    %12 = arith.maximumf %10, %11 : vector<8x8x8xf32>
    %13 = vector.shape_cast %12 : vector<8x8x8xf32> to vector<64x8xf32>
    %14 = arith.truncf %13 : vector<64x8xf32> to vector<64x8xbf16>
    %c0_9 = arith.constant 0 : index
    %c0_10 = arith.constant 0 : index
    %c0_11 = arith.constant 0 : index
    %15 = vector.load %arg4[%c0_9, %c0_10, %c0_11] : memref<9x8x8xbf16, #tpu.memory_space<vmem>>, vector<1x8x8xbf16>
    %16 = vector.shape_cast %15 : vector<1x8x8xbf16> to vector<8x8xbf16>
    %cst_12 = arith.constant dense<0.000000e+00> : vector<64x8xf32>
    %17 = tpu.matmul %14, %16, %cst_12 {dimension_numbers = #tpu.dot_dimension_numbers<[1], [0], [0], [1], [0, 0, 1, 1], [], []>} : vector<64x8xbf16>, vector<8x8xbf16>, vector<64x8xf32> -> vector<64x8xf32>
    %18 = arith.addf %2, %17 : vector<64x8xf32>
    %c0_13 = arith.constant 0 : index
    %c0_14 = arith.constant 0 : index
    %c0_15 = arith.constant 0 : index
    %c1 = arith.constant 1 : index
    %c0_16 = arith.constant 0 : index
    %19 = vector.load %arg1[%c0_13, %c0_14, %c0_15, %c1, %c0_16] : memref<1x1x10x10x8xf32, #tpu.memory_space<vmem>>, vector<1x1x8x8x8xf32>
    %20 = vector.shape_cast %19 : vector<1x1x8x8x8xf32> to vector<8x8x8xf32>
    %21 = vector.shape_cast %0 : vector<1x8xf32> to vector<1x1x8xf32>
    %22 = vector.broadcast %21 : vector<1x1x8xf32> to vector<8x8x8xf32>
    %23 = arith.mulf %20, %22 : vector<8x8x8xf32>
    %24 = vector.shape_cast %1 : vector<1x8xf32> to vector<1x1x8xf32>
    %25 = vector.broadcast %24 : vector<1x1x8xf32> to vector<8x8x8xf32>
    %26 = arith.addf %23, %25 : vector<8x8x8xf32>
    %cst_17 = arith.constant 0.000000e+00 : f32
    %27 = vector.broadcast %cst_17 : f32 to vector<8x8x8xf32>
    %28 = arith.maximumf %26, %27 : vector<8x8x8xf32>
    %29 = vector.shape_cast %28 : vector<8x8x8xf32> to vector<64x8xf32>
    %30 = arith.truncf %29 : vector<64x8xf32> to vector<64x8xbf16>
    %c1_18 = arith.constant 1 : index
    %c0_19 = arith.constant 0 : index
    %c0_20 = arith.constant 0 : index
    %31 = vector.load %arg4[%c1_18, %c0_19, %c0_20] : memref<9x8x8xbf16, #tpu.memory_space<vmem>>, vector<1x8x8xbf16>
    %32 = vector.shape_cast %31 : vector<1x8x8xbf16> to vector<8x8xbf16>
    %cst_21 = arith.constant dense<0.000000e+00> : vector<64x8xf32>
    %33 = tpu.matmul %30, %32, %cst_21 {dimension_numbers = #tpu.dot_dimension_numbers<[1], [0], [0], [1], [0, 0, 1, 1], [], []>} : vector<64x8xbf16>, vector<8x8xbf16>, vector<64x8xf32> -> vector<64x8xf32>
    %34 = arith.addf %18, %33 : vector<64x8xf32>
    %c0_22 = arith.constant 0 : index
    %c0_23 = arith.constant 0 : index
    %c0_24 = arith.constant 0 : index
    %c2 = arith.constant 2 : index
    %c0_25 = arith.constant 0 : index
    %35 = vector.load %arg1[%c0_22, %c0_23, %c0_24, %c2, %c0_25] : memref<1x1x10x10x8xf32, #tpu.memory_space<vmem>>, vector<1x1x8x8x8xf32>
    %36 = vector.shape_cast %35 : vector<1x1x8x8x8xf32> to vector<8x8x8xf32>
    %37 = vector.shape_cast %0 : vector<1x8xf32> to vector<1x1x8xf32>
    %38 = vector.broadcast %37 : vector<1x1x8xf32> to vector<8x8x8xf32>
    %39 = arith.mulf %36, %38 : vector<8x8x8xf32>
    %40 = vector.shape_cast %1 : vector<1x8xf32> to vector<1x1x8xf32>
    %41 = vector.broadcast %40 : vector<1x1x8xf32> to vector<8x8x8xf32>
    %42 = arith.addf %39, %41 : vector<8x8x8xf32>
    %cst_26 = arith.constant 0.000000e+00 : f32
    %43 = vector.broadcast %cst_26 : f32 to vector<8x8x8xf32>
    %44 = arith.maximumf %42, %43 : vector<8x8x8xf32>
    %45 = vector.shape_cast %44 : vector<8x8x8xf32> to vector<64x8xf32>
    %46 = arith.truncf %45 : vector<64x8xf32> to vector<64x8xbf16>
    %c2_27 = arith.constant 2 : index
    %c0_28 = arith.constant 0 : index
    %c0_29 = arith.constant 0 : index
    %47 = vector.load %arg4[%c2_27, %c0_28, %c0_29] : memref<9x8x8xbf16, #tpu.memory_space<vmem>>, vector<1x8x8xbf16>
    %48 = vector.shape_cast %47 : vector<1x8x8xbf16> to vector<8x8xbf16>
    %cst_30 = arith.constant dense<0.000000e+00> : vector<64x8xf32>
    %49 = tpu.matmul %46, %48, %cst_30 {dimension_numbers = #tpu.dot_dimension_numbers<[1], [0], [0], [1], [0, 0, 1, 1], [], []>} : vector<64x8xbf16>, vector<8x8xbf16>, vector<64x8xf32> -> vector<64x8xf32>
    %50 = arith.addf %34, %49 : vector<64x8xf32>
    %c0_31 = arith.constant 0 : index
    %c0_32 = arith.constant 0 : index
    %c1_33 = arith.constant 1 : index
    %c0_34 = arith.constant 0 : index
    %c0_35 = arith.constant 0 : index
    %51 = vector.load %arg1[%c0_31, %c0_32, %c1_33, %c0_34, %c0_35] : memref<1x1x10x10x8xf32, #tpu.memory_space<vmem>>, vector<1x1x8x8x8xf32>
    %52 = vector.shape_cast %51 : vector<1x1x8x8x8xf32> to vector<8x8x8xf32>
    %53 = vector.shape_cast %0 : vector<1x8xf32> to vector<1x1x8xf32>
    %54 = vector.broadcast %53 : vector<1x1x8xf32> to vector<8x8x8xf32>
    %55 = arith.mulf %52, %54 : vector<8x8x8xf32>
    %56 = vector.shape_cast %1 : vector<1x8xf32> to vector<1x1x8xf32>
    %57 = vector.broadcast %56 : vector<1x1x8xf32> to vector<8x8x8xf32>
    %58 = arith.addf %55, %57 : vector<8x8x8xf32>
    %cst_36 = arith.constant 0.000000e+00 : f32
    %59 = vector.broadcast %cst_36 : f32 to vector<8x8x8xf32>
    %60 = arith.maximumf %58, %59 : vector<8x8x8xf32>
    %61 = vector.shape_cast %60 : vector<8x8x8xf32> to vector<64x8xf32>
    %62 = arith.truncf %61 : vector<64x8xf32> to vector<64x8xbf16>
    %c3 = arith.constant 3 : index
    %c0_37 = arith.constant 0 : index
    %c0_38 = arith.constant 0 : index
    %63 = vector.load %arg4[%c3, %c0_37, %c0_38] : memref<9x8x8xbf16, #tpu.memory_space<vmem>>, vector<1x8x8xbf16>
    %64 = vector.shape_cast %63 : vector<1x8x8xbf16> to vector<8x8xbf16>
    %cst_39 = arith.constant dense<0.000000e+00> : vector<64x8xf32>
    %65 = tpu.matmul %62, %64, %cst_39 {dimension_numbers = #tpu.dot_dimension_numbers<[1], [0], [0], [1], [0, 0, 1, 1], [], []>} : vector<64x8xbf16>, vector<8x8xbf16>, vector<64x8xf32> -> vector<64x8xf32>
    %66 = arith.addf %50, %65 : vector<64x8xf32>
    %c0_40 = arith.constant 0 : index
    %c0_41 = arith.constant 0 : index
    %c1_42 = arith.constant 1 : index
    %c1_43 = arith.constant 1 : index
    %c0_44 = arith.constant 0 : index
    %67 = vector.load %arg1[%c0_40, %c0_41, %c1_42, %c1_43, %c0_44] : memref<1x1x10x10x8xf32, #tpu.memory_space<vmem>>, vector<1x1x8x8x8xf32>
    %68 = vector.shape_cast %67 : vector<1x1x8x8x8xf32> to vector<8x8x8xf32>
    %69 = vector.shape_cast %0 : vector<1x8xf32> to vector<1x1x8xf32>
    %70 = vector.broadcast %69 : vector<1x1x8xf32> to vector<8x8x8xf32>
    %71 = arith.mulf %68, %70 : vector<8x8x8xf32>
    %72 = vector.shape_cast %1 : vector<1x8xf32> to vector<1x1x8xf32>
    %73 = vector.broadcast %72 : vector<1x1x8xf32> to vector<8x8x8xf32>
    %74 = arith.addf %71, %73 : vector<8x8x8xf32>
    %cst_45 = arith.constant 0.000000e+00 : f32
    %75 = vector.broadcast %cst_45 : f32 to vector<8x8x8xf32>
    %76 = arith.maximumf %74, %75 : vector<8x8x8xf32>
    %77 = vector.shape_cast %76 : vector<8x8x8xf32> to vector<64x8xf32>
    %78 = arith.truncf %77 : vector<64x8xf32> to vector<64x8xbf16>
    %c4 = arith.constant 4 : index
    %c0_46 = arith.constant 0 : index
    %c0_47 = arith.constant 0 : index
    %79 = vector.load %arg4[%c4, %c0_46, %c0_47] : memref<9x8x8xbf16, #tpu.memory_space<vmem>>, vector<1x8x8xbf16>
    %80 = vector.shape_cast %79 : vector<1x8x8xbf16> to vector<8x8xbf16>
    %cst_48 = arith.constant dense<0.000000e+00> : vector<64x8xf32>
    %81 = tpu.matmul %78, %80, %cst_48 {dimension_numbers = #tpu.dot_dimension_numbers<[1], [0], [0], [1], [0, 0, 1, 1], [], []>} : vector<64x8xbf16>, vector<8x8xbf16>, vector<64x8xf32> -> vector<64x8xf32>
    %82 = arith.addf %66, %81 : vector<64x8xf32>
    %c0_49 = arith.constant 0 : index
    %c0_50 = arith.constant 0 : index
    %c1_51 = arith.constant 1 : index
    %c2_52 = arith.constant 2 : index
    %c0_53 = arith.constant 0 : index
    %83 = vector.load %arg1[%c0_49, %c0_50, %c1_51, %c2_52, %c0_53] : memref<1x1x10x10x8xf32, #tpu.memory_space<vmem>>, vector<1x1x8x8x8xf32>
    %84 = vector.shape_cast %83 : vector<1x1x8x8x8xf32> to vector<8x8x8xf32>
    %85 = vector.shape_cast %0 : vector<1x8xf32> to vector<1x1x8xf32>
    %86 = vector.broadcast %85 : vector<1x1x8xf32> to vector<8x8x8xf32>
    %87 = arith.mulf %84, %86 : vector<8x8x8xf32>
    %88 = vector.shape_cast %1 : vector<1x8xf32> to vector<1x1x8xf32>
    %89 = vector.broadcast %88 : vector<1x1x8xf32> to vector<8x8x8xf32>
    %90 = arith.addf %87, %89 : vector<8x8x8xf32>
    %cst_54 = arith.constant 0.000000e+00 : f32
    %91 = vector.broadcast %cst_54 : f32 to vector<8x8x8xf32>
    %92 = arith.maximumf %90, %91 : vector<8x8x8xf32>
    %93 = vector.shape_cast %92 : vector<8x8x8xf32> to vector<64x8xf32>
    %94 = arith.truncf %93 : vector<64x8xf32> to vector<64x8xbf16>
    %c5 = arith.constant 5 : index
    %c0_55 = arith.constant 0 : index
    %c0_56 = arith.constant 0 : index
    %95 = vector.load %arg4[%c5, %c0_55, %c0_56] : memref<9x8x8xbf16, #tpu.memory_space<vmem>>, vector<1x8x8xbf16>
    %96 = vector.shape_cast %95 : vector<1x8x8xbf16> to vector<8x8xbf16>
    %cst_57 = arith.constant dense<0.000000e+00> : vector<64x8xf32>
    %97 = tpu.matmul %94, %96, %cst_57 {dimension_numbers = #tpu.dot_dimension_numbers<[1], [0], [0], [1], [0, 0, 1, 1], [], []>} : vector<64x8xbf16>, vector<8x8xbf16>, vector<64x8xf32> -> vector<64x8xf32>
    %98 = arith.addf %82, %97 : vector<64x8xf32>
    %c0_58 = arith.constant 0 : index
    %c0_59 = arith.constant 0 : index
    %c2_60 = arith.constant 2 : index
    %c0_61 = arith.constant 0 : index
    %c0_62 = arith.constant 0 : index
    %99 = vector.load %arg1[%c0_58, %c0_59, %c2_60, %c0_61, %c0_62] : memref<1x1x10x10x8xf32, #tpu.memory_space<vmem>>, vector<1x1x8x8x8xf32>
    %100 = vector.shape_cast %99 : vector<1x1x8x8x8xf32> to vector<8x8x8xf32>
    %101 = vector.shape_cast %0 : vector<1x8xf32> to vector<1x1x8xf32>
    %102 = vector.broadcast %101 : vector<1x1x8xf32> to vector<8x8x8xf32>
    %103 = arith.mulf %100, %102 : vector<8x8x8xf32>
    %104 = vector.shape_cast %1 : vector<1x8xf32> to vector<1x1x8xf32>
    %105 = vector.broadcast %104 : vector<1x1x8xf32> to vector<8x8x8xf32>
    %106 = arith.addf %103, %105 : vector<8x8x8xf32>
    %cst_63 = arith.constant 0.000000e+00 : f32
    %107 = vector.broadcast %cst_63 : f32 to vector<8x8x8xf32>
    %108 = arith.maximumf %106, %107 : vector<8x8x8xf32>
    %109 = vector.shape_cast %108 : vector<8x8x8xf32> to vector<64x8xf32>
    %110 = arith.truncf %109 : vector<64x8xf32> to vector<64x8xbf16>
    %c6 = arith.constant 6 : index
    %c0_64 = arith.constant 0 : index
    %c0_65 = arith.constant 0 : index
    %111 = vector.load %arg4[%c6, %c0_64, %c0_65] : memref<9x8x8xbf16, #tpu.memory_space<vmem>>, vector<1x8x8xbf16>
    %112 = vector.shape_cast %111 : vector<1x8x8xbf16> to vector<8x8xbf16>
    %cst_66 = arith.constant dense<0.000000e+00> : vector<64x8xf32>
    %113 = tpu.matmul %110, %112, %cst_66 {dimension_numbers = #tpu.dot_dimension_numbers<[1], [0], [0], [1], [0, 0, 1, 1], [], []>} : vector<64x8xbf16>, vector<8x8xbf16>, vector<64x8xf32> -> vector<64x8xf32>
    %114 = arith.addf %98, %113 : vector<64x8xf32>
    %c0_67 = arith.constant 0 : index
    %c0_68 = arith.constant 0 : index
    %c2_69 = arith.constant 2 : index
    %c1_70 = arith.constant 1 : index
    %c0_71 = arith.constant 0 : index
    %115 = vector.load %arg1[%c0_67, %c0_68, %c2_69, %c1_70, %c0_71] : memref<1x1x10x10x8xf32, #tpu.memory_space<vmem>>, vector<1x1x8x8x8xf32>
    %116 = vector.shape_cast %115 : vector<1x1x8x8x8xf32> to vector<8x8x8xf32>
    %117 = vector.shape_cast %0 : vector<1x8xf32> to vector<1x1x8xf32>
    %118 = vector.broadcast %117 : vector<1x1x8xf32> to vector<8x8x8xf32>
    %119 = arith.mulf %116, %118 : vector<8x8x8xf32>
    %120 = vector.shape_cast %1 : vector<1x8xf32> to vector<1x1x8xf32>
    %121 = vector.broadcast %120 : vector<1x1x8xf32> to vector<8x8x8xf32>
    %122 = arith.addf %119, %121 : vector<8x8x8xf32>
    %cst_72 = arith.constant 0.000000e+00 : f32
    %123 = vector.broadcast %cst_72 : f32 to vector<8x8x8xf32>
    %124 = arith.maximumf %122, %123 : vector<8x8x8xf32>
    %125 = vector.shape_cast %124 : vector<8x8x8xf32> to vector<64x8xf32>
    %126 = arith.truncf %125 : vector<64x8xf32> to vector<64x8xbf16>
    %c7 = arith.constant 7 : index
    %c0_73 = arith.constant 0 : index
    %c0_74 = arith.constant 0 : index
    %127 = vector.load %arg4[%c7, %c0_73, %c0_74] : memref<9x8x8xbf16, #tpu.memory_space<vmem>>, vector<1x8x8xbf16>
    %128 = vector.shape_cast %127 : vector<1x8x8xbf16> to vector<8x8xbf16>
    %cst_75 = arith.constant dense<0.000000e+00> : vector<64x8xf32>
    %129 = tpu.matmul %126, %128, %cst_75 {dimension_numbers = #tpu.dot_dimension_numbers<[1], [0], [0], [1], [0, 0, 1, 1], [], []>} : vector<64x8xbf16>, vector<8x8xbf16>, vector<64x8xf32> -> vector<64x8xf32>
    %130 = arith.addf %114, %129 : vector<64x8xf32>
    %c0_76 = arith.constant 0 : index
    %c0_77 = arith.constant 0 : index
    %c2_78 = arith.constant 2 : index
    %c2_79 = arith.constant 2 : index
    %c0_80 = arith.constant 0 : index
    %131 = vector.load %arg1[%c0_76, %c0_77, %c2_78, %c2_79, %c0_80] : memref<1x1x10x10x8xf32, #tpu.memory_space<vmem>>, vector<1x1x8x8x8xf32>
    %132 = vector.shape_cast %131 : vector<1x1x8x8x8xf32> to vector<8x8x8xf32>
    %133 = vector.shape_cast %0 : vector<1x8xf32> to vector<1x1x8xf32>
    %134 = vector.broadcast %133 : vector<1x1x8xf32> to vector<8x8x8xf32>
    %135 = arith.mulf %132, %134 : vector<8x8x8xf32>
    %136 = vector.shape_cast %1 : vector<1x8xf32> to vector<1x1x8xf32>
    %137 = vector.broadcast %136 : vector<1x1x8xf32> to vector<8x8x8xf32>
    %138 = arith.addf %135, %137 : vector<8x8x8xf32>
    %cst_81 = arith.constant 0.000000e+00 : f32
    %139 = vector.broadcast %cst_81 : f32 to vector<8x8x8xf32>
    %140 = arith.maximumf %138, %139 : vector<8x8x8xf32>
    %141 = vector.shape_cast %140 : vector<8x8x8xf32> to vector<64x8xf32>
    %142 = arith.truncf %141 : vector<64x8xf32> to vector<64x8xbf16>
    %c8 = arith.constant 8 : index
    %c0_82 = arith.constant 0 : index
    %c0_83 = arith.constant 0 : index
    %143 = vector.load %arg4[%c8, %c0_82, %c0_83] : memref<9x8x8xbf16, #tpu.memory_space<vmem>>, vector<1x8x8xbf16>
    %144 = vector.shape_cast %143 : vector<1x8x8xbf16> to vector<8x8xbf16>
    %cst_84 = arith.constant dense<0.000000e+00> : vector<64x8xf32>
    %145 = tpu.matmul %142, %144, %cst_84 {dimension_numbers = #tpu.dot_dimension_numbers<[1], [0], [0], [1], [0, 0, 1, 1], [], []>} : vector<64x8xbf16>, vector<8x8xbf16>, vector<64x8xf32> -> vector<64x8xf32>
    %146 = arith.addf %130, %145 : vector<64x8xf32>
    %c0_85 = arith.constant 0 : index
    %c0_86 = arith.constant 0 : index
    %147 = vector.load %arg5[%c0_85, %c0_86] : memref<1x8xf32, #tpu.memory_space<vmem>>, vector<1x8xf32>
    %148 = vector.broadcast %147 : vector<1x8xf32> to vector<64x8xf32>
    %149 = arith.mulf %146, %148 : vector<64x8xf32>
    %c0_87 = arith.constant 0 : index
    %c0_88 = arith.constant 0 : index
    %150 = vector.load %arg6[%c0_87, %c0_88] : memref<1x8xf32, #tpu.memory_space<vmem>>, vector<1x8xf32>
    %151 = vector.broadcast %150 : vector<1x8xf32> to vector<64x8xf32>
    %152 = arith.addf %149, %151 : vector<64x8xf32>
    %cst_89 = arith.constant 0.000000e+00 : f32
    %153 = vector.broadcast %cst_89 : f32 to vector<64x8xf32>
    %154 = arith.maximumf %152, %153 : vector<64x8xf32>
    %155 = arith.truncf %154 : vector<64x8xf32> to vector<64x8xbf16>
    %c0_90 = arith.constant 0 : index
    %c0_91 = arith.constant 0 : index
    %c0_92 = arith.constant 0 : index
    %156 = vector.load %arg7[%c0_90, %c0_91, %c0_92] : memref<1x64x8xbf16, #tpu.memory_space<vmem>>, vector<1x64x8xbf16>
    %157 = vector.shape_cast %156 : vector<1x64x8xbf16> to vector<64x8xbf16>
    %158 = vector.shape_cast %155 : vector<64x8xbf16> to vector<1x64x8xbf16>
    tpu.vector_store %arg7[%c0_90, %c0_91, %c0_92], %158 {strides = array<i32>} : memref<1x64x8xbf16, #tpu.memory_space<vmem>>, vector<1x64x8xbf16>,
    return
  }
  func.func @transform_0(%arg0: i32) -> (i32, i32, i32, i32, i32) {
    %c0_i32 = arith.constant 0 : i32
    %c0_i32_0 = arith.constant 0 : i32
    %c0_i32_1 = arith.constant 0 : i32
    %c0_i32_2 = arith.constant 0 : i32
    %c0_i32_3 = arith.constant 0 : i32
    return %arg0, %c0_i32, %c0_i32_0, %c0_i32_1, %c0_i32_2 : i32, i32, i32, i32, i32
  }
  func.func @transform_1(%arg0: i32) -> (i32, i32) {
    %c0_i32 = arith.constant 0 : i32
    %c0_i32_0 = arith.constant 0 : i32
    %c0_i32_1 = arith.constant 0 : i32
    return %c0_i32, %c0_i32_0 : i32, i32
  }
  func.func @transform_2(%arg0: i32) -> (i32, i32) {
    %c0_i32 = arith.constant 0 : i32
    %c0_i32_0 = arith.constant 0 : i32
    %c0_i32_1 = arith.constant 0 : i32
    return %c0_i32, %c0_i32_0 : i32, i32
  }
  func.func @transform_3(%arg0: i32) -> (i32, i32, i32) {
    %c0_i32 = arith.constant 0 : i32
    %c0_i32_0 = arith.constant 0 : i32
    %c0_i32_1 = arith.constant 0 : i32
    %c0_i32_2 = arith.constant 0 : i32
    return %c0_i32, %c0_i32_0, %c0_i32_1 : i32, i32, i32
  }
  func.func @transform_4(%arg0: i32) -> (i32, i32) {
    %c0_i32 = arith.constant 0 : i32
    %c0_i32_0 = arith.constant 0 : i32
    %c0_i32_1 = arith.constant 0 : i32
    return %c0_i32, %c0_i32_0 : i32, i32
  }
  func.func @transform_5(%arg0: i32) -> (i32, i32) {
    %c0_i32 = arith.constant 0 : i32
    %c0_i32_0 = arith.constant 0 : i32
    %c0_i32_1 = arith.constant 0 : i32
    return %c0_i32, %c0_i32_0 : i32, i32
  }
  func.func @transform_6(%arg0: i32) -> (i32, i32, i32) {
    %c0_i32 = arith.constant 0 : i32
    %c0_i32_0 = arith.constant 0 : i32
    %c0_i32_1 = arith.constant 0 : i32
    return %arg0, %c0_i32, %c0_i32_0 : i32, i32, i32
  }
}

module attributes {stable_mosaic.version = 11 : i64} {
  func.func @_conv2_add_kernel(%arg0: i32, %arg1: memref<1x10x10x8xbf16, #tpu.memory_space<vmem>>, %arg2: memref<9x8x8xbf16, #tpu.memory_space<vmem>>, %arg3: memref<1x64x8xf32, #tpu.memory_space<vmem>>, %arg4: memref<1x64x8xf32, #tpu.memory_space<vmem>>) attributes {dimension_semantics = [#tpu.dimension_semantics<parallel>], iteration_bounds = array<i64: 2>, scalar_prefetch = 0 : i64, scratch_operands = 0 : i64, tpu.core_type = #tpu.core_type<tc>, window_params = [{transform_indices = @transform_0, window_bounds = array<i64: 1, 10, 10, 8>}, {pipeline_mode = #tpu.pipeline_mode<synchronous>, transform_indices = @transform_1, window_bounds = array<i64: 9, 8, 8>}, {transform_indices = @transform_2, window_bounds = array<i64: 1, 64, 8>}, {transform_indices = @transform_3, window_bounds = array<i64: 1, 64, 8>}]} {
    %c0 = arith.constant 0 : index
    %c0_0 = arith.constant 0 : index
    %c0_1 = arith.constant 0 : index
    %0 = vector.load %arg3[%c0, %c0_0, %c0_1] : memref<1x64x8xf32, #tpu.memory_space<vmem>>, vector<1x64x8xf32>
    %1 = vector.shape_cast %0 : vector<1x64x8xf32> to vector<64x8xf32>
    %c0_2 = arith.constant 0 : index
    %c0_3 = arith.constant 0 : index
    %c0_4 = arith.constant 0 : index
    %c0_5 = arith.constant 0 : index
    %2 = vector.load %arg1[%c0_2, %c0_3, %c0_4, %c0_5] : memref<1x10x10x8xbf16, #tpu.memory_space<vmem>>, vector<1x8x8x8xbf16>
    %3 = vector.shape_cast %2 : vector<1x8x8x8xbf16> to vector<8x8x8xbf16>
    %4 = vector.shape_cast %3 : vector<8x8x8xbf16> to vector<64x8xbf16>
    %c0_6 = arith.constant 0 : index
    %c0_7 = arith.constant 0 : index
    %c0_8 = arith.constant 0 : index
    %5 = vector.load %arg2[%c0_6, %c0_7, %c0_8] : memref<9x8x8xbf16, #tpu.memory_space<vmem>>, vector<1x8x8xbf16>
    %6 = vector.shape_cast %5 : vector<1x8x8xbf16> to vector<8x8xbf16>
    %cst = arith.constant dense<0.000000e+00> : vector<64x8xf32>
    %7 = tpu.matmul %4, %6, %cst {dimension_numbers = #tpu.dot_dimension_numbers<[1], [0], [0], [1], [0, 0, 1, 1], [], []>} : vector<64x8xbf16>, vector<8x8xbf16>, vector<64x8xf32> -> vector<64x8xf32>
    %8 = arith.addf %1, %7 : vector<64x8xf32>
    %c0_9 = arith.constant 0 : index
    %c0_10 = arith.constant 0 : index
    %c1 = arith.constant 1 : index
    %c0_11 = arith.constant 0 : index
    %9 = vector.load %arg1[%c0_9, %c0_10, %c1, %c0_11] : memref<1x10x10x8xbf16, #tpu.memory_space<vmem>>, vector<1x8x8x8xbf16>
    %10 = vector.shape_cast %9 : vector<1x8x8x8xbf16> to vector<8x8x8xbf16>
    %11 = vector.shape_cast %10 : vector<8x8x8xbf16> to vector<64x8xbf16>
    %c1_12 = arith.constant 1 : index
    %c0_13 = arith.constant 0 : index
    %c0_14 = arith.constant 0 : index
    %12 = vector.load %arg2[%c1_12, %c0_13, %c0_14] : memref<9x8x8xbf16, #tpu.memory_space<vmem>>, vector<1x8x8xbf16>
    %13 = vector.shape_cast %12 : vector<1x8x8xbf16> to vector<8x8xbf16>
    %cst_15 = arith.constant dense<0.000000e+00> : vector<64x8xf32>
    %14 = tpu.matmul %11, %13, %cst_15 {dimension_numbers = #tpu.dot_dimension_numbers<[1], [0], [0], [1], [0, 0, 1, 1], [], []>} : vector<64x8xbf16>, vector<8x8xbf16>, vector<64x8xf32> -> vector<64x8xf32>
    %15 = arith.addf %8, %14 : vector<64x8xf32>
    %c0_16 = arith.constant 0 : index
    %c0_17 = arith.constant 0 : index
    %c2 = arith.constant 2 : index
    %c0_18 = arith.constant 0 : index
    %16 = vector.load %arg1[%c0_16, %c0_17, %c2, %c0_18] : memref<1x10x10x8xbf16, #tpu.memory_space<vmem>>, vector<1x8x8x8xbf16>
    %17 = vector.shape_cast %16 : vector<1x8x8x8xbf16> to vector<8x8x8xbf16>
    %18 = vector.shape_cast %17 : vector<8x8x8xbf16> to vector<64x8xbf16>
    %c2_19 = arith.constant 2 : index
    %c0_20 = arith.constant 0 : index
    %c0_21 = arith.constant 0 : index
    %19 = vector.load %arg2[%c2_19, %c0_20, %c0_21] : memref<9x8x8xbf16, #tpu.memory_space<vmem>>, vector<1x8x8xbf16>
    %20 = vector.shape_cast %19 : vector<1x8x8xbf16> to vector<8x8xbf16>
    %cst_22 = arith.constant dense<0.000000e+00> : vector<64x8xf32>
    %21 = tpu.matmul %18, %20, %cst_22 {dimension_numbers = #tpu.dot_dimension_numbers<[1], [0], [0], [1], [0, 0, 1, 1], [], []>} : vector<64x8xbf16>, vector<8x8xbf16>, vector<64x8xf32> -> vector<64x8xf32>
    %22 = arith.addf %15, %21 : vector<64x8xf32>
    %c0_23 = arith.constant 0 : index
    %c1_24 = arith.constant 1 : index
    %c0_25 = arith.constant 0 : index
    %c0_26 = arith.constant 0 : index
    %23 = vector.load %arg1[%c0_23, %c1_24, %c0_25, %c0_26] : memref<1x10x10x8xbf16, #tpu.memory_space<vmem>>, vector<1x8x8x8xbf16>
    %24 = vector.shape_cast %23 : vector<1x8x8x8xbf16> to vector<8x8x8xbf16>
    %25 = vector.shape_cast %24 : vector<8x8x8xbf16> to vector<64x8xbf16>
    %c3 = arith.constant 3 : index
    %c0_27 = arith.constant 0 : index
    %c0_28 = arith.constant 0 : index
    %26 = vector.load %arg2[%c3, %c0_27, %c0_28] : memref<9x8x8xbf16, #tpu.memory_space<vmem>>, vector<1x8x8xbf16>
    %27 = vector.shape_cast %26 : vector<1x8x8xbf16> to vector<8x8xbf16>
    %cst_29 = arith.constant dense<0.000000e+00> : vector<64x8xf32>
    %28 = tpu.matmul %25, %27, %cst_29 {dimension_numbers = #tpu.dot_dimension_numbers<[1], [0], [0], [1], [0, 0, 1, 1], [], []>} : vector<64x8xbf16>, vector<8x8xbf16>, vector<64x8xf32> -> vector<64x8xf32>
    %29 = arith.addf %22, %28 : vector<64x8xf32>
    %c0_30 = arith.constant 0 : index
    %c1_31 = arith.constant 1 : index
    %c1_32 = arith.constant 1 : index
    %c0_33 = arith.constant 0 : index
    %30 = vector.load %arg1[%c0_30, %c1_31, %c1_32, %c0_33] : memref<1x10x10x8xbf16, #tpu.memory_space<vmem>>, vector<1x8x8x8xbf16>
    %31 = vector.shape_cast %30 : vector<1x8x8x8xbf16> to vector<8x8x8xbf16>
    %32 = vector.shape_cast %31 : vector<8x8x8xbf16> to vector<64x8xbf16>
    %c4 = arith.constant 4 : index
    %c0_34 = arith.constant 0 : index
    %c0_35 = arith.constant 0 : index
    %33 = vector.load %arg2[%c4, %c0_34, %c0_35] : memref<9x8x8xbf16, #tpu.memory_space<vmem>>, vector<1x8x8xbf16>
    %34 = vector.shape_cast %33 : vector<1x8x8xbf16> to vector<8x8xbf16>
    %cst_36 = arith.constant dense<0.000000e+00> : vector<64x8xf32>
    %35 = tpu.matmul %32, %34, %cst_36 {dimension_numbers = #tpu.dot_dimension_numbers<[1], [0], [0], [1], [0, 0, 1, 1], [], []>} : vector<64x8xbf16>, vector<8x8xbf16>, vector<64x8xf32> -> vector<64x8xf32>
    %36 = arith.addf %29, %35 : vector<64x8xf32>
    %c0_37 = arith.constant 0 : index
    %c1_38 = arith.constant 1 : index
    %c2_39 = arith.constant 2 : index
    %c0_40 = arith.constant 0 : index
    %37 = vector.load %arg1[%c0_37, %c1_38, %c2_39, %c0_40] : memref<1x10x10x8xbf16, #tpu.memory_space<vmem>>, vector<1x8x8x8xbf16>
    %38 = vector.shape_cast %37 : vector<1x8x8x8xbf16> to vector<8x8x8xbf16>
    %39 = vector.shape_cast %38 : vector<8x8x8xbf16> to vector<64x8xbf16>
    %c5 = arith.constant 5 : index
    %c0_41 = arith.constant 0 : index
    %c0_42 = arith.constant 0 : index
    %40 = vector.load %arg2[%c5, %c0_41, %c0_42] : memref<9x8x8xbf16, #tpu.memory_space<vmem>>, vector<1x8x8xbf16>
    %41 = vector.shape_cast %40 : vector<1x8x8xbf16> to vector<8x8xbf16>
    %cst_43 = arith.constant dense<0.000000e+00> : vector<64x8xf32>
    %42 = tpu.matmul %39, %41, %cst_43 {dimension_numbers = #tpu.dot_dimension_numbers<[1], [0], [0], [1], [0, 0, 1, 1], [], []>} : vector<64x8xbf16>, vector<8x8xbf16>, vector<64x8xf32> -> vector<64x8xf32>
    %43 = arith.addf %36, %42 : vector<64x8xf32>
    %c0_44 = arith.constant 0 : index
    %c2_45 = arith.constant 2 : index
    %c0_46 = arith.constant 0 : index
    %c0_47 = arith.constant 0 : index
    %44 = vector.load %arg1[%c0_44, %c2_45, %c0_46, %c0_47] : memref<1x10x10x8xbf16, #tpu.memory_space<vmem>>, vector<1x8x8x8xbf16>
    %45 = vector.shape_cast %44 : vector<1x8x8x8xbf16> to vector<8x8x8xbf16>
    %46 = vector.shape_cast %45 : vector<8x8x8xbf16> to vector<64x8xbf16>
    %c6 = arith.constant 6 : index
    %c0_48 = arith.constant 0 : index
    %c0_49 = arith.constant 0 : index
    %47 = vector.load %arg2[%c6, %c0_48, %c0_49] : memref<9x8x8xbf16, #tpu.memory_space<vmem>>, vector<1x8x8xbf16>
    %48 = vector.shape_cast %47 : vector<1x8x8xbf16> to vector<8x8xbf16>
    %cst_50 = arith.constant dense<0.000000e+00> : vector<64x8xf32>
    %49 = tpu.matmul %46, %48, %cst_50 {dimension_numbers = #tpu.dot_dimension_numbers<[1], [0], [0], [1], [0, 0, 1, 1], [], []>} : vector<64x8xbf16>, vector<8x8xbf16>, vector<64x8xf32> -> vector<64x8xf32>
    %50 = arith.addf %43, %49 : vector<64x8xf32>
    %c0_51 = arith.constant 0 : index
    %c2_52 = arith.constant 2 : index
    %c1_53 = arith.constant 1 : index
    %c0_54 = arith.constant 0 : index
    %51 = vector.load %arg1[%c0_51, %c2_52, %c1_53, %c0_54] : memref<1x10x10x8xbf16, #tpu.memory_space<vmem>>, vector<1x8x8x8xbf16>
    %52 = vector.shape_cast %51 : vector<1x8x8x8xbf16> to vector<8x8x8xbf16>
    %53 = vector.shape_cast %52 : vector<8x8x8xbf16> to vector<64x8xbf16>
    %c7 = arith.constant 7 : index
    %c0_55 = arith.constant 0 : index
    %c0_56 = arith.constant 0 : index
    %54 = vector.load %arg2[%c7, %c0_55, %c0_56] : memref<9x8x8xbf16, #tpu.memory_space<vmem>>, vector<1x8x8xbf16>
    %55 = vector.shape_cast %54 : vector<1x8x8xbf16> to vector<8x8xbf16>
    %cst_57 = arith.constant dense<0.000000e+00> : vector<64x8xf32>
    %56 = tpu.matmul %53, %55, %cst_57 {dimension_numbers = #tpu.dot_dimension_numbers<[1], [0], [0], [1], [0, 0, 1, 1], [], []>} : vector<64x8xbf16>, vector<8x8xbf16>, vector<64x8xf32> -> vector<64x8xf32>
    %57 = arith.addf %50, %56 : vector<64x8xf32>
    %c0_58 = arith.constant 0 : index
    %c2_59 = arith.constant 2 : index
    %c2_60 = arith.constant 2 : index
    %c0_61 = arith.constant 0 : index
    %58 = vector.load %arg1[%c0_58, %c2_59, %c2_60, %c0_61] : memref<1x10x10x8xbf16, #tpu.memory_space<vmem>>, vector<1x8x8x8xbf16>
    %59 = vector.shape_cast %58 : vector<1x8x8x8xbf16> to vector<8x8x8xbf16>
    %60 = vector.shape_cast %59 : vector<8x8x8xbf16> to vector<64x8xbf16>
    %c8 = arith.constant 8 : index
    %c0_62 = arith.constant 0 : index
    %c0_63 = arith.constant 0 : index
    %61 = vector.load %arg2[%c8, %c0_62, %c0_63] : memref<9x8x8xbf16, #tpu.memory_space<vmem>>, vector<1x8x8xbf16>
    %62 = vector.shape_cast %61 : vector<1x8x8xbf16> to vector<8x8xbf16>
    %cst_64 = arith.constant dense<0.000000e+00> : vector<64x8xf32>
    %63 = tpu.matmul %60, %62, %cst_64 {dimension_numbers = #tpu.dot_dimension_numbers<[1], [0], [0], [1], [0, 0, 1, 1], [], []>} : vector<64x8xbf16>, vector<8x8xbf16>, vector<64x8xf32> -> vector<64x8xf32>
    %64 = arith.addf %57, %63 : vector<64x8xf32>
    %c0_65 = arith.constant 0 : index
    %c0_66 = arith.constant 0 : index
    %c0_67 = arith.constant 0 : index
    %65 = vector.load %arg4[%c0_65, %c0_66, %c0_67] : memref<1x64x8xf32, #tpu.memory_space<vmem>>, vector<1x64x8xf32>
    %66 = vector.shape_cast %65 : vector<1x64x8xf32> to vector<64x8xf32>
    %67 = vector.shape_cast %64 : vector<64x8xf32> to vector<1x64x8xf32>
    tpu.vector_store %arg4[%c0_65, %c0_66, %c0_67], %67 {strides = array<i32>} : memref<1x64x8xf32, #tpu.memory_space<vmem>>, vector<1x64x8xf32>,
    return
  }
  func.func @transform_0(%arg0: i32) -> (i32, i32, i32, i32) {
    %c0_i32 = arith.constant 0 : i32
    %c0_i32_0 = arith.constant 0 : i32
    %c0_i32_1 = arith.constant 0 : i32
    %c0_i32_2 = arith.constant 0 : i32
    return %arg0, %c0_i32, %c0_i32_0, %c0_i32_1 : i32, i32, i32, i32
  }
  func.func @transform_1(%arg0: i32) -> (i32, i32, i32) {
    %c0_i32 = arith.constant 0 : i32
    %c0_i32_0 = arith.constant 0 : i32
    %c0_i32_1 = arith.constant 0 : i32
    %c0_i32_2 = arith.constant 0 : i32
    return %c0_i32, %c0_i32_0, %c0_i32_1 : i32, i32, i32
  }
  func.func @transform_2(%arg0: i32) -> (i32, i32, i32) {
    %c0_i32 = arith.constant 0 : i32
    %c0_i32_0 = arith.constant 0 : i32
    %c0_i32_1 = arith.constant 0 : i32
    return %arg0, %c0_i32, %c0_i32_0 : i32, i32, i32
  }
  func.func @transform_3(%arg0: i32) -> (i32, i32, i32) {
    %c0_i32 = arith.constant 0 : i32
    %c0_i32_0 = arith.constant 0 : i32
    %c0_i32_1 = arith.constant 0 : i32
    return %arg0, %c0_i32, %c0_i32_0 : i32, i32, i32
  }
}

</mosaic_0001>

<bundles_post_ra>
// kernel: network_block_forward.4
= control target key start
LH: loop header
LB: loop body
LE: loop exit
PB: predicated region body
PF: predicated region fallthrough
CT: control target
= control target key end

     0   :  { %s1335_s21 = smov 0   ;;  %s1848_s0 = inlined_call_operand.vmem [shape: f32[2,4,9,9,4], index: 0, kind: input, shape index: {}]   ;;  %s1849_s1 = inlined_call_operand.vmem [shape: f32[1,4], index: 1, kind: input, shape index: {}]   ;;  %s1850_s2 = inlined_call_operand.vmem [shape: f32[1,4], index: 2, kind: input, shape index: {}]   ;;  %s1851_s3 = inlined_call_operand.vmem [shape: bf16[9,4,8], index: 3, kind: input, shape index: {}]   ;;  %s1852_s4 = inlined_call_operand.vmem [shape: f32[1,8], index: 4, kind: input, shape index: {}]   ;;  %s1853_s5 = inlined_call_operand.vmem [shape: f32[1,8], index: 5, kind: input, shape index: {}]   ;;  %s1854_s6 = inlined_call_operand.vmem [shape: bf16[2,64,8], index: 6, kind: output, shape index: {}]  }
   0x1 LB: > { %s1165_s22 = sadd.s32 4294967295, %s1298_s21   ;;  %p1169_p0 = scmp.ge.s32.totalorder %s1298_s21, 1  ;;  %s1298_s21 = sphi %s1335_s21, %s16_s21  }
   0x2   : > { %p212_p1 = scmp.lt.s32.totalorder %s1298_s21, 3 }
   0x4   : > { %p213_p2 = pnand %p1169_p0, %p212_p1 }
   0x5   : > { %p242_p3 = scmp.lt.s32.totalorder (!%p213_p2), %s1165_s22, 1 }
   0x6   : > { %216 = sbr.rel (%p213_p2) target bundleno = 308 (0x134), region = 44 }
   0xb   : > { %v1181_v0 = vld [vmem:[%s1851_s3 + $0x2] sm:$0x3]  ;;  %vm350_vm0 = vcmask 1041408   ;;  %s1856_s22 = smov (!%p242_p3, %s1165_s22), 1  ;;  %v1352_v2 = vld [vmem:[%s1849_s1] ss:$0 sm:$0xff] }
   0xc   : > { %v352_v1 = vsel %vm350_vm0, %v1181_v0, 0  ;;  %v1190_v3 = vld [vmem:[%s1851_s3 + $0x4] sm:$0x3]  ;;  %v1203_v5 = vld [vmem:[%s1851_s3 + $0x6] sm:$0x3]  ;;  %s1279_s9 = smul.u32 576, %s1856_s22 }
   0xd   : > { %1276 = vmatpush.bf16.msra.mxu1 %v352_v1  ;;  %1277 = vmatpush.bf16.msra.mxu2 %v352_v1  ;;  %v478_v4 = vsel %vm350_vm0, %v1190_v3, 0  ;;  %v297_v6 = vld [vmem:[%s1851_s3] sm:$0x3]  ;;  %v569_v7 = vsel %vm350_vm0, %v1203_v5, 0  ;;  %v1216_v9 = vld [vmem:[%s1851_s3 + $0x8] sm:$0x3] }
   0xe   : > { %1278 = vmatpush.bf16.msra.mxu3 %v352_v1  ;;  %361 = vmatpush.bf16.msra.mxu0 %v352_v1  ;;  %v396_v8 = vsel %vm350_vm0, %v297_v6, 0  ;;  %v660_v10 = vsel %vm350_vm0, %v1216_v9, 0  ;;  %s1374_s14 = scalar_lea.vmem %s1848_s0, %s1279_s9  ;;  %v1379_v11 = vld [vmem:[%s1850_s2] ss:$0 sm:$0xff]  ;;  %v1242_v12 = vld [vmem:[%s1851_s3 + $0xc] sm:$0x3] }
   0xf   : > { %v1175_v13 = vld [vmem:[%s1374_s14 + $0xb0] sm:$0xff]  ;;  %v1176_v14 = vld [vmem:[%s1374_s14 + $0xc0] sm:$0xff]  ;;  %vm337_vm1 = vcmask 31744   ;;  %v841_v27 = vsel %vm350_vm0, %v1242_v12, 0  ;;  %v1255_v36 = vld [vmem:[%s1851_s3 + $0xe] sm:$0x3] }
  0x10   : > { %v1177_v15 = vld [vmem:[%s1374_s14 + $0xd0] sm:$0xff]  ;;  %v309_v16 = vmul.f32 %v1352_v2, %v1175_v13  ;;  %v310_v17 = vmul.f32 %v1352_v2, %v1176_v14  ;;  %v1178_v18 = vld [vmem:[%s1374_s14 + $0xe0] sm:$0xff]  ;;  %v1229_v42 = vld [vmem:[%s1851_s3 + $0xa] sm:$0x3]  ;;  %v932_v54 = vsel %vm350_vm0, %v1255_v36, 0  ;;  %s1275_s7 = sshll.u32 %s1856_s22, 5 }
  0x11   : > { %487 = vmatpush.bf16.msrb.mxu2 %v478_v4  ;;  %405 = vmatpush.bf16.msrb.mxu1 %v396_v8  ;;  %v311_v19 = vmul.f32 %v1352_v2, %v1177_v15  ;;  %v1179_v20 = vld [vmem:[%s1374_s14 + $0xf0] sm:$0xff]  ;;  %v1180_v21 = vld [vmem:[%s1374_s14 + $0x100] sm:$0xff]  ;;  %v312_v22 = vmul.f32 %v1352_v2, %v1178_v18  ;;  %v750_v59 = vsel %vm350_vm0, %v1229_v42, 0  ;;  %s1790_s10 = scalar_lea.vmem %s1854_s6, %s1275_s7  ;;  %vm1101_vm2 = vcmask 60416  }
  0x12   : > { %578 = vmatpush.bf16.msrb.mxu3 %v569_v7  ;;  %669 = vmatpush.bf16.msrb.mxu0 %v660_v10  ;;  %v313_v23 = vmul.f32 %v1352_v2, %v1179_v20  ;;  %v314_v24 = vmul.f32 %v1352_v2, %v1180_v21  ;;  %v1173_v25 = vld [vmem:[%s1374_s14 + $0x90] sm:$0xff]  ;;  %v1174_v26 = vld [vmem:[%s1374_s14 + $0xa0] sm:$0xff]  ;;  %v1400_v28 = vadd.f32 %v1379_v11, %v309_v16 }
  0x13   : > { %v1403_v29 = vadd.f32 %v1379_v11, %v310_v17  ;;  %v1406_v30 = vadd.f32 %v1379_v11, %v311_v19  ;;  %v307_v31 = vmul.f32 %v1352_v2, %v1173_v25  ;;  %v1410_v32 = vadd.f32 %v1379_v11, %v312_v22  ;;  %v255_v41 = vld [vmem:[%s1374_s14] sm:$0xff]  ;;  %v256_v47 = vld [vmem:[%s1374_s14 + $0x10] sm:$0xff] }
  0x14   : > { %v1413_v33 = vadd.f32 %v1379_v11, %v313_v23  ;;  %v1416_v34 = vadd.f32 %v1379_v11, %v314_v24  ;;  %v308_v35 = vmul.f32 %v1352_v2, %v1174_v26  ;;  %v325_v37 = vmax.f32 %v1400_v28, 0.0  ;;  %v427_v48 = vld [vmem:[%s1374_s14 + $0x1] sm:$0xff]  ;;  %v428_v49 = vld [vmem:[%s1374_s14 + $0x11] sm:$0xff] }
  0x15   : > { %v326_v38 = vmax.f32 %v1403_v29, 0.0  ;;  %v327_v39 = vmax.f32 %v1406_v30, 0.0  ;;  %v315_v40 = vadd.f32 %v1379_v11, %v307_v31  ;;  %v328_v43 = vmax.f32 %v1410_v32, 0.0  ;;  %v1195_v52 = vld [vmem:[%s1374_s14 + $0x120] sm:$0xff]  ;;  %v1196_v53 = vld [vmem:[%s1374_s14 + $0x130] sm:$0xff] }
  0x16   : > { %v329_v44 = vmax.f32 %v1413_v33, 0.0  ;;  %v330_v45 = vmax.f32 %v1416_v34, 0.0  ;;  %v1434_v46 = vadd.f32 %v1379_v11, %v308_v35  ;;  %v1268_v55 = vld [vmem:[%s1851_s3 + $0x10] sm:$0x3]  ;;  %v266_v60 = vmul.f32 %v1352_v2, %v255_v41  ;;  %v1209_v1 = vld [vmem:[%s1374_s14 + $0x1c0] sm:$0xff] }
  0x17   : > { %v332_v50 = vpack.c.bf16 %v326_v38, %v325_v37  ;;  %v323_v51 = vmax.f32 %v315_v40, 0.0  ;;  %v333_v56 = vpack.c.bf16 %v328_v43, %v327_v39  ;;  %v267_v61 = vmul.f32 %v1352_v2, %v256_v47  ;;  %v1208_v0 = vld [vmem:[%s1374_s14 + $0x1b0] sm:$0xff]  ;;  %v257_v35 = vld [vmem:[%s1374_s14 + $0x20] sm:$0xff] }
  0x18   : > { %v334_v57 = vpack.c.bf16 %v330_v45, %v329_v44  ;;  %v324_v58 = vmax.f32 %v1434_v46, 0.0  ;;  %v435_v62 = vmul.f32 %v1352_v2, %v427_v48  ;;  %v436_v63 = vmul.f32 %v1352_v2, %v428_v49  ;;  %v258_v36 = vld [vmem:[%s1374_s14 + $0x30] sm:$0xff]  ;;  %v429_v40 = vld [vmem:[%s1374_s14 + $0x21] sm:$0xff] }
  0x19   : > { %1183 = vmatmul.msk.bf16.vlgmr.msra.gmra.mxu1 %vm337_vm1, %v332_v50  ;;  %1184 = vmatmul.msk.bf16.vlgmr.msra.gmra.mxu2 %vm337_vm1, %v333_v56  ;;  %v526_v4 = vmul.f32 %v1352_v2, %v1195_v52  ;;  %v527_v5 = vmul.f32 %v1352_v2, %v1196_v53  ;;  %v1022_v6 = vsel %vm350_vm0, %v1268_v55, 0  ;;  %v617_v7 = vmul.f32 %v1352_v2, %v1208_v0  ;;  %v430_v41 = vld [vmem:[%s1374_s14 + $0x31] sm:$0xff]  ;;  %v1197_v42 = vld [vmem:[%s1374_s14 + $0x140] sm:$0xff] }
  0x1a   : > { %1185 = vmatmul.msk.bf16.vlgmr.msra.gmra.mxu3 %vm337_vm1, %v334_v57  ;;  %v331_v3 = vpack.c.bf16 %v324_v58, %v323_v51  ;;  %850 = vmatpush.bf16.msra.mxu2 %v841_v27  ;;  %v618_v8 = vmul.f32 %v1352_v2, %v1209_v1  ;;  %v277_v9 = vadd.f32 %v1379_v11, %v266_v60  ;;  %v1198_v47 = vld [vmem:[%s1374_s14 + $0x150] sm:$0xff]  ;;  %v1211_v53 = vld [vmem:[%s1374_s14 + $0x1e0] sm:$0xff] }
  0x1b   : > { %941 = vmatpush.bf16.msra.mxu3 %v932_v54  ;;  %759 = vmatpush.bf16.msra.mxu1 %v750_v59  ;;  %v1478_v10 = vadd.f32 %v1379_v11, %v267_v61  ;;  %v443_v12 = vadd.f32 %v1379_v11, %v435_v62  ;;  %v1482_v13 = vadd.f32 %v1379_v11, %v436_v63  ;;  %v1210_v52 = vld [vmem:[%s1374_s14 + $0x1d0] sm:$0xff] }
  0x1c   : > { %1182 = vmatmul.msk.bf16.vlgmr.msra.gmra.mxu0 %vm337_vm1, %v331_v3  ;;  %v534_v14 = vadd.f32 %v1379_v11, %v526_v4  ;;  %v535_v15 = vadd.f32 %v1379_v11, %v527_v5  ;;  %v625_v16 = vadd.f32 %v1379_v11, %v617_v7  ;;  %v626_v17 = vadd.f32 %v1379_v11, %v618_v8 }
  0x1d   : > { %1031 = vmatpush.bf16.msra.mxu0 %v1022_v6  ;;  %v285_v18 = vmax.f32 %v277_v9, 0.0  ;;  %v286_v19 = vmax.f32 %v1478_v10, 0.0  ;;  %v451_v20 = vmax.f32 %v443_v12, 0.0  ;;  %v452_v21 = vmax.f32 %v1482_v13, 0.0 }
  0x1e   : > { %v542_v22 = vmax.f32 %v534_v14, 0.0  ;;  %v543_v23 = vmax.f32 %v535_v15, 0.0  ;;  %v633_v24 = vmax.f32 %v625_v16, 0.0  ;;  %v634_v25 = vmax.f32 %v626_v17, 0.0 }
  0x1f   : > { %v293_v26 = vpack.c.bf16 %v286_v19, %v285_v18  ;;  %v459_v27 = vpack.c.bf16 %v452_v21, %v451_v20  ;;  %v268_v49 = vmul.f32 %v1352_v2, %v257_v35  ;;  %v269_v50 = vmul.f32 %v1352_v2, %v258_v36  ;;  %v259_v20 = vld [vmem:[%s1374_s14 + $0x40] sm:$0xff] }
  0x20   : > { %v550_v31 = vpack.c.bf16 %v543_v23, %v542_v22  ;;  %v641_v48 = vpack.c.bf16 %v634_v25, %v633_v24  ;;  %v437_v51 = vmul.f32 %v1352_v2, %v429_v40  ;;  %v438_v54 = vmul.f32 %v1352_v2, %v430_v41  ;;  %v260_v22 = vld [vmem:[%s1374_s14 + $0x50] sm:$0xff]  ;;  %v431_v23 = vld [vmem:[%s1374_s14 + $0x41] sm:$0xff] }
  0x21   : > { %v528_v55 = vmul.f32 %v1352_v2, %v1197_v42  ;;  %v529_v56 = vmul.f32 %v1352_v2, %v1198_v47  ;;  %v619_v57 = vmul.f32 %v1352_v2, %v1210_v52  ;;  %v620_v59 = vmul.f32 %v1352_v2, %v1211_v53  ;;  %v432_v24 = vld [vmem:[%s1374_s14 + $0x51] sm:$0xff]  ;;  %v1199_v25 = vld [vmem:[%s1374_s14 + $0x160] sm:$0xff] }
  0x22   : > { %v1515_v60 = vadd.f32 %v1379_v11, %v268_v49  ;;  %v1518_v61 = vadd.f32 %v1379_v11, %v269_v50  ;;  %v1521_v62 = vadd.f32 %v1379_v11, %v437_v51  ;;  %v1524_v63 = vadd.f32 %v1379_v11, %v438_v54  ;;  %v1212_v40 = vld [vmem:[%s1374_s14 + $0x1f0] sm:$0xff]  ;;  %v1213_v41 = vld [vmem:[%s1374_s14 + $0x200] sm:$0xff] }
  0x23   : > { %v536_v0 = vadd.f32 %v1379_v11, %v528_v55  ;;  %v537_v1 = vadd.f32 %v1379_v11, %v529_v56  ;;  %v627_v3 = vadd.f32 %v1379_v11, %v619_v57  ;;  %v628_v4 = vadd.f32 %v1379_v11, %v620_v59 }
  0x24   : > { %v287_v5 = vmax.f32 %v1515_v60, 0.0  ;;  %v288_v6 = vmax.f32 %v1518_v61, 0.0  ;;  %v453_v7 = vmax.f32 %v1521_v62, 0.0  ;;  %v454_v8 = vmax.f32 %v1524_v63, 0.0 }
  0x25   : > { %v544_v9 = vmax.f32 %v536_v0, 0.0  ;;  %v545_v12 = vmax.f32 %v537_v1, 0.0  ;;  %v635_v14 = vmax.f32 %v627_v3, 0.0  ;;  %v636_v15 = vmax.f32 %v628_v4, 0.0 }
  0x26   : > { %v294_v16 = vpack.c.bf16 %v288_v6, %v287_v5  ;;  %v460_v17 = vpack.c.bf16 %v454_v8, %v453_v7  ;;  %v271_v35 = vmul.f32 %v1352_v2, %v260_v22  ;;  %v439_v36 = vmul.f32 %v1352_v2, %v431_v23  ;;  %v262_v22 = vld [vmem:[%s1374_s14 + $0x70] sm:$0xff]  ;;  %v433_v23 = vld [vmem:[%s1374_s14 + $0x61] sm:$0xff] }
  0x27   : > { %v551_v18 = vpack.c.bf16 %v545_v12, %v544_v9  ;;  %v440_v42 = vmul.f32 %v1352_v2, %v432_v24  ;;  %v530_v47 = vmul.f32 %v1352_v2, %v1199_v25  ;;  %v621_v49 = vmul.f32 %v1352_v2, %v1212_v40  ;;  %v434_v24 = vld [vmem:[%s1374_s14 + $0x71] sm:$0xff]  ;;  %v1201_v25 = vld [vmem:[%s1374_s14 + $0x180] sm:$0xff] }
  0x28   : > { %v622_v50 = vmul.f32 %v1352_v2, %v1213_v41  ;;  %v1566_v52 = vadd.f32 %v1379_v11, %v271_v35  ;;  %v1569_v53 = vadd.f32 %v1379_v11, %v439_v36  ;;  %v273_v36 = vmul.f32 %v1352_v2, %v262_v22  ;;  %v1214_v41 = vld [vmem:[%s1374_s14 + $0x210] sm:$0xff] }
  0x29   : > { %1186 = vmatmul.msk.bf16.vlgmr.msrb.gmra.mxu1 %vm337_vm1, %v293_v26  ;;  %1191 = vmatmul.msk.bf16.vlgmr.msrb.gmra.mxu2 %vm337_vm1, %v459_v27  ;;  %v1200_v26 = vld [vmem:[%s1374_s14 + $0x170] sm:$0xff]  ;;  %v642_v27 = vpack.c.bf16 %v636_v15, %v635_v14  ;;  %v1572_v54 = vadd.f32 %v1379_v11, %v440_v42  ;;  %v538_v55 = vadd.f32 %v1379_v11, %v530_v47  ;;  %v1215_v42 = vld [vmem:[%s1374_s14 + $0x220] sm:$0xff] }
  0x2a   : > { %1204 = vmatmul.msk.bf16.vlgmr.msrb.gmra.mxu3 %vm337_vm1, %v550_v31  ;;  %v270_v31 = vmul.f32 %v1352_v2, %v259_v20  ;;  %v629_v57 = vadd.f32 %v1379_v11, %v621_v49  ;;  %v630_v59 = vadd.f32 %v1379_v11, %v622_v50  ;;  %v290_v1 = vmax.f32 %v1566_v52, 0.0  ;;  %v261_v20 = vld [vmem:[%s1374_s14 + $0x60] sm:$0xff] }
  0x2b   : > { %v455_v3 = vmax.f32 %v1569_v53, 0.0  ;;  %v456_v4 = vmax.f32 %v1572_v54, 0.0  ;;  %v546_v9 = vmax.f32 %v538_v55, 0.0  ;;  %v272_v35 = vmul.f32 %v1352_v2, %v261_v20  ;;  %v1227_v53 = vld [vmem:[%s1374_s14 + $0x181] sm:$0xff] }
  0x2c   : > { %1217 = vmatmul.msk.bf16.vlgmr.msrb.gmra.mxu0 %vm337_vm1, %v641_v48  ;;  %v531_v48 = vmul.f32 %v1352_v2, %v1200_v26  ;;  %v1563_v51 = vadd.f32 %v1379_v11, %v270_v31  ;;  %v637_v14 = vmax.f32 %v629_v57, 0.0  ;;  %v638_v15 = vmax.f32 %v630_v59, 0.0  ;;  %v1202_v26 = vld [vmem:[%s1374_s14 + $0x190] sm:$0xff]  ;;  %v1267_v52 = vld [vmem:[%s1374_s14 + $0x81] sm:$0xff] }
  0x2d   : > { %v913_v31 = vpack.c.bf16 %v325_v37, %v324_v58  ;;  %v441_v40 = vmul.f32 %v1352_v2, %v433_v23  ;;  %v442_v47 = vmul.f32 %v1352_v2, %v434_v24  ;;  %v532_v46 = vmul.f32 %v1352_v2, %v1201_v25 }
  0x2e   : > { %v539_v56 = vadd.f32 %v1379_v11, %v531_v48  ;;  %v289_v0 = vmax.f32 %v1563_v51, 0.0  ;;  %v533_v28 = vmul.f32 %v1352_v2, %v1202_v26  ;;  %v623_v37 = vmul.f32 %v1352_v2, %v1214_v41  ;;  %v1221_v26 = vld [vmem:[%s1374_s14 + $0x121] sm:$0xff] }
  0x2f   : > { %v624_v58 = vmul.f32 %v1352_v2, %v1215_v42  ;;  %v1615_v48 = vadd.f32 %v1379_v11, %v272_v35  ;;  %v1618_v49 = vadd.f32 %v1379_v11, %v273_v36  ;;  %v1621_v50 = vadd.f32 %v1379_v11, %v441_v40 }
  0x30   : > { %v547_v12 = vmax.f32 %v539_v56, 0.0  ;;  %v1624_v55 = vadd.f32 %v1379_v11, %v442_v47  ;;  %v540_v56 = vadd.f32 %v1379_v11, %v532_v46  ;;  %v541_v57 = vadd.f32 %v1379_v11, %v533_v28 }
  0x31   : > { %v631_v59 = vadd.f32 %v1379_v11, %v623_v37  ;;  %v707_v36 = vmul.f32 %v1352_v2, %v1221_v26  ;;  %v822_v37 = vpack.c.bf16 %v287_v5, %v286_v19  ;;  %v914_v5 = vpack.c.bf16 %v327_v39, %v326_v38 }
  0x32   : > { %v915_v51 = vpack.c.bf16 %v329_v44, %v328_v43  ;;  %v986_v43 = vmul.f32 %v1352_v2, %v1267_v52 }
  0x33   : > { %v639_v20 = vmax.f32 %v631_v59, 0.0  ;;  %v715_v41 = vadd.f32 %v1379_v11, %v707_v36  ;;  %v1004_v59 = vpack.c.bf16 %v455_v3, %v454_v8 }
  0x35   : > { %v723_v47 = vmax.f32 %v715_v41, 0.0 }
  0x39   : > { %1187 = vmatmul.msk.bf16.gmra.mxu1 %vm337_vm1, %v294_v16  ;;  %1192 = vmatmul.msk.bf16.gmra.mxu2 %vm337_vm1, %v460_v17  ;;  %v295_v16 = vpack.c.bf16 %v290_v1, %v289_v0  ;;  %v461_v17 = vpack.c.bf16 %v456_v4, %v455_v3  ;;  %v1241_v3 = vld [vmem:[%s1374_s14 + $0x80] sm:$0xff] }
  0x3a   : > { %1205 = vmatmul.msk.bf16.gmra.mxu3 %vm337_vm1, %v551_v18  ;;  %v552_v18 = vpack.c.bf16 %v547_v12, %v546_v9  ;;  %v632_v9 = vadd.f32 %v1379_v11, %v624_v58  ;;  %v291_v12 = vmax.f32 %v1615_v48, 0.0  ;;  %v1223_v58 = vld [vmem:[%s1374_s14 + $0x141] sm:$0xff]  ;;  %v1224_v48 = vld [vmem:[%s1374_s14 + $0x151] sm:$0xff]  ;;  %v805_v32 = vmul.f32 %v1352_v2, %v1241_v3 }
  0x3c   : > { %1218 = vmatmul.msk.bf16.gmra.mxu0 %vm337_vm1, %v642_v27  ;;  %v643_v27 = vpack.c.bf16 %v638_v15, %v637_v14  ;;  %v292_v14 = vmax.f32 %v1618_v49, 0.0  ;;  %v457_v15 = vmax.f32 %v1621_v50, 0.0  ;;  %v640_v22 = vmax.f32 %v632_v9, 0.0  ;;  %v1254_v9 = vld [vmem:[%s1374_s14 + $0x110] sm:$0xff] }
  0x3d   : > { %v1003_v50 = vpack.c.bf16 %v453_v7, %v452_v21  ;;  %v823_v21 = vpack.c.bf16 %v289_v0, %v288_v6  ;;  %v1225_v7 = vld [vmem:[%s1374_s14 + $0x161] sm:$0xff]  ;;  %v824_v8 = vpack.c.bf16 %v291_v12, %v290_v1  ;;  %v1228_v0 = vld [vmem:[%s1374_s14 + $0x191] sm:$0xff]  ;;  %v896_v33 = vmul.f32 %v1352_v2, %v1254_v9 }
  0x3e   : > { %v296_v23 = vpack.c.bf16 %v292_v14, %v291_v12  ;;  %v644_v35 = vpack.c.bf16 %v640_v22, %v639_v20  ;;  %v711_v61 = vmul.f32 %v1352_v2, %v1225_v7  ;;  %v714_v20 = vmul.f32 %v1352_v2, %v1228_v0 }
  0x3f   : > { %v813_v1 = vadd.f32 %v1379_v11, %v805_v32  ;;  %v994_v12 = vadd.f32 %v1379_v11, %v986_v43 }
  0x40   : > { %v719_v30 = vadd.f32 %v1379_v11, %v711_v61  ;;  %v722_v54 = vadd.f32 %v1379_v11, %v714_v20 }
  0x42   : > { %v727_v39 = vmax.f32 %v719_v30, 0.0  ;;  %v730_v22 = vmax.f32 %v722_v54, 0.0 }
  0x49   : > { %1188 = vmatmul.msk.bf16.gmra.mxu1 %vm337_vm1, %v295_v16  ;;  %1193 = vmatmul.msk.bf16.gmra.mxu2 %vm337_vm1, %v461_v17  ;;  %v458_v16 = vmax.f32 %v1624_v55, 0.0  ;;  %v548_v17 = vmax.f32 %v540_v56, 0.0  ;;  %v709_v56 = vmul.f32 %v1352_v2, %v1223_v58 }
  0x4a   : > { %1206 = vmatmul.msk.bf16.gmra.mxu3 %vm337_vm1, %v552_v18  ;;  %v549_v18 = vmax.f32 %v541_v57, 0.0  ;;  %v710_v57 = vmul.f32 %v1352_v2, %v1224_v48 }
  0x4b   : > { %v462_v24 = vpack.c.bf16 %v458_v16, %v457_v15  ;;  %v717_v10 = vadd.f32 %v1379_v11, %v709_v56 }
  0x4c   : > { %1219 = vmatmul.msk.bf16.gmra.mxu0 %vm337_vm1, %v643_v27  ;;  %v553_v25 = vpack.c.bf16 %v549_v18, %v548_v17  ;;  %v1222_v27 = vld [vmem:[%s1374_s14 + $0x131] sm:$0xff]  ;;  %v718_v13 = vadd.f32 %v1379_v11, %v710_v57  ;;  %v1005_v17 = vpack.c.bf16 %v457_v15, %v456_v4  ;;  %v713_v18 = vmul.f32 %v1352_v2, %v1227_v53 }
  0x4d   : > { %v708_v40 = vmul.f32 %v1352_v2, %v1222_v27  ;;  %v725_v19 = vmax.f32 %v717_v10, 0.0  ;;  %v904_v4 = vadd.f32 %v1379_v11, %v896_v33 }
  0x4e   : > { %v726_v60 = vmax.f32 %v718_v13, 0.0  ;;  %v721_v44 = vadd.f32 %v1379_v11, %v713_v18 }
  0x4f   : > { %v716_v42 = vadd.f32 %v1379_v11, %v708_v40 }
  0x50   : > { %v732_v62 = vpack.c.bf16 %v726_v60, %v725_v19  ;;  %v729_v15 = vmax.f32 %v721_v44, 0.0 }
  0x51   : > { %v724_v46 = vmax.f32 %v716_v42, 0.0 }
  0x52   : > { %v734_v26 = vpack.c.bf16 %v730_v22, %v729_v15  ;;  %v1776_v22 = vld [vmem:[%s1852_s4] ss:$0 sm:$0xff] }
  0x53   : > { %v731_v28 = vpack.c.bf16 %v724_v46, %v723_v47 }
  0x59   : > { %1189 = vmatmul.msk.bf16.gmra.mxu1 %vm337_vm1, %v296_v23  ;;  %1194 = vmatmul.msk.bf16.gmra.mxu2 %vm337_vm1, %v462_v24  ;;  %v821_v23 = vmax.f32 %v813_v1, 0.0  ;;  %v912_v24 = vmax.f32 %v904_v4, 0.0 }
  0x5a   : > { %1207 = vmatmul.msk.bf16.gmra.mxu3 %vm337_vm1, %v553_v25  ;;  %v1002_v25 = vmax.f32 %v994_v12, 0.0 }
  0x5c   : > { %1220 = vmatmul.msk.bf16.gmra.mxu0 %vm337_vm1, %v644_v35  ;;  %v916_v35 = vpack.c.bf16 %v912_v24, %v330_v45  ;;  %v1006_v36 = vpack.c.bf16 %v1002_v25, %v458_v16 }
  0x69   : > { %1230 = vmatmul.msk.bf16.vlgmr.msra.gmra.mxu1 %vm337_vm1, %v731_v28  ;;  %1243 = vmatmul.msk.bf16.vlgmr.msra.gmra.mxu2 %vm337_vm1, %v822_v37 }
  0x6a   : > { %1256 = vmatmul.msk.bf16.vlgmr.msra.gmra.mxu3 %vm337_vm1, %v913_v31  ;;  %v1226_v31 = vld [vmem:[%s1374_s14 + $0x171] sm:$0xff] }
  0x6b   : > { %v712_v29 = vmul.f32 %v1352_v2, %v1226_v31  ;;  %v825_v2 = vpack.c.bf16 %v821_v23, %v292_v14 }
  0x6c   : > { %1269 = vmatmul.msk.bf16.vlgmr.msra.gmra.mxu0 %vm337_vm1, %v1003_v50 }
  0x6d   : > { %v720_v38 = vadd.f32 %v1379_v11, %v712_v29 }
  0x6f   : > { %v728_v63 = vmax.f32 %v720_v38, 0.0 }
  0x71   : > { %v733_v6 = vpack.c.bf16 %v728_v63, %v727_v39 }
  0x79   : > { %1231 = vmatmul.msk.bf16.gmra.mxu1 %vm337_vm1, %v732_v62  ;;  %1244 = vmatmul.msk.bf16.gmra.mxu2 %vm337_vm1, %v823_v21 }
  0x7a   : > { %1257 = vmatmul.msk.bf16.gmra.mxu3 %vm337_vm1, %v914_v5 }
  0x7c   : > { %1270 = vmatmul.msk.bf16.gmra.mxu0 %vm337_vm1, %v1004_v59 }
  0x89   : > { %1232 = vmatmul.msk.bf16.gmra.mxu1 %vm337_vm1, %v733_v6  ;;  %1245 = vmatmul.msk.bf16.gmra.mxu2 %vm337_vm1, %v824_v8 }
  0x8a   : > { %1258 = vmatmul.msk.bf16.gmra.mxu3 %vm337_vm1, %v915_v51 }
  0x8c   : > { %1271 = vmatmul.msk.bf16.gmra.mxu0 %vm337_vm1, %v1005_v17 }
  0x96   : > { %v368_v27 = vpop.f32.mrf.mxu1 }
  0x99   : > { %v363_v40 = vpop.f32.mrf.mxu0  ;;  %1233 = vmatmul.msk.bf16.gmra.mxu1 %vm337_vm1, %v734_v26  ;;  %1246 = vmatmul.msk.bf16.gmra.mxu2 %vm337_vm1, %v825_v2  ;;  %v1781_v26 = vld [vmem:[%s1853_s5] ss:$0 sm:$0xff] }
  0x9a   : > { %1259 = vmatmul.msk.bf16.gmra.mxu3 %vm337_vm1, %v916_v35 }
  0x9c   : > { %1272 = vmatmul.msk.bf16.gmra.mxu0 %vm337_vm1, %v1006_v36  ;;  %v1725_v11 = vpop.f32.mrf.mxu2 }
  0x9d   : > { %v1727_v41 = vpop.f32.mrf.mxu3 }
  0x9e   : > { %v1729_v49 = vpop.f32.mrf.mxu1 }
  0xa1   : > { %v365_v34 = vpop.f32.mrf.mxu0 }
  0xa4   : > { %v1731_v45 = vpop.f32.mrf.mxu2 }
  0xa5   : > { %v1733_v55 = vpop.f32.mrf.mxu3 }
  0xa6   : > { %v407_v14 = vpop.f32.mrf.mxu1 }
  0xa7   : > { %v408_v8 = vadd.f32 %v407_v14, %v363_v40 }
  0xa9   : > { %v671_v16 = vpop.f32.mrf.mxu0 }
  0xac   : > { %v489_v42 = vpop.f32.mrf.mxu2 }
  0xad   : > { %v580_v47 = vpop.f32.mrf.mxu3  ;;  %v509_v53 = vadd.f32 %v489_v42, %v408_v8 }
  0xae   : > { %v409_v46 = vpop.f32.mrf.mxu1 }
  0xaf   : > { %v600_v9 = vadd.f32 %v580_v47, %v509_v53  ;;  %v410_v18 = vadd.f32 %v409_v46, %v365_v34 }
  0xb1   : > { %v673_v28 = vpop.f32.mrf.mxu0  ;;  %v691_v32 = vadd.f32 %v671_v16, %v600_v9 }
  0xb4   : > { %v491_v37 = vpop.f32.mrf.mxu2 }
  0xb5   : > { %v582_v58 = vpop.f32.mrf.mxu3  ;;  %v510_v52 = vadd.f32 %v491_v37, %v410_v18 }
  0xb6   : > { %v412_v48 = vpop.f32.mrf.mxu1 }
  0xb7   : > { %v601_v54 = vadd.f32 %v582_v58, %v510_v52  ;;  %v413_v12 = vadd.f32 %v412_v48, %v368_v27 }
  0xb9   : > { %v1735_v50 = vpop.f32.mrf.mxu0  ;;  %v692_v2 = vadd.f32 %v673_v28, %v601_v54 }
  0xbc   : > { %v494_v56 = vpop.f32.mrf.mxu2 }
  0xbd   : > { %v585_v57 = vpop.f32.mrf.mxu3  ;;  %v511_v24 = vadd.f32 %v494_v56, %v413_v12 }
  0xbe   : > { %v414_v10 = vpop.f32.mrf.mxu1 }
  0xbf   : > { %v602_v34 = vadd.f32 %v585_v57, %v511_v24  ;;  %v415_v47 = vadd.f32 %v414_v10, %v1729_v49 }
  0xc1   : > { %v1737_v13 = vpop.f32.mrf.mxu0  ;;  %v693_v57 = vadd.f32 %v1735_v50, %v602_v34 }
  0xc4   : > { %v496_v19 = vpop.f32.mrf.mxu2 }
  0xc5   : > { %v1739_v60 = vpop.f32.mrf.mxu3  ;;  %v512_v58 = vadd.f32 %v496_v19, %v415_v47 }
  0xc6   : > { %v1741_v62 = vpop.f32.mrf.mxu1 }
  0xc7   : > { %v603_v9 = vadd.f32 %v1739_v60, %v512_v58  ;;  %v418_v19 = vadd.f32 %v1741_v62, %v1725_v11 }
  0xc9   : > { %v1743_v21 = vpop.f32.mrf.mxu0  ;;  %v694_v54 = vadd.f32 %v1737_v13, %v603_v9 }
  0xcc   : > { %v1745_v5 = vpop.f32.mrf.mxu2 }
  0xcd   : > { %v1747_v7 = vpop.f32.mrf.mxu3 }
  0xce   : > { %v1749_v31 = vpop.f32.mrf.mxu1 }
  0xd1   : > { %v1751_v59 = vpop.f32.mrf.mxu0 }
  0xd4   : > { %v1753_v61 = vpop.f32.mrf.mxu2 }
  0xd5   : > { %v1755_v29 = vpop.f32.mrf.mxu3 }
  0xd6   : > { %v1757_v30 = vpop.f32.mrf.mxu1 }
  0xd9   : > { %v1759_v38 = vpop.f32.mrf.mxu0 }
  0xdc   : > { %v1761_v39 = vpop.f32.mrf.mxu2 }
  0xdd   : > { %v1763_v63 = vpop.f32.mrf.mxu3 }
  0xde   : > { %v1765_v6 = vpop.f32.mrf.mxu1 }
  0xe1   : > { %v1767_v51 = vpop.f32.mrf.mxu0 }
  0xe4   : > { %v1769_v0 = vpop.f32.mrf.mxu2 }
  0xe5   : > { %v1771_v3 = vpop.f32.mrf.mxu3 }
  0xe6   : > { %v761_v17 = vpop.f32.mrf.mxu1 }
  0xe7   : > { %v781_v33 = vadd.f32 %v761_v17, %v691_v32 }
  0xe9   : > { %v1033_v20 = vpop.f32.mrf.mxu0 }
  0xec   : > { %v852_v43 = vpop.f32.mrf.mxu2 }
  0xed   : > { %v943_v44 = vpop.f32.mrf.mxu3  ;;  %v872_v1 = vadd.f32 %v852_v43, %v781_v33  ;;  %v513_v33 = vadd.f32 %v1745_v5, %v418_v19  ;;  %v420_v5 = vadd.f32 %v1749_v31, %v1731_v45 }
  0xee   : > { %v763_v4 = vpop.f32.mrf.mxu1 }
  0xef   : > { %v963_v15 = vadd.f32 %v943_v44, %v872_v1  ;;  %v782_v36 = vadd.f32 %v763_v4, %v692_v2  ;;  %v514_v13 = vadd.f32 %v1753_v61, %v420_v5  ;;  %v423_v61 = vadd.f32 %v1757_v30, %v1727_v41 }
  0xf1   : > { %v1035_v23 = vpop.f32.mrf.mxu0  ;;  %v1053_v25 = vadd.f32 %v1033_v20, %v963_v15  ;;  %v604_v15 = vadd.f32 %v1747_v7, %v513_v33 }
  0xf3   : > { %v1065_v35 = vmul.f32 %v1776_v22, %v1053_v25 }
  0xf4   : > { %v854_v40 = vpop.f32.mrf.mxu2 }
  0xf5   : > { %v945_v27 = vpop.f32.mrf.mxu3  ;;  %v1077_v14 = vadd.f32 %v1781_v26, %v1065_v35  ;;  %v873_v16 = vadd.f32 %v854_v40, %v782_v36  ;;  %v695_v36 = vadd.f32 %v1743_v21, %v604_v15 }
  0xf6   : > { %v766_v42 = vpop.f32.mrf.mxu1 }
  0xf7   : > { %v1085_v46 = vmax.f32 %v1077_v14, 0.0  ;;  %v964_v37 = vadd.f32 %v945_v27, %v873_v16  ;;  %v783_v49 = vadd.f32 %v766_v42, %v693_v57  ;;  %v605_v16 = vadd.f32 %v1755_v29, %v514_v13 }
  0xf9   : > { %v1038_v28 = vpop.f32.mrf.mxu0  ;;  %v1093_v48 = vpack.c.bf16 %v1085_v46, %v1085_v46  ;;  %v1054_v56 = vadd.f32 %v1035_v23, %v964_v37  ;;  %v515_v46 = vadd.f32 %v1761_v39, %v423_v61  ;;  %v696_v58 = vadd.f32 %v1751_v59, %v605_v16 }
  0xfa   : > { %v425_v39 = vadd.f32 %v1765_v6, %v1733_v55 }
  0xfb   : > { %1102 = vst.msk [vmem:[%s1790_s10] sm:$0xf] %vm1101_vm2, %v1093_v48  ;;  %v1066_v8 = vmul.f32 %v1776_v22, %v1054_v56 }
  0xfc   : > { %v857_v10 = vpop.f32.mrf.mxu2  ;;  %v516_v9 = vadd.f32 %v1769_v0, %v425_v39 }
  0xfd   : > { %v948_v53 = vpop.f32.mrf.mxu3  ;;  %v1078_v17 = vadd.f32 %v1781_v26, %v1066_v8  ;;  %v874_v18 = vadd.f32 %v857_v10, %v783_v49  ;;  %v606_v49 = vadd.f32 %v1763_v63, %v515_v46 }
  0xfe   : > { %v768_v20 = vpop.f32.mrf.mxu1 }
  0xff   : > { %v1086_v52 = vmax.f32 %v1078_v17, 0.0  ;;  %v965_v32 = vadd.f32 %v948_v53, %v874_v18  ;;  %v784_v1 = vadd.f32 %v768_v20, %v694_v54  ;;  %v697_v20 = vadd.f32 %v1759_v38, %v606_v49 }
 0x101   : > { %v1040_v50 = vpop.f32.mrf.mxu0  ;;  %v1094_v43 = vpack.c.bf16 %v1086_v52, %v1086_v52  ;;  %v1055_v44 = vadd.f32 %v1038_v28, %v965_v32 }
 0x103   : > { %1103 = vst.msk [vmem:[%s1790_s10 + $0x4] sm:$0xf] %vm1101_vm2, %v1094_v43  ;;  %v1067_v60 = vmul.f32 %v1776_v22, %v1055_v44 }
 0x104   : > { %v859_v4 = vpop.f32.mrf.mxu2 }
 0x105   : > { %v950_v12 = vpop.f32.mrf.mxu3  ;;  %v1079_v11 = vadd.f32 %v1781_v26, %v1067_v60  ;;  %v875_v62 = vadd.f32 %v859_v4, %v784_v1 }
 0x106   : > { %v771_v23 = vpop.f32.mrf.mxu1 }
 0x107   : > { %v1087_v24 = vmax.f32 %v1079_v11, 0.0  ;;  %v966_v25 = vadd.f32 %v950_v12, %v875_v62  ;;  %v785_v27 = vadd.f32 %v771_v23, %v695_v36 }
 0x109   : > { %v1095_v2 = vpack.c.bf16 %v1087_v24, %v1087_v24  ;;  %v1056_v35 = vadd.f32 %v1040_v50, %v966_v25  ;;  %v1043_v40 = vpop.f32.mrf.mxu0  ;;  %v607_v50 = vadd.f32 %v1771_v3, %v516_v9 }
 0x10b   : > { %1104 = vst.msk [vmem:[%s1790_s10 + $0x8] sm:$0xf] %vm1101_vm2, %v1095_v2  ;;  %v1068_v7 = vmul.f32 %v1776_v22, %v1056_v35  ;;  %v698_v60 = vadd.f32 %v1767_v51, %v607_v50 }
 0x10c   : > { %v862_v34 = vpop.f32.mrf.mxu2 }
 0x10d   : > { %v953_v14 = vpop.f32.mrf.mxu3  ;;  %v1080_v45 = vadd.f32 %v1781_v26, %v1068_v7  ;;  %v876_v31 = vadd.f32 %v862_v34, %v785_v27 }
 0x10e   : > { %v773_v42 = vpop.f32.mrf.mxu1 }
 0x10f   : > { %v1088_v47 = vmax.f32 %v1080_v45, 0.0  ;;  %v967_v21 = vadd.f32 %v953_v14, %v876_v31  ;;  %v786_v29 = vadd.f32 %v773_v42, %v696_v58 }
 0x111   : > { %v1096_v37 = vpack.c.bf16 %v1088_v47, %v1088_v47  ;;  %v1057_v28 = vadd.f32 %v1043_v40, %v967_v21  ;;  %v1045_v56 = vpop.f32.mrf.mxu0 }
 0x113   : > { %1105 = vst.msk [vmem:[%s1790_s10 + $0xc] sm:$0xf] %vm1101_vm2, %v1096_v37  ;;  %v1069_v48 = vmul.f32 %v1776_v22, %v1057_v28 }
 0x114   : > { %v864_v57 = vpop.f32.mrf.mxu2 }
 0x115   : > { %v955_v8 = vpop.f32.mrf.mxu3  ;;  %v1081_v41 = vadd.f32 %v1781_v26, %v1069_v48  ;;  %v877_v30 = vadd.f32 %v864_v57, %v786_v29 }
 0x116   : > { %v776_v10 = vpop.f32.mrf.mxu1 }
 0x117   : > { %v1089_v53 = vmax.f32 %v1081_v41, 0.0  ;;  %v968_v59 = vadd.f32 %v955_v8, %v877_v30  ;;  %v787_v19 = vadd.f32 %v776_v10, %v697_v20 }
 0x119   : > { %v1097_v17 = vpack.c.bf16 %v1089_v53, %v1089_v53  ;;  %v1058_v18 = vadd.f32 %v1045_v56, %v968_v59  ;;  %v1048_v33 = vpop.f32.mrf.mxu0 }
 0x11b   : > { %1106 = vst.msk [vmem:[%s1790_s10 + $0x10] sm:$0xf] %vm1101_vm2, %v1097_v17  ;;  %v1070_v63 = vmul.f32 %v1776_v22, %v1058_v18 }
 0x11c   : > { %v867_v52 = vpop.f32.mrf.mxu2 }
 0x11d   : > { %v958_v32 = vpop.f32.mrf.mxu3  ;;  %v1082_v55 = vadd.f32 %v1781_v26, %v1070_v63  ;;  %v878_v6 = vadd.f32 %v867_v52, %v787_v19 }
 0x11e   : > { %v778_v44 = vpop.f32.mrf.mxu1 }
 0x11f   : > { %v1090_v43 = vmax.f32 %v1082_v55, 0.0  ;;  %v969_v0 = vadd.f32 %v958_v32, %v878_v6  ;;  %v788_v4 = vadd.f32 %v778_v44, %v698_v60 }
 0x121   : > { %v1098_v54 = vpack.c.bf16 %v1090_v43, %v1090_v43  ;;  %v1059_v38 = vadd.f32 %v1048_v33, %v969_v0  ;;  %v1050_v5 = vpop.f32.mrf.mxu0 }
 0x123   : > { %1107 = vst.msk [vmem:[%s1790_s10 + $0x14] sm:$0xf] %vm1101_vm2, %v1098_v54  ;;  %v1071_v1 = vmul.f32 %v1776_v22, %v1059_v38 }
 0x124   : > { %v869_v12 = vpop.f32.mrf.mxu2 }
 0x125   : > { %v1083_v3 = vadd.f32 %v1781_v26, %v1071_v1  ;;  %v879_v15 = vadd.f32 %v869_v12, %v788_v4  ;;  %v960_v11 = vpop.f32.mrf.mxu3 }
 0x127   : > { %v1091_v62 = vmax.f32 %v1083_v3, 0.0  ;;  %v970_v23 = vadd.f32 %v960_v11, %v879_v15 }
 0x129   : > { %v1099_v24 = vpack.c.bf16 %v1091_v62, %v1091_v62  ;;  %v1060_v25 = vadd.f32 %v1050_v5, %v970_v23 }
 0x12b   : > { %1108 = vst.msk [vmem:[%s1790_s10 + $0x18] sm:$0xf] %vm1101_vm2, %v1099_v24  ;;  %v1072_v51 = vmul.f32 %v1776_v22, %v1060_v25 }
 0x12d   : > { %v1084_v13 = vadd.f32 %v1781_v26, %v1072_v51 }
 0x12f   : > { %v1092_v2 = vmax.f32 %v1084_v13, 0.0 }
 0x131   : > { %v1100_v35 = vpack.c.bf16 %v1092_v2, %v1092_v2 }
 0x133   : > { %1109 = vst.msk [vmem:[%s1790_s10 + $0x1c] sm:$0xf] %vm1101_vm2, %v1100_v35 }
 0x134 PF: > { %s16_s21 = sadd.s32 1, %s1298_s21  }
 0x135   : > { %p13_p4 = scmp.ge.s32.totalorder %s16_s21, 4  }
 0x137   :  { %15 = sbr.rel (!%p13_p4) target bundleno = 1 (0x1), region = 87 }

// kernel: network_block_forward.6
= control target key start
LH: loop header
LB: loop body
LE: loop exit
PB: predicated region body
PF: predicated region fallthrough
CT: control target
= control target key end

     0   :  { %s1324_s21 = smov 0   ;;  %s1707_s0 = inlined_call_operand.vmem [shape: f32[2,1,10,10,8], index: 0, kind: input, shape index: {}]   ;;  %s1708_s1 = inlined_call_operand.vmem [shape: f32[1,8], index: 1, kind: input, shape index: {}]   ;;  %s1709_s2 = inlined_call_operand.vmem [shape: f32[1,8], index: 2, kind: input, shape index: {}]   ;;  %s1710_s3 = inlined_call_operand.vmem [shape: bf16[9,8,8], index: 3, kind: input, shape index: {}]   ;;  %s1711_s4 = inlined_call_operand.vmem [shape: f32[1,8], index: 4, kind: input, shape index: {}]   ;;  %s1712_s5 = inlined_call_operand.vmem [shape: f32[1,8], index: 5, kind: input, shape index: {}]   ;;  %s1713_s6 = inlined_call_operand.vmem [shape: bf16[2,64,8], index: 6, kind: output, shape index: {}]  }
   0x1 LB: > { %s1162_s22 = sadd.s32 4294967295, %s1287_s21   ;;  %p1166_p0 = scmp.ge.s32.totalorder %s1287_s21, 1  ;;  %s1287_s21 = sphi %s1324_s21, %s16_s21  }
   0x2   : > { %p212_p1 = scmp.lt.s32.totalorder %s1287_s21, 3 }
   0x4   : > { %p213_p2 = pnand %p1166_p0, %p212_p1 }
   0x5   : > { %p242_p3 = scmp.lt.s32.totalorder (!%p213_p2), %s1162_s22, 1 }
   0x6   : > { %216 = sbr.rel (%p213_p2) target bundleno = 308 (0x134), region = 44 }
   0xb   : > { %v1170_v0 = vld [vmem:[%s1710_s3 + $0x4] sm:$0xf]  ;;  %vm349_vm0 = vcmask 1043456   ;;  %s1715_s22 = smov (!%p242_p3, %s1162_s22), 1  ;;  %v1341_v2 = vld [vmem:[%s1708_s1] ss:$0 sm:$0xff] }
   0xc   : > { %v351_v1 = vsel %vm349_vm0, %v1170_v0, 0  ;;  %v1179_v3 = vld [vmem:[%s1710_s3 + $0x8] sm:$0xf]  ;;  %v1192_v5 = vld [vmem:[%s1710_s3 + $0xc] sm:$0xf]  ;;  %s1268_s9 = smul.u32 160, %s1715_s22 }
   0xd   : > { %1265 = vmatpush.bf16.msra.mxu1 %v351_v1  ;;  %1266 = vmatpush.bf16.msra.mxu2 %v351_v1  ;;  %v477_v4 = vsel %vm349_vm0, %v1179_v3, 0  ;;  %v297_v6 = vld [vmem:[%s1710_s3] sm:$0xf]  ;;  %v568_v7 = vsel %vm349_vm0, %v1192_v5, 0  ;;  %v1205_v9 = vld [vmem:[%s1710_s3 + $0x10] sm:$0xf] }
   0xe   : > { %1267 = vmatpush.bf16.msra.mxu3 %v351_v1  ;;  %360 = vmatpush.bf16.msra.mxu0 %v351_v1  ;;  %v395_v8 = vsel %vm349_vm0, %v297_v6, 0  ;;  %v658_v10 = vsel %vm349_vm0, %v1205_v9, 0  ;;  %v1231_v11 = vld [vmem:[%s1710_s3 + $0x18] sm:$0xf]  ;;  %s1366_s16 = scalar_lea.vmem %s1707_s0, %s1268_s9  ;;  %v1371_v12 = vld [vmem:[%s1709_s2] ss:$0 sm:$0xff] }
   0xf   : > { %v1244_v13 = vld [vmem:[%s1710_s3 + $0x1c] sm:$0xf]  ;;  %v300_v14 = vld [vmem:[%s1366_s16 + $0x21] sm:$0xff]  ;;  %v301_v15 = vld [vmem:[%s1366_s16 + $0x31] sm:$0xff]  ;;  %vm336_vm1 = vcmask 64512   ;;  %v839_v23 = vsel %vm349_vm0, %v1231_v11, 0 }
  0x10   : > { %v302_v16 = vld [vmem:[%s1366_s16 + $0x41] sm:$0xff]  ;;  %v308_v17 = vmul.f32 %v1341_v2, %v300_v14  ;;  %v309_v18 = vmul.f32 %v1341_v2, %v301_v15  ;;  %v303_v19 = vld [vmem:[%s1366_s16 + $0x51] sm:$0xff]  ;;  %v929_v29 = vsel %vm349_vm0, %v1244_v13, 0  ;;  %s1264_s7 = sshll.u32 %s1715_s22, 5  ;;  %vm1098_vm2 = vcmask 60416  }
  0x11   : > { %486 = vmatpush.bf16.msrb.mxu2 %v477_v4  ;;  %404 = vmatpush.bf16.msrb.mxu1 %v395_v8  ;;  %v310_v20 = vmul.f32 %v1341_v2, %v302_v16  ;;  %v304_v21 = vld [vmem:[%s1366_s16 + $0x61] sm:$0xff]  ;;  %v305_v22 = vld [vmem:[%s1366_s16 + $0x71] sm:$0xff]  ;;  %v311_v24 = vmul.f32 %v1341_v2, %v303_v19  ;;  %s1649_s10 = scalar_lea.vmem %s1713_s6, %s1264_s7 }
  0x12   : > { %577 = vmatpush.bf16.msrb.mxu3 %v568_v7  ;;  %667 = vmatpush.bf16.msrb.mxu0 %v658_v10  ;;  %v312_v25 = vmul.f32 %v1341_v2, %v304_v21  ;;  %v313_v26 = vmul.f32 %v1341_v2, %v305_v22  ;;  %v298_v27 = vld [vmem:[%s1366_s16 + $0x1] sm:$0xff]  ;;  %v299_v28 = vld [vmem:[%s1366_s16 + $0x11] sm:$0xff]  ;;  %v316_v30 = vadd.f32 %v1371_v12, %v308_v17 }
  0x13   : > { %v1394_v31 = vadd.f32 %v1371_v12, %v309_v18  ;;  %v1397_v32 = vadd.f32 %v1371_v12, %v310_v20  ;;  %v306_v33 = vmul.f32 %v1341_v2, %v298_v27  ;;  %v1401_v34 = vadd.f32 %v1371_v12, %v311_v24  ;;  %v1218_v38 = vld [vmem:[%s1710_s3 + $0x14] sm:$0xf]  ;;  %v255_v43 = vld [vmem:[%s1366_s16] sm:$0xff] }
  0x14   : > { %v1404_v35 = vadd.f32 %v1371_v12, %v312_v25  ;;  %v1407_v36 = vadd.f32 %v1371_v12, %v313_v26  ;;  %v307_v37 = vmul.f32 %v1341_v2, %v299_v28  ;;  %v324_v39 = vmax.f32 %v316_v30, 0.0  ;;  %v256_v44 = vld [vmem:[%s1366_s16 + $0x10] sm:$0xff]  ;;  %v426_v45 = vld [vmem:[%s1366_s16 + $0x2] sm:$0xff] }
  0x15   : > { %v325_v40 = vmax.f32 %v1394_v31, 0.0  ;;  %v326_v41 = vmax.f32 %v1397_v32, 0.0  ;;  %v314_v42 = vadd.f32 %v1371_v12, %v306_v33  ;;  %v327_v46 = vmax.f32 %v1401_v34, 0.0  ;;  %v427_v50 = vld [vmem:[%s1366_s16 + $0x12] sm:$0xff]  ;;  %v1185_v53 = vld [vmem:[%s1366_s16 + $0x20] sm:$0xff] }
  0x16   : > { %v328_v47 = vmax.f32 %v1404_v35, 0.0  ;;  %v329_v48 = vmax.f32 %v1407_v36, 0.0  ;;  %v315_v49 = vadd.f32 %v1371_v12, %v307_v37  ;;  %v1257_v54 = vld [vmem:[%s1710_s3 + $0x20] sm:$0xf]  ;;  %v748_v58 = vsel %vm349_vm0, %v1218_v38, 0  ;;  %v258_v17 = vld [vmem:[%s1366_s16 + $0x30] sm:$0xff] }
  0x17   : > { %v1426_v51 = vpack.c.bf16 %v325_v40, %v324_v39  ;;  %v322_v52 = vmax.f32 %v314_v42, 0.0  ;;  %v1436_v55 = vpack.c.bf16 %v327_v46, %v326_v41  ;;  %v266_v59 = vmul.f32 %v1341_v2, %v255_v43  ;;  %v428_v18 = vld [vmem:[%s1366_s16 + $0x22] sm:$0xff]  ;;  %v429_v19 = vld [vmem:[%s1366_s16 + $0x32] sm:$0xff] }
  0x18   : > { %v1442_v56 = vpack.c.bf16 %v329_v48, %v328_v47  ;;  %v323_v57 = vmax.f32 %v315_v49, 0.0  ;;  %v267_v60 = vmul.f32 %v1341_v2, %v256_v44  ;;  %v434_v61 = vmul.f32 %v1341_v2, %v426_v45  ;;  %v1187_v20 = vld [vmem:[%s1366_s16 + $0x40] sm:$0xff]  ;;  %v260_v44 = vld [vmem:[%s1366_s16 + $0x50] sm:$0xff] }
  0x19   : > { %1172 = vmatmul.msk.bf16.vlgmr.msra.gmra.mxu1 %vm336_vm1, %v1426_v51  ;;  %v435_v62 = vmul.f32 %v1341_v2, %v427_v50  ;;  %1173 = vmatmul.msk.bf16.vlgmr.msra.gmra.mxu2 %vm336_vm1, %v1436_v55  ;;  %v526_v0 = vmul.f32 %v1341_v2, %v1185_v53  ;;  %v1019_v1 = vsel %vm349_vm0, %v1257_v54, 0  ;;  %v277_v3 = vadd.f32 %v1371_v12, %v266_v59  ;;  %v430_v45 = vld [vmem:[%s1366_s16 + $0x42] sm:$0xff]  ;;  %v431_v49 = vld [vmem:[%s1366_s16 + $0x52] sm:$0xff] }
  0x1a   : > { %1174 = vmatmul.msk.bf16.vlgmr.msra.gmra.mxu3 %vm336_vm1, %v1442_v56  ;;  %v330_v63 = vpack.c.bf16 %v323_v57, %v322_v52  ;;  %848 = vmatpush.bf16.msra.mxu2 %v839_v23  ;;  %v278_v4 = vadd.f32 %v1371_v12, %v267_v60  ;;  %v442_v5 = vadd.f32 %v1371_v12, %v434_v61  ;;  %v1189_v50 = vld [vmem:[%s1366_s16 + $0x60] sm:$0xff] }
  0x1b   : > { %938 = vmatpush.bf16.msra.mxu3 %v929_v29  ;;  %757 = vmatpush.bf16.msra.mxu1 %v748_v58  ;;  %v1462_v6 = vadd.f32 %v1371_v12, %v435_v62  ;;  %v534_v7 = vadd.f32 %v1371_v12, %v526_v0  ;;  %v285_v8 = vmax.f32 %v277_v3, 0.0  ;;  %v639_v21 = vpack.c.bf16 %v324_v39, %v323_v57  ;;  %v262_v3 = vld [vmem:[%s1366_s16 + $0x70] sm:$0xff] }
  0x1c   : > { %1171 = vmatmul.msk.bf16.vlgmr.msra.gmra.mxu0 %vm336_vm1, %v330_v63  ;;  %v286_v9 = vmax.f32 %v278_v4, 0.0  ;;  %v450_v10 = vmax.f32 %v442_v5, 0.0  ;;  %v269_v22 = vmul.f32 %v1341_v2, %v258_v17  ;;  %v436_v23 = vmul.f32 %v1341_v2, %v428_v18  ;;  %v432_v4 = vld [vmem:[%s1366_s16 + $0x62] sm:$0xff]  ;;  %v433_v5 = vld [vmem:[%s1366_s16 + $0x72] sm:$0xff] }
  0x1d   : > { %1028 = vmatpush.bf16.msra.mxu0 %v1019_v1  ;;  %v451_v11 = vmax.f32 %v1462_v6, 0.0  ;;  %v542_v13 = vmax.f32 %v534_v7, 0.0  ;;  %v437_v24 = vmul.f32 %v1341_v2, %v429_v19  ;;  %v528_v25 = vmul.f32 %v1341_v2, %v1187_v20  ;;  %v1191_v7 = vld [vmem:[%s1366_s16 + $0x80] sm:$0xff] }
  0x1e   : > { %v293_v14 = vpack.c.bf16 %v286_v9, %v285_v8  ;;  %v280_v26 = vadd.f32 %v1371_v12, %v269_v22  ;;  %v1482_v27 = vadd.f32 %v1371_v12, %v436_v23  ;;  %v640_v52 = vpack.c.bf16 %v326_v41, %v325_v40  ;;  %v1217_v6 = vld [vmem:[%s1366_s16 + $0x82] sm:$0xff] }
  0x1f   : > { %v458_v15 = vpack.c.bf16 %v451_v11, %v450_v10  ;;  %v549_v16 = vpack.c.bf16 %v542_v13, %v286_v9  ;;  %v1485_v28 = vadd.f32 %v1371_v12, %v437_v24  ;;  %v536_v29 = vadd.f32 %v1371_v12, %v528_v25 }
  0x20   : > { %v288_v30 = vmax.f32 %v280_v26, 0.0  ;;  %v452_v33 = vmax.f32 %v1482_v27, 0.0  ;;  %v271_v53 = vmul.f32 %v1341_v2, %v260_v44  ;;  %v438_v54 = vmul.f32 %v1341_v2, %v430_v45  ;;  %v1243_v27 = vld [vmem:[%s1366_s16 + $0x91] sm:$0xff] }
  0x21   : > { %v453_v37 = vmax.f32 %v1485_v28, 0.0  ;;  %v544_v38 = vmax.f32 %v536_v29, 0.0  ;;  %v439_v57 = vmul.f32 %v1341_v2, %v431_v49  ;;  %v530_v31 = vmul.f32 %v1341_v2, %v1189_v50 }
  0x22   : > { %v294_v39 = vpack.c.bf16 %v288_v30, %v542_v13  ;;  %v282_v32 = vadd.f32 %v1371_v12, %v271_v53  ;;  %v446_v40 = vadd.f32 %v1371_v12, %v438_v54  ;;  %v641_v8 = vpack.c.bf16 %v328_v47, %v327_v46  ;;  %v1204_v13 = vld [vmem:[%s1366_s16 + $0x81] sm:$0xff] }
  0x23   : > { %v1494_v42 = vpack.c.bf16 %v453_v37, %v452_v33  ;;  %v550_v43 = vpack.c.bf16 %v544_v38, %v288_v30  ;;  %v447_v41 = vadd.f32 %v1371_v12, %v439_v57  ;;  %v538_v58 = vadd.f32 %v1371_v12, %v530_v31  ;;  %v1256_v30 = vld [vmem:[%s1366_s16 + $0x92] sm:$0xff] }
  0x24   : > { %v290_v59 = vmax.f32 %v282_v32, 0.0  ;;  %v454_v60 = vmax.f32 %v446_v40, 0.0  ;;  %v273_v9 = vmul.f32 %v1341_v2, %v262_v3  ;;  %v440_v10 = vmul.f32 %v1341_v2, %v432_v4 }
  0x25   : > { %v455_v61 = vmax.f32 %v447_v41, 0.0  ;;  %v546_v62 = vmax.f32 %v538_v58, 0.0  ;;  %v622_v34 = vmul.f32 %v1341_v2, %v1204_v13  ;;  %v729_v29 = vpack.c.bf16 %v452_v33, %v451_v11  ;;  %v1230_v11 = vld [vmem:[%s1366_s16 + $0x90] sm:$0xff] }
  0x26   : > { %v295_v63 = vpack.c.bf16 %v290_v59, %v544_v38  ;;  %v284_v35 = vadd.f32 %v1371_v12, %v273_v9  ;;  %v448_v46 = vadd.f32 %v1371_v12, %v440_v10  ;;  %v730_v36 = vpack.c.bf16 %v454_v60, %v453_v37 }
  0x27   : > { %v460_v0 = vpack.c.bf16 %v455_v61, %v454_v60  ;;  %v551_v1 = vpack.c.bf16 %v546_v62, %v290_v59  ;;  %v630_v17 = vadd.f32 %v1371_v12, %v622_v34  ;;  %v803_v28 = vmul.f32 %v1341_v2, %v1230_v11 }
  0x28   : > { %v292_v18 = vmax.f32 %v284_v35, 0.0  ;;  %v456_v19 = vmax.f32 %v448_v46, 0.0  ;;  %v983_v33 = vmul.f32 %v1341_v2, %v1256_v30 }
  0x29   : > { %1175 = vmatmul.msk.bf16.vlgmr.msrb.gmra.mxu1 %vm336_vm1, %v293_v14  ;;  %1180 = vmatmul.msk.bf16.vlgmr.msrb.gmra.mxu2 %vm336_vm1, %v458_v15  ;;  %v441_v14 = vmul.f32 %v1341_v2, %v433_v5  ;;  %v532_v15 = vmul.f32 %v1341_v2, %v1191_v7  ;;  %v638_v22 = vmax.f32 %v630_v17, 0.0  ;;  %v811_v38 = vadd.f32 %v1371_v12, %v803_v28 }
  0x2a   : > { %1193 = vmatmul.msk.bf16.vlgmr.msrb.gmra.mxu3 %vm336_vm1, %v549_v16  ;;  %v296_v23 = vpack.c.bf16 %v292_v18, %v546_v62 }
  0x2b   : > { %v449_v47 = vadd.f32 %v1371_v12, %v441_v14  ;;  %v540_v16 = vadd.f32 %v1371_v12, %v532_v15  ;;  %v642_v26 = vpack.c.bf16 %v638_v22, %v329_v48  ;;  %v731_v48 = vpack.c.bf16 %v456_v19, %v455_v61 }
  0x2c   : > { %1206 = vmatmul.msk.bf16.vlgmr.msrb.gmra.mxu0 %vm336_vm1, %v639_v21  ;;  %v819_v44 = vmax.f32 %v811_v38, 0.0 }
  0x2d   : > { %v457_v20 = vmax.f32 %v449_v47, 0.0  ;;  %v548_v21 = vmax.f32 %v540_v16, 0.0 }
  0x2f   : > { %v461_v24 = vpack.c.bf16 %v457_v20, %v456_v19  ;;  %v552_v25 = vpack.c.bf16 %v548_v21, %v292_v18 }
  0x39   : > { %1176 = vmatmul.msk.bf16.gmra.mxu1 %vm336_vm1, %v294_v39  ;;  %1181 = vmatmul.msk.bf16.gmra.mxu2 %vm336_vm1, %v1494_v42 }
  0x3a   : > { %1194 = vmatmul.msk.bf16.gmra.mxu3 %vm336_vm1, %v550_v43 }
  0x3c   : > { %1207 = vmatmul.msk.bf16.gmra.mxu0 %vm336_vm1, %v640_v52  ;;  %v823_v52 = vpack.c.bf16 %v819_v44, %v548_v21 }
  0x49   : > { %1177 = vmatmul.msk.bf16.gmra.mxu1 %vm336_vm1, %v295_v63  ;;  %1182 = vmatmul.msk.bf16.gmra.mxu2 %vm336_vm1, %v460_v0 }
  0x4a   : > { %1195 = vmatmul.msk.bf16.gmra.mxu3 %vm336_vm1, %v551_v1 }
  0x4c   : > { %1208 = vmatmul.msk.bf16.gmra.mxu0 %vm336_vm1, %v641_v8 }
  0x59   : > { %1178 = vmatmul.msk.bf16.gmra.mxu1 %vm336_vm1, %v296_v23  ;;  %1183 = vmatmul.msk.bf16.gmra.mxu2 %vm336_vm1, %v461_v24 }
  0x5a   : > { %1196 = vmatmul.msk.bf16.gmra.mxu3 %vm336_vm1, %v552_v25 }
  0x5c   : > { %1209 = vmatmul.msk.bf16.gmra.mxu0 %vm336_vm1, %v642_v26 }
  0x69   : > { %1219 = vmatmul.msk.bf16.vlgmr.msra.gmra.mxu1 %vm336_vm1, %v729_v29  ;;  %1232 = vmatmul.msk.bf16.vlgmr.msra.gmra.mxu2 %vm336_vm1, %v294_v39 }
  0x6a   : > { %1245 = vmatmul.msk.bf16.vlgmr.msra.gmra.mxu3 %vm336_vm1, %v1426_v51  ;;  %v712_v51 = vmul.f32 %v1341_v2, %v1217_v6 }
  0x6c   : > { %1258 = vmatmul.msk.bf16.vlgmr.msra.gmra.mxu0 %vm336_vm1, %v1494_v42  ;;  %v720_v37 = vadd.f32 %v1371_v12, %v712_v51  ;;  %v991_v42 = vadd.f32 %v1371_v12, %v983_v33 }
  0x6e   : > { %v728_v43 = vmax.f32 %v720_v37, 0.0 }
  0x70   : > { %v732_v49 = vpack.c.bf16 %v728_v43, %v457_v20 }
  0x79   : > { %1220 = vmatmul.msk.bf16.gmra.mxu1 %vm336_vm1, %v730_v36  ;;  %1233 = vmatmul.msk.bf16.gmra.mxu2 %vm336_vm1, %v295_v63 }
  0x7a   : > { %1246 = vmatmul.msk.bf16.gmra.mxu3 %vm336_vm1, %v1436_v55  ;;  %v893_v55 = vmul.f32 %v1341_v2, %v1243_v27 }
  0x7c   : > { %1259 = vmatmul.msk.bf16.gmra.mxu0 %vm336_vm1, %v460_v0  ;;  %v901_v39 = vadd.f32 %v1371_v12, %v893_v55 }
  0x7e   : > { %v909_v45 = vmax.f32 %v901_v39, 0.0 }
  0x80   : > { %v913_v53 = vpack.c.bf16 %v909_v45, %v638_v22 }
  0x89   : > { %1221 = vmatmul.msk.bf16.gmra.mxu1 %vm336_vm1, %v731_v48  ;;  %1234 = vmatmul.msk.bf16.gmra.mxu2 %vm336_vm1, %v296_v23 }
  0x8a   : > { %1247 = vmatmul.msk.bf16.gmra.mxu3 %vm336_vm1, %v1442_v56  ;;  %v999_v56 = vmax.f32 %v991_v42, 0.0 }
  0x8c   : > { %1260 = vmatmul.msk.bf16.gmra.mxu0 %vm336_vm1, %v461_v24  ;;  %v1003_v54 = vpack.c.bf16 %v999_v56, %v728_v43  ;;  %v1635_v43 = vld [vmem:[%s1711_s4] ss:$0 sm:$0xff] }
  0x96   : > { %v367_v50 = vpop.f32.mrf.mxu1 }
  0x99   : > { %v362_v57 = vpop.f32.mrf.mxu0  ;;  %1222 = vmatmul.msk.bf16.gmra.mxu1 %vm336_vm1, %v732_v49  ;;  %1235 = vmatmul.msk.bf16.gmra.mxu2 %vm336_vm1, %v823_v52  ;;  %v1640_v49 = vld [vmem:[%s1712_s5] ss:$0 sm:$0xff] }
  0x9a   : > { %1248 = vmatmul.msk.bf16.gmra.mxu3 %vm336_vm1, %v913_v53 }
  0x9c   : > { %1261 = vmatmul.msk.bf16.gmra.mxu0 %vm336_vm1, %v1003_v54  ;;  %v1584_v2 = vpop.f32.mrf.mxu2 }
  0x9d   : > { %v1586_v12 = vpop.f32.mrf.mxu3 }
  0x9e   : > { %v1588_v31 = vpop.f32.mrf.mxu1 }
  0xa1   : > { %v364_v32 = vpop.f32.mrf.mxu0 }
  0xa4   : > { %v1590_v40 = vpop.f32.mrf.mxu2 }
  0xa5   : > { %v1592_v41 = vpop.f32.mrf.mxu3 }
  0xa6   : > { %v406_v58 = vpop.f32.mrf.mxu1 }
  0xa7   : > { %v407_v23 = vadd.f32 %v406_v58, %v362_v57 }
  0xa9   : > { %v669_v59 = vpop.f32.mrf.mxu0 }
  0xac   : > { %v488_v60 = vpop.f32.mrf.mxu2 }
  0xad   : > { %v579_v61 = vpop.f32.mrf.mxu3  ;;  %v508_v25 = vadd.f32 %v488_v60, %v407_v23 }
  0xae   : > { %v408_v62 = vpop.f32.mrf.mxu1 }
  0xaf   : > { %v599_v36 = vadd.f32 %v579_v61, %v508_v25  ;;  %v409_v6 = vadd.f32 %v408_v62, %v364_v32 }
  0xb1   : > { %v671_v63 = vpop.f32.mrf.mxu0  ;;  %v689_v51 = vadd.f32 %v669_v59, %v599_v36 }
  0xb4   : > { %v490_v0 = vpop.f32.mrf.mxu2 }
  0xb5   : > { %v581_v1 = vpop.f32.mrf.mxu3  ;;  %v509_v27 = vadd.f32 %v490_v0, %v409_v6 }
  0xb6   : > { %v411_v3 = vpop.f32.mrf.mxu1 }
  0xb7   : > { %v600_v33 = vadd.f32 %v581_v1, %v509_v27  ;;  %v412_v39 = vadd.f32 %v411_v3, %v367_v50 }
  0xb9   : > { %v1594_v4 = vpop.f32.mrf.mxu0  ;;  %v690_v52 = vadd.f32 %v671_v63, %v600_v33 }
  0xbc   : > { %v493_v5 = vpop.f32.mrf.mxu2 }
  0xbd   : > { %v584_v7 = vpop.f32.mrf.mxu3  ;;  %v510_v45 = vadd.f32 %v493_v5, %v412_v39 }
  0xbe   : > { %v413_v8 = vpop.f32.mrf.mxu1 }
  0xbf   : > { %v601_v32 = vadd.f32 %v584_v7, %v510_v45  ;;  %v414_v61 = vadd.f32 %v413_v8, %v1588_v31 }
  0xc1   : > { %v1596_v9 = vpop.f32.mrf.mxu0  ;;  %v691_v7 = vadd.f32 %v1594_v4, %v601_v32 }
  0xc4   : > { %v495_v10 = vpop.f32.mrf.mxu2 }
  0xc5   : > { %v1598_v13 = vpop.f32.mrf.mxu3  ;;  %v511_v1 = vadd.f32 %v495_v10, %v414_v61 }
  0xc6   : > { %v1600_v14 = vpop.f32.mrf.mxu1 }
  0xc7   : > { %v602_v36 = vadd.f32 %v1598_v13, %v511_v1  ;;  %v417_v10 = vadd.f32 %v1600_v14, %v1584_v2 }
  0xc9   : > { %v1602_v15 = vpop.f32.mrf.mxu0  ;;  %v692_v33 = vadd.f32 %v1596_v9, %v602_v36 }
  0xcc   : > { %v1604_v34 = vpop.f32.mrf.mxu2 }
  0xcd   : > { %v1606_v35 = vpop.f32.mrf.mxu3 }
  0xce   : > { %v1608_v46 = vpop.f32.mrf.mxu1 }
  0xd1   : > { %v1610_v47 = vpop.f32.mrf.mxu0 }
  0xd4   : > { %v1612_v16 = vpop.f32.mrf.mxu2 }
  0xd5   : > { %v1614_v17 = vpop.f32.mrf.mxu3 }
  0xd6   : > { %v1616_v18 = vpop.f32.mrf.mxu1 }
  0xd9   : > { %v1618_v19 = vpop.f32.mrf.mxu0 }
  0xdc   : > { %v1620_v20 = vpop.f32.mrf.mxu2 }
  0xdd   : > { %v1622_v21 = vpop.f32.mrf.mxu3 }
  0xde   : > { %v1624_v22 = vpop.f32.mrf.mxu1 }
  0xe1   : > { %v1626_v24 = vpop.f32.mrf.mxu0 }
  0xe4   : > { %v1628_v26 = vpop.f32.mrf.mxu2 }
  0xe5   : > { %v1630_v29 = vpop.f32.mrf.mxu3 }
  0xe6   : > { %v759_v48 = vpop.f32.mrf.mxu1 }
  0xe7   : > { %v779_v30 = vadd.f32 %v759_v48, %v689_v51 }
  0xe9   : > { %v1030_v11 = vpop.f32.mrf.mxu0 }
  0xec   : > { %v850_v28 = vpop.f32.mrf.mxu2 }
  0xed   : > { %v940_v55 = vpop.f32.mrf.mxu3  ;;  %v870_v37 = vadd.f32 %v850_v28, %v779_v30  ;;  %v512_v30 = vadd.f32 %v1604_v34, %v417_v10  ;;  %v419_v34 = vadd.f32 %v1608_v46, %v1590_v40 }
  0xee   : > { %v761_v38 = vpop.f32.mrf.mxu1 }
  0xef   : > { %v960_v42 = vadd.f32 %v940_v55, %v870_v37  ;;  %v780_v54 = vadd.f32 %v761_v38, %v690_v52  ;;  %v513_v9 = vadd.f32 %v1612_v16, %v419_v34  ;;  %v422_v16 = vadd.f32 %v1616_v18, %v1586_v12 }
  0xf1   : > { %v1032_v44 = vpop.f32.mrf.mxu0  ;;  %v1050_v56 = vadd.f32 %v1030_v11, %v960_v42  ;;  %v603_v42 = vadd.f32 %v1606_v35, %v512_v30 }
  0xf3   : > { %v1062_v53 = vmul.f32 %v1635_v43, %v1050_v56 }
  0xf4   : > { %v852_v57 = vpop.f32.mrf.mxu2 }
  0xf5   : > { %v942_v50 = vpop.f32.mrf.mxu3  ;;  %v1074_v58 = vadd.f32 %v1640_v49, %v1062_v53  ;;  %v871_v59 = vadd.f32 %v852_v57, %v780_v54  ;;  %v693_v54 = vadd.f32 %v1602_v15, %v603_v42 }
  0xf6   : > { %v764_v60 = vpop.f32.mrf.mxu1 }
  0xf7   : > { %v1082_v62 = vmax.f32 %v1074_v58, 0.0  ;;  %v961_v0 = vadd.f32 %v942_v50, %v871_v59  ;;  %v781_v31 = vadd.f32 %v764_v60, %v691_v7  ;;  %v604_v59 = vadd.f32 %v1614_v17, %v513_v9 }
  0xf9   : > { %v1035_v63 = vpop.f32.mrf.mxu0  ;;  %v1090_v3 = vpack.c.bf16 %v1082_v62, %v1082_v62  ;;  %v1051_v5 = vadd.f32 %v1032_v44, %v961_v0  ;;  %v514_v62 = vadd.f32 %v1620_v20, %v422_v16  ;;  %v694_v1 = vadd.f32 %v1610_v47, %v604_v59 }
  0xfa   : > { %v424_v20 = vadd.f32 %v1624_v22, %v1592_v41 }
  0xfb   : > { %1099 = vst.msk [vmem:[%s1649_s10] sm:$0xf] %vm1098_vm2, %v1090_v3  ;;  %v1063_v23 = vmul.f32 %v1635_v43, %v1051_v5 }
  0xfc   : > { %v855_v8 = vpop.f32.mrf.mxu2  ;;  %v515_v36 = vadd.f32 %v1628_v26, %v424_v20 }
  0xfd   : > { %v945_v25 = vpop.f32.mrf.mxu3  ;;  %v1075_v48 = vadd.f32 %v1640_v49, %v1063_v23  ;;  %v872_v6 = vadd.f32 %v855_v8, %v781_v31  ;;  %v605_v31 = vadd.f32 %v1622_v21, %v514_v62 }
  0xfe   : > { %v766_v11 = vpop.f32.mrf.mxu1 }
  0xff   : > { %v1083_v27 = vmax.f32 %v1075_v48, 0.0  ;;  %v962_v51 = vadd.f32 %v945_v25, %v872_v6  ;;  %v782_v37 = vadd.f32 %v766_v11, %v692_v33  ;;  %v695_v11 = vadd.f32 %v1618_v19, %v605_v31 }
 0x101   : > { %v1037_v4 = vpop.f32.mrf.mxu0  ;;  %v1091_v28 = vpack.c.bf16 %v1083_v27, %v1083_v27  ;;  %v1052_v55 = vadd.f32 %v1035_v63, %v962_v51 }
 0x103   : > { %1100 = vst.msk [vmem:[%s1649_s10 + $0x4] sm:$0xf] %vm1098_vm2, %v1091_v28  ;;  %v1064_v13 = vmul.f32 %v1635_v43, %v1052_v55 }
 0x104   : > { %v857_v38 = vpop.f32.mrf.mxu2 }
 0x105   : > { %v947_v39 = vpop.f32.mrf.mxu3  ;;  %v1076_v2 = vadd.f32 %v1640_v49, %v1064_v13  ;;  %v873_v14 = vadd.f32 %v857_v38, %v782_v37 }
 0x106   : > { %v769_v44 = vpop.f32.mrf.mxu1 }
 0x107   : > { %v1084_v45 = vmax.f32 %v1076_v2, 0.0  ;;  %v963_v56 = vadd.f32 %v947_v39, %v873_v14  ;;  %v783_v50 = vadd.f32 %v769_v44, %v693_v54 }
 0x109   : > { %v1092_v52 = vpack.c.bf16 %v1084_v45, %v1084_v45  ;;  %v1053_v53 = vadd.f32 %v1037_v4, %v963_v56  ;;  %v1040_v57 = vpop.f32.mrf.mxu0  ;;  %v606_v4 = vadd.f32 %v1630_v29, %v515_v36 }
 0x10b   : > { %1101 = vst.msk [vmem:[%s1649_s10 + $0x8] sm:$0xf] %vm1098_vm2, %v1092_v52  ;;  %v1065_v35 = vmul.f32 %v1635_v43, %v1053_v53  ;;  %v696_v13 = vadd.f32 %v1626_v24, %v606_v4 }
 0x10c   : > { %v860_v32 = vpop.f32.mrf.mxu2 }
 0x10d   : > { %v950_v58 = vpop.f32.mrf.mxu3  ;;  %v1077_v40 = vadd.f32 %v1640_v49, %v1065_v35  ;;  %v874_v46 = vadd.f32 %v860_v32, %v783_v50 }
 0x10e   : > { %v771_v60 = vpop.f32.mrf.mxu1 }
 0x10f   : > { %v1085_v61 = vmax.f32 %v1077_v40, 0.0  ;;  %v964_v15 = vadd.f32 %v950_v58, %v874_v46  ;;  %v784_v17 = vadd.f32 %v771_v60, %v694_v1 }
 0x111   : > { %v1093_v0 = vpack.c.bf16 %v1085_v61, %v1085_v61  ;;  %v1054_v63 = vadd.f32 %v1040_v57, %v964_v15  ;;  %v1042_v5 = vpop.f32.mrf.mxu0 }
 0x113   : > { %1102 = vst.msk [vmem:[%s1649_s10 + $0xc] sm:$0xf] %vm1098_vm2, %v1093_v0  ;;  %v1066_v3 = vmul.f32 %v1635_v43, %v1054_v63 }
 0x114   : > { %v862_v7 = vpop.f32.mrf.mxu2 }
 0x115   : > { %v952_v23 = vpop.f32.mrf.mxu3  ;;  %v1078_v12 = vadd.f32 %v1640_v49, %v1066_v3  ;;  %v875_v18 = vadd.f32 %v862_v7, %v784_v17 }
 0x116   : > { %v774_v8 = vpop.f32.mrf.mxu1 }
 0x117   : > { %v1086_v25 = vmax.f32 %v1078_v12, 0.0  ;;  %v965_v47 = vadd.f32 %v952_v23, %v875_v18  ;;  %v785_v10 = vadd.f32 %v774_v8, %v695_v11 }
 0x119   : > { %v1094_v48 = vpack.c.bf16 %v1086_v25, %v1086_v25  ;;  %v1055_v6 = vadd.f32 %v1042_v5, %v965_v47  ;;  %v1045_v30 = vpop.f32.mrf.mxu0 }
 0x11b   : > { %1103 = vst.msk [vmem:[%s1649_s10 + $0x10] sm:$0xf] %vm1098_vm2, %v1094_v48  ;;  %v1067_v21 = vmul.f32 %v1635_v43, %v1055_v6 }
 0x11c   : > { %v865_v27 = vpop.f32.mrf.mxu2 }
 0x11d   : > { %v955_v51 = vpop.f32.mrf.mxu3  ;;  %v1079_v41 = vadd.f32 %v1640_v49, %v1067_v21  ;;  %v876_v22 = vadd.f32 %v865_v27, %v785_v10 }
 0x11e   : > { %v776_v55 = vpop.f32.mrf.mxu1 }
 0x11f   : > { %v1087_v28 = vmax.f32 %v1079_v41, 0.0  ;;  %v966_v26 = vadd.f32 %v955_v51, %v876_v22  ;;  %v786_v38 = vadd.f32 %v776_v55, %v696_v13 }
 0x121   : > { %v1095_v33 = vpack.c.bf16 %v1087_v28, %v1087_v28  ;;  %v1056_v19 = vadd.f32 %v1045_v30, %v966_v26  ;;  %v1047_v34 = vpop.f32.mrf.mxu0 }
 0x123   : > { %1104 = vst.msk [vmem:[%s1649_s10 + $0x14] sm:$0xf] %vm1098_vm2, %v1095_v33  ;;  %v1068_v37 = vmul.f32 %v1635_v43, %v1056_v19 }
 0x124   : > { %v867_v39 = vpop.f32.mrf.mxu2 }
 0x125   : > { %v1080_v29 = vadd.f32 %v1640_v49, %v1068_v37  ;;  %v877_v42 = vadd.f32 %v867_v39, %v786_v38  ;;  %v957_v2 = vpop.f32.mrf.mxu3 }
 0x127   : > { %v1088_v14 = vmax.f32 %v1080_v29, 0.0  ;;  %v967_v44 = vadd.f32 %v957_v2, %v877_v42 }
 0x129   : > { %v1096_v45 = vpack.c.bf16 %v1088_v14, %v1088_v14  ;;  %v1057_v56 = vadd.f32 %v1047_v34, %v967_v44 }
 0x12b   : > { %1105 = vst.msk [vmem:[%s1649_s10 + $0x18] sm:$0xf] %vm1098_vm2, %v1096_v45  ;;  %v1069_v24 = vmul.f32 %v1635_v43, %v1057_v56 }
 0x12d   : > { %v1081_v9 = vadd.f32 %v1640_v49, %v1069_v24 }
 0x12f   : > { %v1089_v52 = vmax.f32 %v1081_v9, 0.0 }
 0x131   : > { %v1097_v53 = vpack.c.bf16 %v1089_v52, %v1089_v52 }
 0x133   : > { %1106 = vst.msk [vmem:[%s1649_s10 + $0x1c] sm:$0xf] %vm1098_vm2, %v1097_v53 }
 0x134 PF: > { %s16_s21 = sadd.s32 1, %s1287_s21  }
 0x135   : > { %p13_p4 = scmp.ge.s32.totalorder %s16_s21, 4  }
 0x137   :  { %15 = sbr.rel (!%p13_p4) target bundleno = 1 (0x1), region = 84 }

// kernel: network_block_forward.5
= control target key start
LH: loop header
LB: loop body
LE: loop exit
PB: predicated region body
PF: predicated region fallthrough
CT: control target
= control target key end

     0   :  { %s1900_s21 = smov 0   ;;  %s2387_s0 = inlined_call_operand.vmem [shape: bf16[2,10,10,8], index: 0, kind: input, shape index: {}]   ;;  %s2388_s1 = inlined_call_operand.vmem [shape: bf16[9,8,8], index: 1, kind: input, shape index: {}]   ;;  %s2389_s2 = inlined_call_operand.vmem [shape: f32[2,64,4], index: 2, kind: input, shape index: {}]   ;;  %s2390_s3 = inlined_call_operand.vmem [shape: f32[1,4], index: 3, kind: input, shape index: {}]   ;;  %s2391_s4 = inlined_call_operand.vmem [shape: f32[1,4], index: 4, kind: input, shape index: {}]   ;;  %s2392_s5 = inlined_call_operand.vmem [shape: bf16[4,8], index: 5, kind: input, shape index: {}]   ;;  %s2393_s6 = inlined_call_operand.vmem [shape: f32[2,64,8], index: 6, kind: output, shape index: {}]  }
   0x1 LB: > { %s1634_s22 = sadd.s32 4294967295, %s1863_s21   ;;  %p1638_p0 = scmp.ge.s32.totalorder %s1863_s21, 1  ;;  %s1863_s21 = sphi %s1900_s21, %s16_s21  }
   0x2   : > { %p222_p1 = scmp.lt.s32.totalorder %s1863_s21, 3 }
   0x4   : > { %p223_p2 = pnand %p1638_p0, %p222_p1 }
   0x5   : > { %p257_p3 = scmp.lt.s32.totalorder (!%p223_p2), %s1634_s22, 1 }
   0x6   : > { %226 = sbr.rel (%p223_p2) target bundleno = 318 (0x13e), region = 44 }
   0xb   : > { %v326_v0 = vld [vmem:[%s2388_s1] sm:$0xf]  ;;  %vm360_vm0 = vcmask 1043456   ;;  %vm406_vm1 = vcmask 1041408   ;;  %v1668_v3 = vld [vmem:[%s2388_s1 + $0x4] sm:$0xf] }
   0xc   : > { %v362_v1 = vsel %vm360_vm0, %v326_v0, 0  ;;  %v317_v2 = vld [vmem:[%s2392_s5] sm:$0x3]  ;;  %s2399_s22 = smov (!%p257_p3, %s1634_s22), 1  ;;  %v597_v5 = vsel %vm360_vm0, %v1668_v3, 0  ;;  %vm347_vm2 = vcmask 64512  }
   0xd   : > { %1844 = vmatpush.bf16.msra.mxu2 %v362_v1  ;;  %371 = vmatpush.bf16.msra.mxu0 %v362_v1  ;;  %v408_v4 = vsel %vm406_vm1, %v317_v2, 0  ;;  %v1855_v6 = vld [vmem:[%s2390_s3] ss:$0 sm:$0xff]  ;;  %s1846_s7 = smul.u32 80, %s2399_s22  ;;  %s1830_s8 = sshll.u32 %s2399_s22, 6  ;;  %vm393_vm3 = vcmask 31744  }
   0xe   : > { %417 = vmatpush.bf16.msra.mxu1 %v408_v4  ;;  %1845 = vmatpush.bf16.msra.mxu3 %v408_v4  ;;  %v1681_v7 = vld [vmem:[%s2388_s1 + $0x8] sm:$0xf]  ;;  %v1694_v8 = vld [vmem:[%s2388_s1 + $0xc] sm:$0xf]  ;;  %s1937_s15 = scalar_lea.vmem %s2389_s2, %s1830_s8  ;;  %v1942_v9 = vld [vmem:[%s2391_s4] ss:$0 sm:$0xff]  ;;  %s2346_s12 = scalar_lea.vmem %s2393_s6, %s1830_s8 }
   0xf   : > { %v722_v10 = vsel %vm360_vm0, %v1681_v7, 0  ;;  %v805_v11 = vsel %vm360_vm0, %v1694_v8, 0  ;;  %v1731_v12 = vld [vmem:[%s2388_s1 + $0x10] sm:$0xf]  ;;  %s1952_s24 = scalar_lea.vmem %s2387_s0, %s1846_s7  ;;  %v273_v13 = vld [vmem:[%s1937_s15] sm:$0xff]  ;;  %v274_v14 = vld [vmem:[%s1937_s15 + $0x8] sm:$0xff] }
  0x10   : > { %v277_v15 = vld [vmem:[%s1937_s15 + $0x20] sm:$0xff]  ;;  %v999_v16 = vsel %vm360_vm0, %v1731_v12, 0  ;;  %v1834_v18 = vld [vmem:[%s1952_s24 + $0x24] sm:$0xf0]  ;;  %v285_v20 = vmul.f32 %v1855_v6, %v273_v13  ;;  %v286_v21 = vmul.f32 %v1855_v6, %v274_v14  ;;  %v275_v31 = vld [vmem:[%s1937_s15 + $0x10] sm:$0xff]  ;;  %vm660_vm6 = vcmask 1042432  }
  0x11   : > { %606 = vmatpush.bf16.msrb.mxu2 %v597_v5  ;;  %814 = vmatpush.bf16.msrb.mxu0 %v805_v11  ;;  %v1654_v17 = vld [vmem:[%s1952_s24 + $0x20] sm:$0xf]  ;;  %v289_v22 = vmul.f32 %v1855_v6, %v277_v15  ;;  %v1832_v24 = vld [vmem:[%s1952_s24 + $0x4] sm:$0xf0]  ;;  %v276_v32 = vld [vmem:[%s1937_s15 + $0x18] sm:$0xff]  ;;  %v287_v42 = vmul.f32 %v1855_v6, %v275_v31  ;;  %vm661_vm7 = vcmask 1046532  }
  0x12   : > { %731 = vmatpush.bf16.msrb.mxu3 %v722_v10  ;;  %v1646_v19 = vld [vmem:[%s1952_s24] sm:$0xf]  ;;  %1008 = vmatpush.bf16.msrb.mxu1 %v999_v16  ;;  %v1655_v23 = vor.u32 %v1834_v18, %v1654_v17  ;;  %v278_v25 = vld [vmem:[%s1937_s15 + $0x28] sm:$0xff]  ;;  %v297_v27 = vadd.f32 %v1942_v9, %v285_v20  ;;  %v298_v28 = vadd.f32 %v1942_v9, %v286_v21  ;;  %v279_v36 = vld [vmem:[%s1937_s15 + $0x30] sm:$0xff]  ;;  %vm455_vm4 = vsmask.f32 3328 }
  0x13   : > { %v1647_v26 = vor.u32 %v1832_v24, %v1646_v19  ;;  %v290_v29 = vmul.f32 %v1855_v6, %v278_v25  ;;  %v301_v30 = vadd.f32 %v1942_v9, %v289_v22  ;;  %v439_v37 = vld [vmem:[%s1952_s24] sm:$0xf]  ;;  %v280_v39 = vld [vmem:[%s1937_s15 + $0x38] sm:$0xff]  ;;  %v288_v43 = vmul.f32 %v1855_v6, %v276_v32  ;;  %v441_v45 = vld [vmem:[%s1952_s24 + $0x8] sm:$0xf] }
  0x14   : > { %1662 = vmatmul.msk.bf16.vlgmr.msra.gmra.mxu2 %vm347_vm2, %v1655_v23  ;;  %v305_v33 = vmax.f32 %v297_v27, 0.0  ;;  %v306_v34 = vmax.f32 %v298_v28, 0.0  ;;  %v291_v44 = vmul.f32 %v1855_v6, %v279_v36  ;;  %v459_v46 = vshrl.u32 %v439_v37, 16  ;;  %v1658_v49 = vld [vmem:[%s1952_s24 + $0x30] sm:$0xf]  ;;  %vm2039_vm9 = vmor %vm660_vm6, %vm661_vm7 }
  0x15   : > { %1660 = vmatmul.msk.bf16.vlgmr.msra.gmra.mxu0 %vm347_vm2, %v1647_v26  ;;  %v302_v35 = vadd.f32 %v1942_v9, %v290_v29  ;;  %v309_v38 = vmax.f32 %v301_v30, 0.0  ;;  %v462_v47 = vshll.u32 %v439_v37, 16  ;;  %v292_v50 = vmul.f32 %v1855_v6, %v280_v39  ;;  %v1752_v51 = vld [vmem:[%s2388_s1 + $0x14] sm:$0xf]  ;;  %v1835_v52 = vld [vmem:[%s1952_s24 + $0x34] sm:$0xf0] }
  0x16   : > { %v313_v40 = vpack.c.bf16 %v306_v34, %v305_v33  ;;  %v1650_v53 = vld [vmem:[%s1952_s24 + $0x10] sm:$0xf]  ;;  %v1983_v54 = vld [vmem:[%s1952_s24 + $0x4] sm:$0x1]  ;;  %v1833_v55 = vld [vmem:[%s1952_s24 + $0x14] sm:$0xf0]  ;;  %v299_v56 = vadd.f32 %v1942_v9, %v287_v42  ;;  %v300_v57 = vadd.f32 %v1942_v9, %v288_v43  ;;  %v303_v61 = vadd.f32 %v1942_v9, %v291_v44 }
  0x17   : > { %v310_v41 = vmax.f32 %v302_v35, 0.0  ;;  %v1990_v58 = vld [vmem:[%s1952_s24 + $0xc] sm:$0x1]  ;;  %v473_v59 = vshrl.u32 %v441_v45, 16  ;;  %v476_v60 = vshll.u32 %v441_v45, 16  ;;  %v461_v62 = vrot.slane %v459_v46, 4 }
  0x18   : > { %1664 = vmatmul.msk.bf16.vlgmr.msra.gmra.mxu1 %vm393_vm3, %v313_v40  ;;  %v464_v63 = vrot.slane %v462_v47, 5  ;;  %v1121_v0 = vsel %vm360_vm0, %v1752_v51, 0  ;;  %v1765_v1 = vld [vmem:[%s2388_s1 + $0x18] sm:$0xf]  ;;  %v304_v2 = vadd.f32 %v1942_v9, %v292_v50  ;;  %v468_v3 = vshll.u32 %v1983_v54, 16 }
  0x19   : > { %v315_v48 = vpack.c.bf16 %v310_v41, %v309_v38  ;;  %v475_v4 = vrot.slane %v473_v59, 4  ;;  %v478_v5 = vrot.slane %v476_v60, 5  ;;  %1130 = vmatpush.bf16.msra.mxu2 %v1121_v0  ;;  %v1715_v6 = vld [vmem:[%s1952_s24 + $0x8] sm:$0xf]  ;;  %v1659_v7 = vor.u32 %v1835_v52, %v1658_v49  ;;  %v636_v15 = vld [vmem:[%s1952_s24] sm:$0xe] }
  0x1a   : > { %vm456_vm5 = vsmask.f32 7440  ;;  %v482_v8 = vshll.u32 %v1990_v58, 16  ;;  %v1651_v10 = vor.u32 %v1833_v55, %v1650_v53  ;;  %v307_v11 = vmax.f32 %v299_v56, 0.0  ;;  %v1717_v16 = vld [vmem:[%s1952_s24 + $0x10] sm:$0xf] }
  0x1b   : > { %1666 = vmatmul.msk.bf16.vlgmr.msra.gmra.mxu3 %vm393_vm3, %v315_v48  ;;  %v308_v12 = vmax.f32 %v300_v57, 0.0  ;;  %v1204_v9 = vsel %vm360_vm0, %v1765_v1, 0  ;;  %v465_v13 = vor.u32 %v464_v63, %v461_v62  ;;  %v479_v14 = vor.u32 %v478_v5, %v475_v4  ;;  %v2005_v22 = vld [vmem:[%s1952_s24 + $0xc] sm:$0x1]  ;;  %v637_v24 = vld [vmem:[%s1952_s24 + $0x8] sm:$0xe]  ;;  %vm2022_vm8 = vmor %vm455_vm4, %vm456_vm5 }
  0x1c   : > { %1213 = vmatpush.bf16.msra.mxu3 %v1204_v9  ;;  %v861_v17 = vshrl.u32 %v1715_v6, 16  ;;  %v864_v18 = vshll.u32 %v1715_v6, 16  ;;  %v311_v19 = vmax.f32 %v303_v61, 0.0  ;;  %v312_v20 = vmax.f32 %v304_v2, 0.0  ;;  %v2009_v28 = vld [vmem:[%s1952_s24 + $0x14] sm:$0x1] }
  0x1d   : > { %v470_v21 = vrot.slane %v468_v3, 5  ;;  %v484_v23 = vrot.slane %v482_v8, 5  ;;  %v314_v27 = vpack.c.bf16 %v308_v12, %v307_v11  ;;  %v875_v29 = vshrl.u32 %v1717_v16, 16  ;;  %v1802_v31 = vld [vmem:[%s2388_s1 + $0x1c] sm:$0xf] }
  0x1e   : > { %v863_v25 = vrot.slane %v861_v17, 4  ;;  %v866_v26 = vrot.slane %v864_v18, 5  ;;  %v878_v30 = vshll.u32 %v1717_v16, 16  ;;  %v466_v32 = vrot.slane %v465_v13, 4  ;;  %v1823_v36 = vld [vmem:[%s2388_s1 + $0x20] sm:$0xf] }
  0x1f   : > { %v480_v33 = vrot.slane %v479_v14, 4  ;;  %v870_v35 = vshll.u32 %v2005_v22, 16  ;;  %v1673_v38 = vrot.slane %v636_v15, 9  ;;  %v665_v39 = vrot.slane %v1983_v54, 5  ;;  %v443_v45 = vld [vmem:[%s1952_s24 + $0x10] sm:$0xf] }
  0x20   : > { %v867_v34 = vor.u32 %v866_v26, %v863_v25  ;;  %v877_v40 = vrot.slane %v875_v29, 4  ;;  %v880_v41 = vrot.slane %v878_v30, 5  ;;  %v316_v42 = vpack.c.bf16 %v312_v20, %v311_v19  ;;  %v445_v46 = vld [vmem:[%s1952_s24 + $0x18] sm:$0xf]  ;;  %v1697_v3 = vld [vmem:[%s1952_s24 + $0x8] sm:$0xf] }
  0x21   : > { %v884_v43 = vshll.u32 %v2009_v28, 16  ;;  %v1398_v44 = vsel %vm360_vm0, %v1802_v31, 0  ;;  %v1674_v47 = vrot.slane %v637_v24, 9  ;;  %v669_v48 = vrot.slane %v1990_v58, 5  ;;  %v1719_v63 = vld [vmem:[%s1952_s24 + $0x18] sm:$0xf] }
  0x22   : > { %v881_v49 = vor.u32 %v880_v41, %v877_v40  ;;  %1407 = vmatpush.bf16.msra.mxu0 %v1398_v44  ;;  %v1520_v50 = vsel %vm360_vm0, %v1823_v36, 0  ;;  %v471_v51 = vsel %vm2022_vm8, %v466_v32, %v470_v21  ;;  %v485_v52 = vsel %vm2022_vm8, %v480_v33, %v484_v23  ;;  %v1836_v4 = vld [vmem:[%s1952_s24 + $0xc] sm:$0xf0]  ;;  %v2055_v6 = vld [vmem:[%s1952_s24 + $0x14] sm:$0x1] }
  0x23   : > { %v868_v54 = vrot.slane %v867_v34, 4  ;;  %v872_v55 = vrot.slane %v870_v35, 5  ;;  %1529 = vmatpush.bf16.msra.mxu1 %v1520_v50  ;;  %v487_v56 = vshrl.u32 %v443_v45, 16  ;;  %v490_v57 = vshll.u32 %v443_v45, 16  ;;  %v1721_v13 = vld [vmem:[%s1952_s24 + $0x20] sm:$0xf] }
  0x24   : > { %1663 = vmatmul.msk.bf16.gmra.mxu2 %vm347_vm2, %v1659_v7  ;;  %v501_v58 = vshrl.u32 %v445_v46, 16  ;;  %v504_v59 = vshll.u32 %v445_v46, 16  ;;  %v882_v60 = vrot.slane %v881_v49, 4  ;;  %v886_v61 = vrot.slane %v884_v43, 5  ;;  %v2058_v7 = vld [vmem:[%s1952_s24 + $0x1c] sm:$0x1] }
  0x25   : > { %1661 = vmatmul.msk.bf16.gmra.mxu0 %vm347_vm2, %v1651_v10  ;;  %v666_v62 = vsel %vm2039_vm9, %v1673_v38, %v665_v39  ;;  %v572_v0 = vunpack.c.l.b16 %v471_v51  ;;  %v573_v1 = vunpack.c.l.b16 %v485_v52  ;;  %v670_v2 = vsel %vm2039_vm9, %v1674_v47, %v669_v48  ;;  %v2066_v32 = vld [vmem:[%s1952_s24 + $0x1c] sm:$0x1]  ;;  %v2069_v33 = vld [vmem:[%s1952_s24 + $0x24] sm:$0x1]  ;;  %v447_v39 = vld [vmem:[%s1952_s24 + $0x20] sm:$0xf] }
  0x26   : > { %v873_v5 = vsel %vm2022_vm8, %v868_v54, %v872_v55  ;;  %v489_v8 = vrot.slane %v487_v56, 4  ;;  %v492_v10 = vrot.slane %v490_v57, 5  ;;  %v503_v11 = vrot.slane %v501_v58, 4  ;;  %v449_v40 = vld [vmem:[%s1952_s24 + $0x28] sm:$0xf] }
  0x27   : > { %v506_v12 = vrot.slane %v504_v59, 5  ;;  %v887_v9 = vsel %vm2022_vm8, %v882_v60, %v886_v61  ;;  %v889_v14 = vshrl.u32 %v1719_v63, 16  ;;  %v697_v15 = vunpack.c.l.b16 %v666_v62  ;;  %v638_v45 = vld [vmem:[%s1952_s24 + $0x10] sm:$0xe]  ;;  %v639_v46 = vld [vmem:[%s1952_s24 + $0x18] sm:$0xe] }
  0x28   : > { %1665 = vmatmul.msk.bf16.gmra.mxu1 %vm393_vm3, %v314_v27  ;;  %v698_v16 = vunpack.c.l.b16 %v670_v2  ;;  %v1698_v17 = vor.u32 %v1836_v4, %v1697_v3  ;;  %v892_v18 = vshll.u32 %v1719_v63, 16  ;;  %v580_v19 = vpack.c.b16 %v573_v1, %v572_v0  ;;  %v1723_v2 = vld [vmem:[%s1952_s24 + $0x28] sm:$0xf] }
  0x29   : > { %v974_v20 = vunpack.c.l.b16 %v873_v5  ;;  %v496_v21 = vshll.u32 %v2055_v6, 16  ;;  %v510_v23 = vshll.u32 %v2058_v7, 16  ;;  %v975_v24 = vunpack.c.l.b16 %v887_v9  ;;  %v2093_v9 = vld [vmem:[%s1952_s24 + $0x2c] sm:$0x1] }
  0x2a   : > { %v493_v25 = vor.u32 %v492_v10, %v489_v8  ;;  %v507_v26 = vor.u32 %v506_v12, %v503_v11  ;;  %v903_v27 = vshrl.u32 %v1721_v13, 16  ;;  %v891_v29 = vrot.slane %v889_v14, 4  ;;  %v1725_v8 = vld [vmem:[%s1952_s24 + $0x30] sm:$0xf]  ;;  %v2090_v12 = vld [vmem:[%s1952_s24 + $0x24] sm:$0x1] }
  0x2b   : > { %1667 = vmatmul.msk.bf16.gmra.mxu3 %vm393_vm3, %v316_v42  ;;  %v894_v30 = vrot.slane %v892_v18, 5  ;;  %v906_v31 = vshll.u32 %v1721_v13, 16  ;;  %v705_v35 = vpack.c.b16 %v698_v16, %v697_v15  ;;  %v498_v36 = vrot.slane %v496_v21, 5  ;;  %v1701_v14 = vld [vmem:[%s1952_s24 + $0x18] sm:$0xf] }
  0x2c   : > { %v905_v34 = vrot.slane %v903_v27, 4  ;;  %v982_v41 = vpack.c.b16 %v975_v24, %v974_v20  ;;  %v494_v42 = vrot.slane %v493_v25, 4  ;;  %v508_v43 = vrot.slane %v507_v26, 4  ;;  %v1837_v15 = vld [vmem:[%s1952_s24 + $0x1c] sm:$0xf0] }
  0x2d   : > { %v908_v38 = vrot.slane %v906_v31, 5  ;;  %v512_v44 = vrot.slane %v510_v23, 5  ;;  %v895_v47 = vor.u32 %v894_v30, %v891_v29  ;;  %v898_v48 = vshll.u32 %v2066_v32, 16 }
  0x2e   : > { %v912_v50 = vshll.u32 %v2069_v33, 16  ;;  %v515_v51 = vshrl.u32 %v447_v39, 16  ;;  %v518_v52 = vshll.u32 %v447_v39, 16  ;;  %v529_v54 = vshrl.u32 %v449_v40, 16  ;;  %v2108_v39 = vld [vmem:[%s1952_s24 + $0x2c] sm:$0x1] }
  0x2f   : > { %v909_v49 = vor.u32 %v908_v38, %v905_v34  ;;  %v532_v55 = vshll.u32 %v449_v40, 16  ;;  %v1675_v56 = vrot.slane %v638_v45, 9  ;;  %v673_v57 = vrot.slane %v2055_v6, 5 }
  0x30   : > { %v499_v58 = vsel %vm2022_vm8, %v494_v42, %v498_v36  ;;  %v513_v59 = vsel %vm2022_vm8, %v508_v43, %v512_v44  ;;  %v1676_v60 = vrot.slane %v639_v46, 9  ;;  %v677_v61 = vrot.slane %v2058_v7, 5  ;;  %v2111_v46 = vld [vmem:[%s1952_s24 + $0x34] sm:$0x1] }
  0x31   : > { %v896_v62 = vrot.slane %v895_v47, 4  ;;  %v900_v63 = vrot.slane %v898_v48, 5  ;;  %v910_v0 = vrot.slane %v909_v49, 4  ;;  %v914_v1 = vrot.slane %v912_v50, 5  ;;  %v451_v50 = vld [vmem:[%s1952_s24 + $0x30] sm:$0xf] }
  0x32   : > { %v517_v3 = vrot.slane %v515_v51, 4  ;;  %v520_v4 = vrot.slane %v518_v52, 5  ;;  %v531_v5 = vrot.slane %v529_v54, 4  ;;  %v534_v6 = vrot.slane %v532_v55, 5  ;;  %v453_v51 = vld [vmem:[%s1952_s24 + $0x38] sm:$0xf] }
  0x33   : > { %v574_v10 = vunpack.c.l.b16 %v499_v58  ;;  %v575_v11 = vunpack.c.l.b16 %v513_v59  ;;  %v674_v7 = vsel %vm2039_vm9, %v1675_v56, %v673_v57  ;;  %v678_v13 = vsel %vm2039_vm9, %v1676_v60, %v677_v61  ;;  %v640_v58 = vld [vmem:[%s1952_s24 + $0x20] sm:$0xe]  ;;  %v641_v59 = vld [vmem:[%s1952_s24 + $0x28] sm:$0xe] }
  0x34   : > { %1669 = vmatmul.msk.bf16.vlgmr.msrb.gmra.mxu2 %vm347_vm2, %v580_v19  ;;  %v917_v16 = vshrl.u32 %v1723_v2, 16  ;;  %v901_v18 = vsel %vm2022_vm8, %v896_v62, %v900_v63  ;;  %v915_v19 = vsel %vm2022_vm8, %v910_v0, %v914_v1  ;;  %v931_v20 = vshrl.u32 %v1725_v8, 16 }
  0x35   : > { %1711 = vmatmul.msk.bf16.vlgmr.msrb.gmra.mxu0 %vm347_vm2, %v1698_v17  ;;  %v920_v17 = vshll.u32 %v1723_v2, 16  ;;  %v934_v21 = vshll.u32 %v1725_v8, 16  ;;  %v521_v23 = vor.u32 %v520_v4, %v517_v3  ;;  %v524_v24 = vshll.u32 %v2090_v12, 16 }
  0x36   : > { %v535_v25 = vor.u32 %v534_v6, %v531_v5  ;;  %v538_v26 = vshll.u32 %v2093_v9, 16  ;;  %v581_v27 = vpack.c.b16 %v575_v11, %v574_v10  ;;  %v1702_v29 = vor.u32 %v1837_v15, %v1701_v14  ;;  %v1727_v6 = vld [vmem:[%s1952_s24 + $0x38] sm:$0xf]  ;;  %v1705_v14 = vld [vmem:[%s1952_s24 + $0x28] sm:$0xf] }
  0x37   : > { %v976_v30 = vunpack.c.l.b16 %v901_v18  ;;  %v977_v31 = vunpack.c.l.b16 %v915_v19  ;;  %v919_v34 = vrot.slane %v917_v16, 4  ;;  %v699_v36 = vunpack.c.l.b16 %v674_v7  ;;  %v2135_v19 = vld [vmem:[%s1952_s24 + $0x34] sm:$0x1] }
  0x38   : > { %1732 = vmatmul.msk.bf16.vlgmr.msrb.gmra.mxu1 %vm347_vm2, %v982_v41  ;;  %v700_v38 = vunpack.c.l.b16 %v678_v13  ;;  %v933_v40 = vrot.slane %v931_v20, 4  ;;  %v936_v41 = vrot.slane %v934_v21, 5  ;;  %v522_v42 = vrot.slane %v521_v23, 4  ;;  %v1729_v13 = vld [vmem:[%s1952_s24 + $0x40] sm:$0xf] }
  0x39   : > { %v526_v43 = vrot.slane %v524_v24, 5  ;;  %v536_v44 = vrot.slane %v535_v25, 4  ;;  %v540_v45 = vrot.slane %v538_v26, 5  ;;  %v983_v47 = vpack.c.b16 %v977_v31, %v976_v30  ;;  %v2138_v20 = vld [vmem:[%s1952_s24 + $0x3c] sm:$0x1] }
  0x3a   : > { %v926_v49 = vshll.u32 %v2108_v39, 16  ;;  %v937_v52 = vor.u32 %v936_v41, %v933_v40  ;;  %v940_v54 = vshll.u32 %v2111_v46, 16  ;;  %v706_v55 = vpack.c.b16 %v700_v38, %v699_v36  ;;  %v1838_v23 = vld [vmem:[%s1952_s24 + $0x2c] sm:$0xf0] }
  0x3b   : > { %1682 = vmatmul.msk.bf16.vlgmr.msrb.gmra.mxu3 %vm347_vm2, %v705_v35  ;;  %v922_v35 = vrot.slane %v920_v17, 5  ;;  %v527_v56 = vsel %vm2022_vm8, %v522_v42, %v526_v43  ;;  %v541_v57 = vsel %vm2022_vm8, %v536_v44, %v540_v45  ;;  %v543_v60 = vshrl.u32 %v451_v50, 16  ;;  %v2150_v42 = vld [vmem:[%s1952_s24 + $0x3c] sm:$0x1]  ;;  %v2153_v43 = vld [vmem:[%s1952_s24 + $0x44] sm:$0x1] }
  0x3c   : > { %v546_v61 = vshll.u32 %v451_v50, 16  ;;  %v557_v62 = vshrl.u32 %v453_v51, 16  ;;  %v560_v63 = vshll.u32 %v453_v51, 16  ;;  %v928_v1 = vrot.slane %v926_v49, 5 }
  0x3d   : > { %v923_v48 = vor.u32 %v922_v35, %v919_v34  ;;  %v1677_v2 = vrot.slane %v640_v58, 9  ;;  %v681_v3 = vrot.slane %v2090_v12, 5  ;;  %v938_v4 = vrot.slane %v937_v52, 4 }
  0x3e   : > { %v942_v5 = vrot.slane %v940_v54, 5  ;;  %v576_v8 = vunpack.c.l.b16 %v527_v56  ;;  %v577_v10 = vunpack.c.l.b16 %v541_v57  ;;  %v1678_v11 = vrot.slane %v641_v59, 9 }
  0x3f   : > { %v924_v0 = vrot.slane %v923_v48, 4  ;;  %v685_v7 = vrot.slane %v2093_v9, 5  ;;  %v545_v15 = vrot.slane %v543_v60, 4  ;;  %v548_v16 = vrot.slane %v546_v61, 5  ;;  %v1786_v61 = vld [vmem:[%s1952_s24 + $0x10] sm:$0xf] }
  0x40   : > { %v559_v17 = vrot.slane %v557_v62, 4  ;;  %v562_v18 = vrot.slane %v560_v63, 5  ;;  %v945_v21 = vshrl.u32 %v1727_v6, 16  ;;  %v943_v9 = vsel %vm2022_vm8, %v938_v4, %v942_v5  ;;  %v1788_v63 = vld [vmem:[%s1952_s24 + $0x18] sm:$0xf] }
  0x41   : > { %v929_v12 = vsel %vm2022_vm8, %v924_v0, %v928_v1  ;;  %v948_v24 = vshll.u32 %v1727_v6, 16  ;;  %v959_v25 = vshrl.u32 %v1729_v13, 16  ;;  %v962_v26 = vshll.u32 %v1729_v13, 16 }
  0x42   : > { %v686_v30 = vsel %vm2039_vm9, %v1678_v11, %v685_v7  ;;  %v549_v31 = vor.u32 %v548_v16, %v545_v15  ;;  %v552_v34 = vshll.u32 %v2135_v19, 16  ;;  %v563_v35 = vor.u32 %v562_v18, %v559_v17 }
  0x43   : > { %v566_v36 = vshll.u32 %v2138_v20, 16  ;;  %v1706_v38 = vor.u32 %v1838_v23, %v1705_v14  ;;  %v978_v40 = vunpack.c.l.b16 %v929_v12  ;;  %v979_v41 = vunpack.c.l.b16 %v943_v9  ;;  %v1839_v23 = vld [vmem:[%s1952_s24 + $0x3c] sm:$0xf0] }
  0x44   : > { %1670 = vmatmul.msk.bf16.gmra.mxu2 %vm347_vm2, %v581_v27  ;;  %v582_v27 = vpack.c.b16 %v577_v10, %v576_v8  ;;  %v947_v44 = vrot.slane %v945_v21, 4  ;;  %v950_v45 = vrot.slane %v948_v24, 5  ;;  %v964_v48 = vrot.slane %v962_v26, 5  ;;  %v1709_v21 = vld [vmem:[%s1952_s24 + $0x38] sm:$0xf] }
  0x45   : > { %1712 = vmatmul.msk.bf16.gmra.mxu0 %vm347_vm2, %v1702_v29  ;;  %v682_v29 = vsel %vm2039_vm9, %v1677_v2, %v681_v3  ;;  %v702_v50 = vunpack.c.l.b16 %v686_v30  ;;  %v550_v51 = vrot.slane %v549_v31, 4  ;;  %v554_v52 = vrot.slane %v552_v34, 5  ;;  %v642_v2 = vld [vmem:[%s1952_s24 + $0x30] sm:$0xe]  ;;  %v643_v3 = vld [vmem:[%s1952_s24 + $0x38] sm:$0xe] }
  0x46   : > { %v701_v49 = vunpack.c.l.b16 %v682_v29  ;;  %v564_v54 = vrot.slane %v563_v35, 4  ;;  %v984_v56 = vpack.c.b16 %v979_v41, %v978_v40  ;;  %v954_v57 = vshll.u32 %v2150_v42, 16  ;;  %v1789_v30 = vld [vmem:[%s1952_s24 + $0x1c] sm:$0x1]  ;;  %v1736_v40 = vld [vmem:[%s1952_s24 + $0x8] sm:$0xe] }
  0x47   : > { %v968_v58 = vshll.u32 %v2153_v43, 16  ;;  %v951_v59 = vor.u32 %v950_v45, %v947_v44  ;;  %v555_v0 = vsel %vm2022_vm8, %v550_v51, %v554_v52  ;;  %v1260_v6 = vshrl.u32 %v1786_v61, 16  ;;  %v1737_v41 = vld [vmem:[%s1952_s24 + $0x10] sm:$0xe] }
  0x48   : > { %1733 = vmatmul.msk.bf16.gmra.mxu1 %vm347_vm2, %v983_v47  ;;  %v961_v47 = vrot.slane %v959_v25, 4  ;;  %v707_v62 = vpack.c.b16 %v702_v50, %v701_v49  ;;  %v956_v4 = vrot.slane %v954_v57, 5  ;;  %v1263_v8 = vshll.u32 %v1786_v61, 16 }
  0x49   : > { %v970_v5 = vrot.slane %v968_v58, 5  ;;  %v952_v10 = vrot.slane %v951_v59, 4  ;;  %v1274_v7 = vshrl.u32 %v1788_v63, 16  ;;  %v1277_v13 = vshll.u32 %v1788_v63, 16  ;;  %v1790_v59 = vld [vmem:[%s1952_s24 + $0x20] sm:$0xf] }
  0x4a   : > { %v965_v60 = vor.u32 %v964_v48, %v961_v47  ;;  %v1679_v14 = vrot.slane %v642_v2, 9  ;;  %v689_v15 = vrot.slane %v2135_v19, 5  ;;  %v578_v16 = vunpack.c.l.b16 %v555_v0  ;;  %v1808_v63 = vld [vmem:[%s1952_s24 + $0x18] sm:$0xe] }
  0x4b   : > { %1683 = vmatmul.msk.bf16.gmra.mxu3 %vm347_vm2, %v706_v55  ;;  %v568_v55 = vrot.slane %v566_v36, 5  ;;  %v1680_v18 = vrot.slane %v643_v3, 9  ;;  %v693_v12 = vrot.slane %v2138_v20, 5  ;;  %v1262_v9 = vrot.slane %v1260_v6, 4 }
  0x4c   : > { %v966_v11 = vrot.slane %v965_v60, 4  ;;  %v1265_v24 = vrot.slane %v1263_v8, 5  ;;  %v957_v25 = vsel %vm2022_vm8, %v952_v10, %v956_v4  ;;  %v1276_v29 = vrot.slane %v1274_v7, 4 }
  0x4d   : > { %v569_v1 = vsel %vm2022_vm8, %v564_v54, %v568_v55  ;;  %v1279_v19 = vrot.slane %v1277_v13, 5  ;;  %v690_v20 = vsel %vm2039_vm9, %v1679_v14, %v689_v15  ;;  %v694_v34 = vsel %vm2039_vm9, %v1680_v18, %v693_v12 }
  0x4e   : > { %v579_v17 = vunpack.c.l.b16 %v569_v1  ;;  %v971_v26 = vsel %vm2022_vm8, %v966_v11, %v970_v5  ;;  %v1710_v35 = vor.u32 %v1839_v23, %v1709_v21  ;;  %v980_v36 = vunpack.c.l.b16 %v957_v25  ;;  %v1792_v1 = vld [vmem:[%s1952_s24 + $0x28] sm:$0xf]  ;;  %v1791_v21 = vld [vmem:[%s1952_s24 + $0x24] sm:$0x1] }
  0x4f   : > { %v1266_v44 = vor.u32 %v1265_v24, %v1262_v9  ;;  %v1280_v47 = vor.u32 %v1279_v19, %v1276_v29  ;;  %v1283_v48 = vshll.u32 %v1789_v30, 16  ;;  %v703_v49 = vunpack.c.l.b16 %v690_v20  ;;  %v1738_v29 = vld [vmem:[%s1952_s24 + $0x18] sm:$0xe] }
  0x50   : > { %v583_v31 = vpack.c.b16 %v579_v17, %v578_v16  ;;  %v704_v50 = vunpack.c.l.b16 %v694_v34  ;;  %v1064_v51 = vrot.slane %v2005_v22, 5  ;;  %v1068_v52 = vrot.slane %v2009_v28, 5 }
  0x51   : > { %v1744_v54 = vrot.slane %v1736_v40, 9  ;;  %v1745_v55 = vrot.slane %v1737_v41, 9  ;;  %v1267_v57 = vrot.slane %v1266_v44, 4  ;;  %v1281_v60 = vrot.slane %v1280_v47, 4  ;;  %v1768_v40 = vld [vmem:[%s1952_s24 + $0x10] sm:$0xf] }
  0x52   : > { %v1285_v61 = vrot.slane %v1283_v48, 5  ;;  %v708_v0 = vpack.c.b16 %v704_v50, %v703_v49  ;;  %v1288_v2 = vshrl.u32 %v1790_v59, 16  ;;  %v1291_v3 = vshll.u32 %v1790_v59, 16  ;;  %v1810_v59 = vld [vmem:[%s1952_s24 + $0x28] sm:$0xe] }
  0x53   : > { %v1065_v22 = vsel %vm2039_vm9, %v1744_v54, %v1064_v51  ;;  %v1069_v28 = vsel %vm2039_vm9, %v1745_v55, %v1068_v52  ;;  %v1816_v8 = vrot.slane %v1808_v63, 9  ;;  %v1467_v11 = vrot.slane %v1789_v30, 5  ;;  %v1794_v52 = vld [vmem:[%s1952_s24 + $0x30] sm:$0xf] }
  0x54   : > { %1671 = vmatmul.msk.bf16.gmra.mxu2 %vm347_vm2, %v582_v27  ;;  %v1787_v27 = vld [vmem:[%s1952_s24 + $0x14] sm:$0x1]  ;;  %v1286_v10 = vsel %vm2022_vm8, %v1281_v60, %v1285_v61  ;;  %v1302_v7 = vshrl.u32 %v1792_v1, 16  ;;  %v1305_v13 = vshll.u32 %v1792_v1, 16  ;;  %v1096_v14 = vunpack.c.l.b16 %v1065_v22 }
  0x55   : > { %1713 = vmatmul.msk.bf16.gmra.mxu0 %vm347_vm2, %v1706_v38  ;;  %v981_v38 = vunpack.c.l.b16 %v971_v26  ;;  %v1269_v45 = vshll.u32 %v1787_v27, 16  ;;  %v1463_v6 = vrot.slane %v1787_v27, 5  ;;  %v1097_v15 = vunpack.c.l.b16 %v1069_v28  ;;  %v1793_v26 = vld [vmem:[%s1952_s24 + $0x2c] sm:$0x1] }
  0x56   : > { %v1290_v16 = vrot.slane %v1288_v2, 4  ;;  %v1293_v17 = vrot.slane %v1291_v3, 5  ;;  %v1374_v12 = vunpack.c.l.b16 %v1286_v10  ;;  %v1468_v9 = vsel %vm2039_vm9, %v1816_v8, %v1467_v11 }
  0x57   : > { %v1271_v58 = vrot.slane %v1269_v45, 5  ;;  %v1304_v24 = vrot.slane %v1302_v7, 4  ;;  %v1307_v25 = vrot.slane %v1305_v13, 5  ;;  %v1104_v27 = vpack.c.b16 %v1097_v15, %v1096_v14  ;;  %v1840_v45 = vld [vmem:[%s1952_s24 + $0x14] sm:$0xf0] }
  0x58   : > { %1734 = vmatmul.msk.bf16.gmra.mxu1 %vm347_vm2, %v984_v56  ;;  %v985_v56 = vpack.c.b16 %v981_v38, %v980_v36  ;;  %v1294_v19 = vor.u32 %v1293_v17, %v1290_v16  ;;  %v1297_v30 = vshll.u32 %v1791_v21, 16  ;;  %v1496_v34 = vunpack.c.l.b16 %v1468_v9  ;;  %v1795_v13 = vld [vmem:[%s1952_s24 + $0x34] sm:$0x1]  ;;  %v1797_v17 = vld [vmem:[%s1952_s24 + $0x3c] sm:$0x1] }
  0x59   : > { %v1272_v4 = vsel %vm2022_vm8, %v1267_v57, %v1271_v58  ;;  %v1308_v36 = vor.u32 %v1307_v25, %v1304_v24  ;;  %v1311_v38 = vshll.u32 %v1793_v26, 16  ;;  %v1746_v41 = vrot.slane %v1738_v29, 9  ;;  %v1796_v57 = vld [vmem:[%s1952_s24 + $0x38] sm:$0xf] }
  0x5a   : > { %v1373_v18 = vunpack.c.l.b16 %v1272_v4  ;;  %v1072_v44 = vrot.slane %v2066_v32, 5  ;;  %v1076_v48 = vrot.slane %v2069_v33, 5  ;;  %v1295_v49 = vrot.slane %v1294_v19, 4 }
  0x5b   : > { %1684 = vmatmul.msk.bf16.gmra.mxu3 %vm347_vm2, %v707_v62  ;;  %v1807_v62 = vld [vmem:[%s1952_s24 + $0x10] sm:$0xe]  ;;  %v1299_v50 = vrot.slane %v1297_v30, 5  ;;  %v1309_v54 = vrot.slane %v1308_v36, 4  ;;  %v1313_v55 = vrot.slane %v1311_v38, 5  ;;  %v1769_v58 = vor.u32 %v1840_v45, %v1768_v40 }
  0x5c   : > { %v1815_v5 = vrot.slane %v1807_v62, 9  ;;  %v1073_v32 = vsel %vm2039_vm9, %v1746_v41, %v1072_v44  ;;  %v1316_v61 = vshrl.u32 %v1794_v52, 16  ;;  %v1319_v62 = vshll.u32 %v1794_v52, 16  ;;  %v1811_v45 = vld [vmem:[%s1952_s24 + $0x30] sm:$0xe] }
  0x5d   : > { %v1300_v33 = vsel %vm2022_vm8, %v1295_v49, %v1299_v50  ;;  %v1330_v1 = vshrl.u32 %v1796_v57, 16  ;;  %v1333_v22 = vshll.u32 %v1796_v57, 16  ;;  %v1314_v28 = vsel %vm2022_vm8, %v1309_v54, %v1313_v55  ;;  %v1800_v50 = vld [vmem:[%s1952_s24 + $0x48] sm:$0xf] }
  0x5e   : > { %v1464_v23 = vsel %vm2039_vm9, %v1815_v5, %v1463_v6  ;;  %v1818_v2 = vrot.slane %v1810_v59, 9  ;;  %v1475_v3 = vrot.slane %v1793_v26, 5  ;;  %v1098_v4 = vunpack.c.l.b16 %v1073_v32 }
  0x5f   : > { %v1495_v20 = vunpack.c.l.b16 %v1464_v23  ;;  %v1375_v6 = vunpack.c.l.b16 %v1300_v33  ;;  %v1318_v8 = vrot.slane %v1316_v61, 4  ;;  %v1321_v10 = vrot.slane %v1319_v62, 5  ;;  %v1741_v23 = vld [vmem:[%s1952_s24 + $0x30] sm:$0xe] }
  0x60   : > { %v1376_v11 = vunpack.c.l.b16 %v1314_v28  ;;  %v1332_v14 = vrot.slane %v1330_v1, 4  ;;  %v1335_v15 = vrot.slane %v1333_v22, 5  ;;  %v1476_v16 = vsel %vm2039_vm9, %v1818_v2, %v1475_v3  ;;  %v1799_v2 = vld [vmem:[%s1952_s24 + $0x44] sm:$0x1] }
  0x61   : > { %v1503_v51 = vpack.c.b16 %v1496_v34, %v1495_v20  ;;  %v1322_v9 = vor.u32 %v1321_v10, %v1318_v8  ;;  %v1325_v24 = vshll.u32 %v1795_v13, 16  ;;  %v1498_v26 = vunpack.c.l.b16 %v1476_v16  ;;  %v1772_v34 = vld [vmem:[%s1952_s24 + $0x20] sm:$0xf] }
  0x62   : > { %v1382_v25 = vpack.c.b16 %v1376_v11, %v1375_v6  ;;  %v1339_v29 = vshll.u32 %v1797_v17, 16  ;;  %v1080_v30 = vrot.slane %v2108_v39, 5  ;;  %v1084_v20 = vrot.slane %v2111_v46, 5  ;;  %v1743_v16 = vld [vmem:[%s1952_s24 + $0x40] sm:$0xe] }
  0x63   : > { %v1323_v36 = vrot.slane %v1322_v9, 4  ;;  %v1327_v38 = vrot.slane %v1325_v24, 5  ;;  %v1819_v52 = vrot.slane %v1811_v45, 9  ;;  %v1479_v54 = vrot.slane %v1795_v13, 5 }
  0x64   : > { %1672 = vmatmul.msk.bf16.gmra.mxu2 %vm347_vm2, %v583_v31  ;;  %v1381_v31 = vpack.c.b16 %v1374_v12, %v1373_v18  ;;  %v1341_v44 = vrot.slane %v1339_v29, 5  ;;  %v1483_v57 = vrot.slane %v1797_v17, 5  ;;  %v1358_v59 = vshrl.u32 %v1800_v50, 16 }
  0x65   : > { %1714 = vmatmul.msk.bf16.gmra.mxu0 %vm347_vm2, %v1710_v35  ;;  %v1739_v35 = vld [vmem:[%s1952_s24 + $0x20] sm:$0xe]  ;;  %v1088_v24 = vrot.slane %v2150_v42, 5 }
  0x66   : > { %v1747_v47 = vrot.slane %v1739_v35, 9  ;;  %v1841_v35 = vld [vmem:[%s1952_s24 + $0x24] sm:$0xf0]  ;;  %v1360_v3 = vrot.slane %v1358_v59, 4 }
  0x67   : > { %v1773_v49 = vor.u32 %v1841_v35, %v1772_v34 }
  0x68   : > { %1735 = vmatmul.msk.bf16.gmra.mxu1 %vm347_vm2, %v985_v56  ;;  %v1809_v56 = vld [vmem:[%s1952_s24 + $0x20] sm:$0xe]  ;;  %v1077_v60 = vsel %vm2039_vm9, %v1747_v47, %v1076_v48  ;;  %v1812_v47 = vld [vmem:[%s1952_s24 + $0x38] sm:$0xe] }
  0x69   : > { %v1817_v63 = vrot.slane %v1809_v56, 9  ;;  %v1099_v5 = vunpack.c.l.b16 %v1077_v60  ;;  %v1798_v48 = vld [vmem:[%s1952_s24 + $0x40] sm:$0xf]  ;;  %v1820_v55 = vrot.slane %v1812_v47, 9  ;;  %v1361_v60 = vshll.u32 %v1800_v50, 16 }
  0x6a   : > { %v1347_v32 = vshll.u32 %v1798_v48, 16  ;;  %v1487_v47 = vrot.slane %v1799_v2, 5 }
  0x6b   : > { %1685 = vmatmul.msk.bf16.gmra.mxu3 %vm347_vm2, %v708_v0  ;;  %v1471_v0 = vrot.slane %v1791_v21, 5  ;;  %v1105_v18 = vpack.c.b16 %v1099_v5, %v1098_v4  ;;  %v1740_v21 = vld [vmem:[%s1952_s24 + $0x28] sm:$0xe]  ;;  %v1484_v1 = vsel %vm2039_vm9, %v1820_v55, %v1483_v57  ;;  %v1363_v4 = vrot.slane %v1361_v60, 5  ;;  %v1801_v5 = vld [vmem:[%s1952_s24 + $0x4c] sm:$0x1] }
  0x6c   : > { %v1748_v19 = vrot.slane %v1740_v21, 9  ;;  %v1349_v28 = vrot.slane %v1347_v32, 5  ;;  %v1500_v10 = vunpack.c.l.b16 %v1484_v1  ;;  %v1842_v21 = vld [vmem:[%s1952_s24 + $0x34] sm:$0xf0] }
  0x6d   : > { %v1472_v7 = vsel %vm2039_vm9, %v1817_v63, %v1471_v0  ;;  %v1480_v0 = vsel %vm2039_vm9, %v1819_v52, %v1479_v54  ;;  %v1364_v17 = vor.u32 %v1363_v4, %v1360_v3 }
  0x6e   : > { %v1497_v12 = vunpack.c.l.b16 %v1472_v7  ;;  %v1081_v39 = vsel %vm2039_vm9, %v1748_v19, %v1080_v30  ;;  %v1499_v8 = vunpack.c.l.b16 %v1480_v0  ;;  %v1742_v7 = vld [vmem:[%s1952_s24 + $0x38] sm:$0xe] }
  0x6f   : > { %v1100_v33 = vunpack.c.l.b16 %v1081_v39  ;;  %v1750_v9 = vrot.slane %v1742_v7, 9  ;;  %v1365_v30 = vrot.slane %v1364_v17, 4 }
  0x70   : > { %v1504_v40 = vpack.c.b16 %v1498_v26, %v1497_v12  ;;  %v1776_v12 = vld [vmem:[%s1952_s24 + $0x30] sm:$0xf]  ;;  %v1092_v26 = vrot.slane %v2153_v43, 5 }
  0x71   : > { %v1089_v42 = vsel %vm2039_vm9, %v1750_v9, %v1088_v24 }
  0x72   : > { %v1102_v39 = vunpack.c.l.b16 %v1089_v42 }
  0x74   : > { %1753 = vmatmul.msk.bf16.vlgmr.msra.gmra.mxu2 %vm347_vm2, %v1104_v27  ;;  %v1336_v27 = vor.u32 %v1335_v15, %v1332_v14  ;;  %v1353_v14 = vshll.u32 %v1799_v2, 16 }
  0x75   : > { %1803 = vmatmul.msk.bf16.vlgmr.msra.gmra.mxu0 %vm347_vm2, %v1381_v31  ;;  %v1749_v31 = vrot.slane %v1741_v23, 9  ;;  %v1505_v23 = vpack.c.b16 %v1500_v10, %v1499_v8 }
  0x76   : > { %v1337_v41 = vrot.slane %v1336_v27, 4  ;;  %v1355_v29 = vrot.slane %v1353_v14, 5 }
  0x77   : > { %v1085_v46 = vsel %vm2039_vm9, %v1749_v31, %v1084_v20  ;;  %v1813_v20 = vld [vmem:[%s1952_s24 + $0x40] sm:$0xe] }
  0x78   : > { %1824 = vmatmul.msk.bf16.vlgmr.msra.gmra.mxu1 %vm347_vm2, %v1503_v51  ;;  %v1328_v51 = vsel %vm2022_vm8, %v1323_v36, %v1327_v38  ;;  %v1342_v56 = vsel %vm2022_vm8, %v1337_v41, %v1341_v44  ;;  %v1101_v61 = vunpack.c.l.b16 %v1085_v46  ;;  %v1777_v36 = vor.u32 %v1842_v21, %v1776_v12  ;;  %v1814_v38 = vld [vmem:[%s1952_s24 + $0x48] sm:$0xe] }
  0x79   : > { %v1377_v62 = vunpack.c.l.b16 %v1328_v51  ;;  %v1378_v63 = vunpack.c.l.b16 %v1342_v56  ;;  %v1821_v41 = vrot.slane %v1813_v20, 9 }
  0x7a   : > { %v1106_v6 = vpack.c.b16 %v1101_v61, %v1100_v33 }
  0x7b   : > { %1782 = vmatmul.msk.bf16.vlgmr.msra.gmra.mxu3 %vm347_vm2, %v1769_v58  ;;  %v1344_v58 = vshrl.u32 %v1798_v48, 16  ;;  %v1383_v11 = vpack.c.b16 %v1378_v63, %v1377_v62  ;;  %v1822_v48 = vrot.slane %v1814_v38, 9  ;;  %v1488_v55 = vsel %vm2039_vm9, %v1821_v41, %v1487_v47  ;;  %v1780_v62 = vld [vmem:[%s1952_s24 + $0x40] sm:$0xf]  ;;  %v1843_v63 = vld [vmem:[%s1952_s24 + $0x44] sm:$0xf0] }
  0x7c   : > { %v1501_v60 = vunpack.c.l.b16 %v1488_v55  ;;  %v1781_v3 = vor.u32 %v1843_v63, %v1780_v62 }
  0x7d   : > { %v1346_v22 = vrot.slane %v1344_v58, 4 }
  0x7f   : > { %v1350_v13 = vor.u32 %v1349_v28, %v1346_v22 }
  0x81   : > { %v1351_v27 = vrot.slane %v1350_v13, 4 }
  0x83   : > { %v1356_v43 = vsel %vm2022_vm8, %v1351_v27, %v1355_v29 }
  0x84   : > { %1754 = vmatmul.msk.bf16.gmra.mxu2 %vm347_vm2, %v1105_v18  ;;  %v1367_v18 = vshll.u32 %v1801_v5, 16  ;;  %v1379_v50 = vunpack.c.l.b16 %v1356_v43 }
  0x85   : > { %1804 = vmatmul.msk.bf16.gmra.mxu0 %vm347_vm2, %v1382_v25  ;;  %v1751_v25 = vrot.slane %v1743_v16, 9 }
  0x86   : > { %v1369_v31 = vrot.slane %v1367_v18, 5 }
  0x88   : > { %1825 = vmatmul.msk.bf16.gmra.mxu1 %vm347_vm2, %v1504_v40  ;;  %v1093_v40 = vsel %vm2039_vm9, %v1751_v25, %v1092_v26  ;;  %v1370_v45 = vsel %vm2022_vm8, %v1365_v30, %v1369_v31 }
  0x89   : > { %v1103_v46 = vunpack.c.l.b16 %v1093_v40  ;;  %v1380_v51 = vunpack.c.l.b16 %v1370_v45 }
  0x8b   : > { %1783 = vmatmul.msk.bf16.gmra.mxu3 %vm347_vm2, %v1773_v49  ;;  %v1491_v49 = vrot.slane %v1801_v5, 5  ;;  %v1107_v32 = vpack.c.b16 %v1103_v46, %v1102_v39  ;;  %v1384_v59 = vpack.c.b16 %v1380_v51, %v1379_v50 }
  0x8d   : > { %v1492_v37 = vsel %vm2039_vm9, %v1822_v48, %v1491_v49 }
  0x8e   : > { %v1502_v33 = vunpack.c.l.b16 %v1492_v37 }
  0x90   : > { %v1506_v0 = vpack.c.b16 %v1502_v33, %v1501_v60 }
  0x92   : > { %v373_v15 = vpop.f32.mrf.mxu0 }
  0x94   : > { %1755 = vmatmul.msk.bf16.gmra.mxu2 %vm347_vm2, %v1106_v6 }
  0x95   : > { %1805 = vmatmul.msk.bf16.gmra.mxu0 %vm347_vm2, %v1383_v11  ;;  %v419_v19 = vpop.f32.mrf.mxu1 }
  0x96   : > { %v2274_v34 = vadd.f32 %v419_v19, %v373_v15 }
  0x97   : > { %v383_v35 = vpop.f32.mrf.mxu2 }
  0x98   : > { %1826 = vmatmul.msk.bf16.gmra.mxu1 %vm347_vm2, %v1505_v23 }
  0x9a   : > { %v375_v44 = vpop.f32.mrf.mxu0 }
  0x9b   : > { %1784 = vmatmul.msk.bf16.gmra.mxu3 %vm347_vm2, %v1777_v36 }
  0x9d   : > { %v421_v54 = vpop.f32.mrf.mxu1 }
  0x9e   : > { %v429_v52 = vpop.f32.mrf.mxu3  ;;  %v2293_v57 = vadd.f32 %v421_v54, %v375_v44 }
  0x9f   : > { %v2291_v56 = vadd.f32 %v429_v52, %v383_v35  ;;  %v385_v58 = vpop.f32.mrf.mxu2 }
  0xa2   : > { %v378_v61 = vpop.f32.mrf.mxu0 }
  0xa4   : > { %1756 = vmatmul.msk.bf16.gmra.mxu2 %vm347_vm2, %v1107_v32 }
  0xa5   : > { %1806 = vmatmul.msk.bf16.gmra.mxu0 %vm347_vm2, %v1384_v59  ;;  %v424_v53 = vpop.f32.mrf.mxu1 }
  0xa6   : > { %v431_v1 = vpop.f32.mrf.mxu3  ;;  %v425_v28 = vadd.f32 %v424_v53, %v378_v61 }
  0xa7   : > { %v2299_v22 = vadd.f32 %v431_v1, %v385_v58  ;;  %v388_v2 = vpop.f32.mrf.mxu2 }
  0xa8   : > { %1827 = vmatmul.msk.bf16.gmra.mxu1 %vm347_vm2, %v1506_v0 }
  0xaa   : > { %v380_v4 = vpop.f32.mrf.mxu0 }
  0xab   : > { %1785 = vmatmul.msk.bf16.gmra.mxu3 %vm347_vm2, %v1781_v3 }
  0xad   : > { %v426_v6 = vpop.f32.mrf.mxu1 }
  0xae   : > { %v434_v5 = vpop.f32.mrf.mxu3  ;;  %v2305_v10 = vadd.f32 %v426_v6, %v380_v4 }
  0xaf   : > { %v2303_v8 = vadd.f32 %v434_v5, %v388_v2  ;;  %v390_v11 = vpop.f32.mrf.mxu2 }
  0xb2   : > { %v816_v7 = vpop.f32.mrf.mxu0 }
  0xb5   : > { %v1010_v14 = vpop.f32.mrf.mxu1 }
  0xb6   : > { %v436_v13 = vpop.f32.mrf.mxu3 }
  0xb7   : > { %v2307_v15 = vadd.f32 %v436_v13, %v390_v11  ;;  %v608_v16 = vpop.f32.mrf.mxu2 }
  0xb8   : > { %v628_v46 = vadd.f32 %v608_v16, %v2274_v34 }
  0xba   : > { %v818_v17 = vpop.f32.mrf.mxu0 }
  0xbd   : > { %v1012_v12 = vpop.f32.mrf.mxu1 }
  0xbe   : > { %v733_v18 = vpop.f32.mrf.mxu3 }
  0xbf   : > { %v610_v21 = vpop.f32.mrf.mxu2  ;;  %v753_v51 = vadd.f32 %v733_v18, %v628_v46 }
  0xc0   : > { %v629_v58 = vadd.f32 %v610_v21, %v2293_v57 }
  0xc1   : > { %v836_v55 = vadd.f32 %v816_v7, %v753_v51 }
  0xc2   : > { %v821_v23 = vpop.f32.mrf.mxu0 }
  0xc3   : > { %v1030_v59 = vadd.f32 %v1010_v14, %v836_v55 }
  0xc5   : > { %v1015_v24 = vpop.f32.mrf.mxu1 }
  0xc6   : > { %v735_v9 = vpop.f32.mrf.mxu3 }
  0xc7   : > { %v613_v25 = vpop.f32.mrf.mxu2  ;;  %v754_v32 = vadd.f32 %v735_v9, %v629_v58 }
  0xc8   : > { %v630_v34 = vadd.f32 %v613_v25, %v425_v28 }
  0xc9   : > { %v837_v63 = vadd.f32 %v818_v17, %v754_v32 }
  0xca   : > { %v823_v26 = vpop.f32.mrf.mxu0 }
  0xcb   : > { %v1031_v3 = vadd.f32 %v1012_v12, %v837_v63 }
  0xcd   : > { %v2309_v29 = vpop.f32.mrf.mxu1 }
  0xce   : > { %v738_v27 = vpop.f32.mrf.mxu3 }
  0xcf   : > { %v615_v19 = vpop.f32.mrf.mxu2  ;;  %v755_v2 = vadd.f32 %v738_v27, %v630_v34 }
  0xd0   : > { %v631_v14 = vadd.f32 %v615_v19, %v2305_v10 }
  0xd1   : > { %v838_v11 = vadd.f32 %v821_v23, %v755_v2 }
  0xd2   : > { %v2311_v30 = vpop.f32.mrf.mxu0 }
  0xd3   : > { %v1032_v21 = vadd.f32 %v1015_v24, %v838_v11 }
  0xd5   : > { %v2313_v20 = vpop.f32.mrf.mxu1 }
  0xd6   : > { %v740_v31 = vpop.f32.mrf.mxu3 }
  0xd7   : > { %v618_v35 = vpop.f32.mrf.mxu2  ;;  %v756_v17 = vadd.f32 %v740_v31, %v631_v14 }
  0xd8   : > { %v632_v23 = vadd.f32 %v618_v35, %v2291_v56 }
  0xd9   : > { %v839_v25 = vadd.f32 %v823_v26, %v756_v17 }
  0xda   : > { %v2315_v36 = vpop.f32.mrf.mxu0 }
  0xdb   : > { %v1033_v19 = vadd.f32 %v2309_v29, %v839_v25 }
  0xdd   : > { %v2317_v42 = vpop.f32.mrf.mxu1 }
  0xde   : > { %v743_v38 = vpop.f32.mrf.mxu3 }
  0xdf   : > { %v2319_v40 = vpop.f32.mrf.mxu2  ;;  %v757_v55 = vadd.f32 %v743_v38, %v632_v23 }
  0xe0   : > { %v633_v32 = vadd.f32 %v2319_v40, %v2299_v22 }
  0xe2   : > { %v2321_v43 = vpop.f32.mrf.mxu0 }
  0xe5   : > { %v2325_v44 = vpop.f32.mrf.mxu1 }
  0xe6   : > { %v2323_v41 = vpop.f32.mrf.mxu3 }
  0xe7   : > { %v2327_v45 = vpop.f32.mrf.mxu2  ;;  %v758_v35 = vadd.f32 %v2323_v41, %v633_v32 }
  0xe8   : > { %v634_v22 = vadd.f32 %v2327_v45, %v2303_v8 }
  0xea   : > { %v2329_v47 = vpop.f32.mrf.mxu0 }
  0xed   : > { %v2333_v49 = vpop.f32.mrf.mxu1 }
  0xee   : > { %v2331_v48 = vpop.f32.mrf.mxu3 }
  0xef   : > { %v2335_v39 = vpop.f32.mrf.mxu2 }
  0xf0   : > { %v635_v8 = vadd.f32 %v2335_v39, %v2307_v15 }
  0xf2   : > { %v1409_v50 = vpop.f32.mrf.mxu0 }
  0xf5   : > { %v1531_v54 = vpop.f32.mrf.mxu1 }
  0xf6   : > { %v2338_v52 = vpop.f32.mrf.mxu3 }
  0xf7   : > { %v1132_v37 = vpop.f32.mrf.mxu2 }
  0xf8   : > { %v1152_v33 = vadd.f32 %v1132_v37, %v1030_v59  ;;  %v840_v37 = vadd.f32 %v2311_v30, %v757_v55  ;;  %v841_v30 = vadd.f32 %v2315_v36, %v758_v35 }
  0xfa   : > { %v1411_v60 = vpop.f32.mrf.mxu0 }
  0xfd   : > { %v1533_v62 = vpop.f32.mrf.mxu1 }
  0xfe   : > { %v1215_v61 = vpop.f32.mrf.mxu3 }
  0xff   : > { %v1235_v0 = vadd.f32 %v1215_v61, %v1152_v33  ;;  %v1134_v1 = vpop.f32.mrf.mxu2 }
 0x100   : > { %v1153_v4 = vadd.f32 %v1134_v1, %v1031_v3  ;;  %v1035_v1 = vadd.f32 %v2317_v42, %v841_v30 }
 0x101   : > { %v1429_v53 = vadd.f32 %v1409_v50, %v1235_v0  ;;  %v759_v0 = vadd.f32 %v2331_v48, %v634_v22  ;;  %v760_v48 = vadd.f32 %v2338_v52, %v635_v8 }
 0x102   : > { %v1414_v6 = vpop.f32.mrf.mxu0 }
 0x103   : > { %v1551_v57 = vadd.f32 %v1531_v54, %v1429_v53  ;;  %v842_v36 = vadd.f32 %v2321_v43, %v759_v0  ;;  %v843_v43 = vadd.f32 %v2329_v47, %v760_v48 }
 0x105   : > { %1559 = vst.msk [vmem:[%s2346_s12] sm:$0xff] %vm347_vm2, %v1551_v57  ;;  %v1536_v13 = vpop.f32.mrf.mxu1  ;;  %v1036_v42 = vadd.f32 %v2325_v44, %v842_v36  ;;  %v1037_v39 = vadd.f32 %v2333_v49, %v843_v43 }
 0x106   : > { %v1217_v5 = vpop.f32.mrf.mxu3 }
 0x107   : > { %v1236_v7 = vadd.f32 %v1217_v5, %v1153_v4  ;;  %v1137_v28 = vpop.f32.mrf.mxu2 }
 0x108   : > { %v1154_v9 = vadd.f32 %v1137_v28, %v1032_v21 }
 0x109   : > { %v1430_v16 = vadd.f32 %v1411_v60, %v1236_v7  ;;  %v1034_v60 = vadd.f32 %v2313_v20, %v840_v37 }
 0x10a   : > { %v1416_v50 = vpop.f32.mrf.mxu0 }
 0x10b   : > { %v1552_v18 = vadd.f32 %v1533_v62, %v1430_v16 }
 0x10d   : > { %1560 = vst.msk [vmem:[%s2346_s12 + $0x8] sm:$0xff] %vm347_vm2, %v1552_v18  ;;  %v1538_v54 = vpop.f32.mrf.mxu1 }
 0x10e   : > { %v1220_v12 = vpop.f32.mrf.mxu3 }
 0x10f   : > { %v1237_v27 = vadd.f32 %v1220_v12, %v1154_v9  ;;  %v1139_v46 = vpop.f32.mrf.mxu2 }
 0x110   : > { %v1155_v24 = vadd.f32 %v1139_v46, %v1033_v19 }
 0x111   : > { %v1431_v51 = vadd.f32 %v1414_v6, %v1237_v27 }
 0x112   : > { %v1419_v56 = vpop.f32.mrf.mxu0 }
 0x113   : > { %v1553_v10 = vadd.f32 %v1536_v13, %v1431_v51 }
 0x115   : > { %1561 = vst.msk [vmem:[%s2346_s12 + $0x10] sm:$0xff] %vm347_vm2, %v1553_v10  ;;  %v1541_v29 = vpop.f32.mrf.mxu1 }
 0x116   : > { %v1222_v31 = vpop.f32.mrf.mxu3 }
 0x117   : > { %v1238_v58 = vadd.f32 %v1222_v31, %v1155_v24  ;;  %v1142_v26 = vpop.f32.mrf.mxu2 }
 0x118   : > { %v1156_v33 = vadd.f32 %v1142_v26, %v1034_v60 }
 0x119   : > { %v1432_v59 = vadd.f32 %v1416_v50, %v1238_v58 }
 0x11a   : > { %v1421_v20 = vpop.f32.mrf.mxu0 }
 0x11b   : > { %v1554_v38 = vadd.f32 %v1538_v54, %v1432_v59 }
 0x11d   : > { %1562 = vst.msk [vmem:[%s2346_s12 + $0x18] sm:$0xff] %vm347_vm2, %v1554_v38  ;;  %v1543_v53 = vpop.f32.mrf.mxu1 }
 0x11e   : > { %v1225_v61 = vpop.f32.mrf.mxu3 }
 0x11f   : > { %v1239_v62 = vadd.f32 %v1225_v61, %v1156_v33  ;;  %v1144_v63 = vpop.f32.mrf.mxu2 }
 0x120   : > { %v1157_v34 = vadd.f32 %v1144_v63, %v1035_v1 }
 0x121   : > { %v1433_v40 = vadd.f32 %v1419_v56, %v1239_v62 }
 0x122   : > { %v1424_v6 = vpop.f32.mrf.mxu0 }
 0x123   : > { %v1555_v41 = vadd.f32 %v1541_v29, %v1433_v40 }
 0x125   : > { %1563 = vst.msk [vmem:[%s2346_s12 + $0x20] sm:$0xff] %vm347_vm2, %v1555_v41  ;;  %v1546_v28 = vpop.f32.mrf.mxu1 }
 0x126   : > { %v1227_v2 = vpop.f32.mrf.mxu3 }
 0x127   : > { %v1240_v57 = vadd.f32 %v1227_v2, %v1157_v34  ;;  %v1147_v3 = vpop.f32.mrf.mxu2 }
 0x128   : > { %v1158_v5 = vadd.f32 %v1147_v3, %v1036_v42 }
 0x129   : > { %v1434_v45 = vadd.f32 %v1421_v20, %v1240_v57 }
 0x12a   : > { %v1426_v17 = vpop.f32.mrf.mxu0 }
 0x12b   : > { %v1556_v4 = vadd.f32 %v1543_v53, %v1434_v45 }
 0x12d   : > { %1564 = vst.msk [vmem:[%s2346_s12 + $0x28] sm:$0xff] %vm347_vm2, %v1556_v4  ;;  %v1548_v21 = vpop.f32.mrf.mxu1 }
 0x12e   : > { %v1230_v11 = vpop.f32.mrf.mxu3 }
 0x12f   : > { %v1241_v7 = vadd.f32 %v1230_v11, %v1158_v5  ;;  %v1149_v14 = vpop.f32.mrf.mxu2 }
 0x130   : > { %v1159_v52 = vadd.f32 %v1149_v14, %v1037_v39 }
 0x131   : > { %v1435_v13 = vadd.f32 %v1424_v6, %v1241_v7 }
 0x133   : > { %v1557_v15 = vadd.f32 %v1546_v28, %v1435_v13 }
 0x135   : > { %1565 = vst.msk [vmem:[%s2346_s12 + $0x30] sm:$0xff] %vm347_vm2, %v1557_v15 }
 0x136   : > { %v1232_v16 = vpop.f32.mrf.mxu3 }
 0x137   : > { %v1242_v44 = vadd.f32 %v1232_v16, %v1159_v52 }
 0x139   : > { %v1436_v18 = vadd.f32 %v1426_v17, %v1242_v44 }
 0x13b   : > { %v1558_v9 = vadd.f32 %v1548_v21, %v1436_v18 }
 0x13d   : > { %1566 = vst.msk [vmem:[%s2346_s12 + $0x38] sm:$0xff] %vm347_vm2, %v1558_v9 }
 0x13e PF: > { %s16_s21 = sadd.s32 1, %s1863_s21  }
 0x13f   : > { %p13_p4 = scmp.ge.s32.totalorder %s16_s21, 4  }
 0x141   :  { %15 = sbr.rel (!%p13_p4) target bundleno = 1 (0x1), region = 87 }

// kernel: network_block_forward.7
= control target key start
LH: loop header
LB: loop body
LE: loop exit
PB: predicated region body
PF: predicated region fallthrough
CT: control target
= control target key end

     0   :  { %s1724_s12 = smov 0   ;;  %s2163_s0 = inlined_call_operand.vmem [shape: bf16[2,10,10,8], index: 0, kind: input, shape index: {}]   ;;  %s2164_s1 = inlined_call_operand.vmem [shape: bf16[9,8,8], index: 1, kind: input, shape index: {}]   ;;  %s2165_s2 = inlined_call_operand.vmem [shape: f32[2,64,8], index: 2, kind: input, shape index: {}]   ;;  %s2166_s3 = inlined_call_operand.vmem [shape: f32[2,64,8], index: 3, kind: output, shape index: {}]  }
   0x1 LB: > { %s1478_s13 = sadd.s32 4294967295, %s1702_s12   ;;  %p1482_p0 = scmp.ge.s32.totalorder %s1702_s12, 1  ;;  %s1702_s12 = sphi %s1724_s12, %s13_s12  }
   0x2   : > { %p147_p1 = scmp.lt.s32.totalorder %s1702_s12, 3 }
   0x4   : > { %p148_p2 = pnand %p1482_p0, %p147_p1 }
   0x5   : > { %p176_p3 = scmp.lt.s32.totalorder (!%p148_p2), %s1478_s13, 1 }
   0x6   : > { %151 = sbr.rel (%p148_p2) target bundleno = 295 (0x127), region = 32 }
   0xb   : > { %v208_v0 = vld [vmem:[%s2164_s1] sm:$0xf]  ;;  %vm242_vm0 = vcmask 1043456   ;;  %v1521_v2 = vld [vmem:[%s2164_s1 + $0x8] sm:$0xf]  ;;  %s2172_s13 = smov (!%p176_p3, %s1478_s13), 1 }
   0xc   : > { %v244_v1 = vsel %vm242_vm0, %v208_v0, 0  ;;  %v1534_v3 = vld [vmem:[%s2164_s1 + $0xc] sm:$0xf]  ;;  %v566_v4 = vsel %vm242_vm0, %v1521_v2, 0  ;;  %v1508_v6 = vld [vmem:[%s2164_s1 + $0x4] sm:$0xf] }
   0xd   : > { %1684 = vmatpush.bf16.msra.mxu1 %v244_v1  ;;  %1685 = vmatpush.bf16.msra.mxu2 %v244_v1  ;;  %v649_v5 = vsel %vm242_vm0, %v1534_v3, 0  ;;  %v441_v7 = vsel %vm242_vm0, %v1508_v6, 0  ;;  %v1571_v8 = vld [vmem:[%s2164_s1 + $0x10] sm:$0xf]  ;;  %s1687_s24 = smul.u32 80, %s2172_s13  ;;  %vm229_vm1 = vcmask 64512  }
   0xe   : > { %1686 = vmatpush.bf16.msra.mxu3 %v244_v1  ;;  %253 = vmatpush.bf16.msra.mxu0 %v244_v1  ;;  %v843_v9 = vsel %vm242_vm0, %v1571_v8, 0  ;;  %v1605_v10 = vld [vmem:[%s2164_s1 + $0x18] sm:$0xf]  ;;  %vm504_vm2 = vcmask 1042432   ;;  %vm505_vm3 = vcmask 1046532   ;;  %s1670_s9 = sshll.u32 %s2172_s13, 6 }
   0xf   : > { %v1642_v11 = vld [vmem:[%s2164_s1 + $0x1c] sm:$0xf]  ;;  %v1592_v12 = vld [vmem:[%s2164_s1 + $0x14] sm:$0xf]  ;;  %s1767_s6 = scalar_lea.vmem %s2163_s0, %s1687_s24  ;;  %vm299_vm4 = vsmask.f32 3328  ;;  %vm1790_vm5 = vmor %vm504_vm2, %vm505_vm3  ;;  %s2054_s14 = scalar_lea.vmem %s2165_s2, %s1670_s9 }
  0x10   : > { %v1048_v13 = vsel %vm242_vm0, %v1605_v10, 0  ;;  %v1242_v14 = vsel %vm242_vm0, %v1642_v11, 0  ;;  %v965_v15 = vsel %vm242_vm0, %v1592_v12, 0  ;;  %v1494_v16 = vld [vmem:[%s1767_s6 + $0x10] sm:$0xf]  ;;  %s2122_s17 = scalar_lea.vmem %s2166_s3, %s1670_s9 }
  0x11   : > { %575 = vmatpush.bf16.msrb.mxu2 %v566_v4  ;;  %450 = vmatpush.bf16.msrb.mxu1 %v441_v7  ;;  %v1673_v17 = vld [vmem:[%s1767_s6 + $0x14] sm:$0xf0]  ;;  %v1498_v18 = vld [vmem:[%s1767_s6 + $0x20] sm:$0xf]  ;;  %v1674_v20 = vld [vmem:[%s1767_s6 + $0x24] sm:$0xf0] }
  0x12   : > { %658 = vmatpush.bf16.msrb.mxu3 %v649_v5  ;;  %852 = vmatpush.bf16.msrb.mxu0 %v843_v9  ;;  %v1495_v19 = vor.u32 %v1673_v17, %v1494_v16  ;;  %v1502_v21 = vld [vmem:[%s1767_s6 + $0x30] sm:$0xf]  ;;  %v1675_v22 = vld [vmem:[%s1767_s6 + $0x34] sm:$0xf0]  ;;  %v1499_v23 = vor.u32 %v1674_v20, %v1498_v18  ;;  %v1490_v25 = vld [vmem:[%s1767_s6] sm:$0xf] }
  0x13   : > { %v1503_v24 = vor.u32 %v1675_v22, %v1502_v21  ;;  %v1672_v26 = vld [vmem:[%s1767_s6 + $0x4] sm:$0xf0]  ;;  %v283_v27 = vld [vmem:[%s1767_s6] sm:$0xf]  ;;  %v284_v29 = vld [vmem:[%s1767_s6 + $0x4] sm:$0x1] }
  0x14   : > { %1505 = vmatmul.msk.bf16.vlgmr.msra.gmra.mxu1 %vm229_vm1, %v1495_v19  ;;  %v1491_v28 = vor.u32 %v1672_v26, %v1490_v25  ;;  %v285_v30 = vld [vmem:[%s1767_s6 + $0x8] sm:$0xf]  ;;  %v286_v31 = vld [vmem:[%s1767_s6 + $0xc] sm:$0x1]  ;;  %1506 = vmatmul.msk.bf16.vlgmr.msra.gmra.mxu2 %vm229_vm1, %v1499_v23  ;;  %v303_v32 = vshrl.u32 %v283_v27, 16  ;;  %v306_v33 = vshll.u32 %v283_v27, 16 }
  0x15   : > { %1507 = vmatmul.msk.bf16.vlgmr.msra.gmra.mxu3 %vm229_vm1, %v1503_v24  ;;  %v312_v34 = vshll.u32 %v284_v29, 16  ;;  %v317_v35 = vshrl.u32 %v285_v30, 16  ;;  %v480_v36 = vld [vmem:[%s1767_s6] sm:$0xe]  ;;  %v320_v38 = vshll.u32 %v285_v30, 16  ;;  %v326_v39 = vshll.u32 %v286_v31, 16  ;;  %1057 = vmatpush.bf16.msra.mxu2 %v1048_v13 }
  0x16   : > { %1504 = vmatmul.msk.bf16.vlgmr.msra.gmra.mxu0 %vm229_vm1, %v1491_v28  ;;  %v481_v40 = vld [vmem:[%s1767_s6 + $0x8] sm:$0xe]  ;;  %v1513_v41 = vrot.slane %v480_v36, 9  ;;  %v509_v42 = vrot.slane %v284_v29, 5  ;;  %vm300_vm6 = vsmask.f32 7440  ;;  %1251 = vmatpush.bf16.msra.mxu3 %v1242_v14 }
  0x17   : > { %v305_v43 = vrot.slane %v303_v32, 4  ;;  %v308_v44 = vrot.slane %v306_v33, 5  ;;  %v319_v45 = vrot.slane %v317_v35, 4  ;;  %974 = vmatpush.bf16.msra.mxu1 %v965_v15  ;;  %v314_v46 = vrot.slane %v312_v34, 5  ;;  %v1555_v53 = vld [vmem:[%s1767_s6 + $0x8] sm:$0xf]  ;;  %vm1804_vm7 = vmor %vm299_vm4, %vm300_vm6 }
  0x18   : > { %v322_v47 = vrot.slane %v320_v38, 5  ;;  %v510_v48 = vsel %vm1790_vm5, %v1513_v41, %v509_v42  ;;  %v1514_v49 = vrot.slane %v481_v40, 9  ;;  %v328_v51 = vrot.slane %v326_v39, 5  ;;  %v1800_v54 = vld [vmem:[%s1767_s6 + $0xc] sm:$0x1]  ;;  %v194_v55 = vld [vmem:[%s2054_s14 + $0x10] sm:$0xff] }
  0x19   : > { %v309_v50 = vor.u32 %v308_v44, %v305_v43  ;;  %v513_v52 = vrot.slane %v286_v31, 5  ;;  %v541_v57 = vunpack.c.l.b16 %v510_v48  ;;  %v1537_v58 = vld [vmem:[%s1767_s6 + $0x8] sm:$0xf]  ;;  %v1557_v59 = vld [vmem:[%s1767_s6 + $0x10] sm:$0xf]  ;;  %v705_v60 = vshrl.u32 %v1555_v53, 16 }
  0x1a   : > { %v323_v56 = vor.u32 %v322_v47, %v319_v45  ;;  %v708_v61 = vshll.u32 %v1555_v53, 16  ;;  %v1676_v0 = vld [vmem:[%s1767_s6 + $0xc] sm:$0xf0]  ;;  %v714_v1 = vshll.u32 %v1800_v54, 16  ;;  %v719_v2 = vshrl.u32 %v1557_v59, 16 }
  0x1b   : > { %v310_v62 = vrot.slane %v309_v50, 4  ;;  %v514_v63 = vsel %vm1790_vm5, %v1514_v49, %v513_v52  ;;  %v1815_v5 = vld [vmem:[%s1767_s6 + $0x14] sm:$0x1]  ;;  %v707_v6 = vrot.slane %v705_v60, 4  ;;  %v722_v10 = vshll.u32 %v1557_v59, 16 }
  0x1c   : > { %v324_v3 = vrot.slane %v323_v56, 4  ;;  %v542_v4 = vunpack.c.l.b16 %v514_v63  ;;  %v710_v7 = vrot.slane %v708_v61, 5  ;;  %v721_v9 = vrot.slane %v719_v2, 4  ;;  %v1663_v11 = vld [vmem:[%s2164_s1 + $0x20] sm:$0xf] }
  0x1d   : > { %v315_v8 = vsel %vm1804_vm7, %v310_v62, %v314_v46  ;;  %v287_v12 = vld [vmem:[%s1767_s6 + $0x10] sm:$0xf]  ;;  %v716_v16 = vrot.slane %v714_v1, 5  ;;  %v1538_v18 = vor.u32 %v1676_v0, %v1537_v58  ;;  %v724_v19 = vrot.slane %v722_v10, 5  ;;  %v288_v21 = vld [vmem:[%s1767_s6 + $0x14] sm:$0x1] }
  0x1e   : > { %v329_v13 = vsel %vm1804_vm7, %v324_v3, %v328_v51  ;;  %v416_v14 = vunpack.c.l.b16 %v315_v8  ;;  %v711_v15 = vor.u32 %v710_v7, %v707_v6  ;;  %v728_v20 = vshll.u32 %v1815_v5, 16  ;;  %v289_v22 = vld [vmem:[%s1767_s6 + $0x18] sm:$0xf]  ;;  %v290_v30 = vld [vmem:[%s1767_s6 + $0x1c] sm:$0x1] }
  0x1f   : > { %v417_v17 = vunpack.c.l.b16 %v329_v13  ;;  %v549_v23 = vpack.c.b16 %v542_v4, %v541_v57  ;;  %v1364_v25 = vsel %vm242_vm0, %v1663_v11, 0  ;;  %v331_v26 = vshrl.u32 %v287_v12, 16  ;;  %v482_v32 = vld [vmem:[%s1767_s6 + $0x10] sm:$0xe]  ;;  %v483_v42 = vld [vmem:[%s1767_s6 + $0x18] sm:$0xe] }
  0x20   : > { %v712_v24 = vrot.slane %v711_v15, 4  ;;  %v725_v28 = vor.u32 %v724_v19, %v721_v9  ;;  %v730_v29 = vrot.slane %v728_v20, 5  ;;  %1373 = vmatpush.bf16.msra.mxu0 %v1364_v25  ;;  %v334_v31 = vshll.u32 %v287_v12, 16  ;;  %v1836_v47 = vld [vmem:[%s1767_s6 + $0x18] sm:$0xf] }
  0x21   : > { %v424_v27 = vpack.c.b16 %v417_v17, %v416_v14  ;;  %v333_v34 = vrot.slane %v331_v26, 4  ;;  %v340_v35 = vshll.u32 %v288_v21, 16  ;;  %v345_v36 = vshrl.u32 %v289_v22, 16  ;;  %v1843_v52 = vld [vmem:[%s1767_s6 + $0x1c] sm:$0xf0] }
  0x22   : > { %v717_v33 = vsel %vm1804_vm7, %v712_v24, %v716_v16  ;;  %v726_v38 = vrot.slane %v725_v28, 4  ;;  %v336_v40 = vrot.slane %v334_v31, 5  ;;  %v348_v41 = vshll.u32 %v289_v22, 16  ;;  %v1559_v53 = vld [vmem:[%s1767_s6 + $0x18] sm:$0xf] }
  0x23   : > { %v818_v39 = vunpack.c.l.b16 %v717_v33  ;;  %v342_v43 = vrot.slane %v340_v35, 5  ;;  %v347_v44 = vrot.slane %v345_v36, 4  ;;  %v354_v45 = vshll.u32 %v290_v30, 16  ;;  %v1849_v63 = vld [vmem:[%s1767_s6 + $0x1c] sm:$0x1] }
  0x24   : > { %1509 = vmatmul.msk.bf16.vlgmr.msrb.gmra.mxu1 %vm229_vm1, %v424_v27  ;;  %v1515_v46 = vrot.slane %v482_v32, 9  ;;  %1522 = vmatmul.msk.bf16.vlgmr.msrb.gmra.mxu2 %vm229_vm1, %v549_v23  ;;  %v731_v48 = vsel %vm1804_vm7, %v726_v38, %v730_v29  ;;  %v337_v49 = vor.u32 %v336_v40, %v333_v34  ;;  %v350_v50 = vrot.slane %v348_v41, 5  ;;  %v1561_v0 = vld [vmem:[%s1767_s6 + $0x20] sm:$0xf]  ;;  %v1859_v9 = vld [vmem:[%s1767_s6 + $0x24] sm:$0x1] }
  0x25   : > { %1551 = vmatmul.msk.bf16.vlgmr.msrb.gmra.mxu3 %vm229_vm1, %v1538_v18  ;;  %v517_v51 = vrot.slane %v288_v21, 5  ;;  %v819_v56 = vunpack.c.l.b16 %v731_v48  ;;  %v1516_v57 = vrot.slane %v483_v42, 9  ;;  %v521_v58 = vrot.slane %v290_v30, 5  ;;  %v291_v15 = vld [vmem:[%s1767_s6 + $0x20] sm:$0xf] }
  0x26   : > { %v338_v59 = vrot.slane %v337_v49, 4  ;;  %v351_v60 = vor.u32 %v350_v50, %v347_v44  ;;  %v356_v61 = vrot.slane %v354_v45, 5  ;;  %v1542_v3 = vor.u32 %v1843_v52, %v1836_v47  ;;  %v292_v20 = vld [vmem:[%s1767_s6 + $0x24] sm:$0x1]  ;;  %v293_v21 = vld [vmem:[%s1767_s6 + $0x28] sm:$0xf] }
  0x27   : > { %v518_v62 = vsel %vm1790_vm5, %v1515_v46, %v517_v51  ;;  %v826_v1 = vpack.c.b16 %v819_v56, %v818_v39  ;;  %v522_v2 = vsel %vm1790_vm5, %v1516_v57, %v521_v58  ;;  %v733_v4 = vshrl.u32 %v1559_v53, 16  ;;  %v294_v28 = vld [vmem:[%s1767_s6 + $0x2c] sm:$0x1]  ;;  %v484_v40 = vld [vmem:[%s1767_s6 + $0x20] sm:$0xe] }
  0x28   : > { %v343_v6 = vsel %vm1804_vm7, %v338_v59, %v342_v43  ;;  %v352_v7 = vrot.slane %v351_v60, 4  ;;  %v543_v8 = vunpack.c.l.b16 %v518_v62  ;;  %v736_v10 = vshll.u32 %v1559_v53, 16  ;;  %v485_v49 = vld [vmem:[%s1767_s6 + $0x28] sm:$0xe] }
  0x29   : > { %1572 = vmatmul.msk.bf16.vlgmr.msrb.gmra.mxu0 %vm229_vm1, %v826_v1  ;;  %v544_v11 = vunpack.c.l.b16 %v522_v2  ;;  %v735_v12 = vrot.slane %v733_v4, 4  ;;  %v742_v13 = vshll.u32 %v1849_v63, 16  ;;  %v747_v14 = vshrl.u32 %v1561_v0, 16  ;;  %v1563_v56 = vld [vmem:[%s1767_s6 + $0x28] sm:$0xf] }
  0x2a   : > { %v357_v16 = vsel %vm1804_vm7, %v352_v7, %v356_v61  ;;  %v418_v17 = vunpack.c.l.b16 %v343_v6  ;;  %v738_v18 = vrot.slane %v736_v10, 5  ;;  %v750_v19 = vshll.u32 %v1561_v0, 16  ;;  %v1879_v1 = vld [vmem:[%s1767_s6 + $0x2c] sm:$0x1]  ;;  %v1565_v2 = vld [vmem:[%s1767_s6 + $0x30] sm:$0xf] }
  0x2b   : > { %v419_v22 = vunpack.c.l.b16 %v357_v16  ;;  %v744_v23 = vrot.slane %v742_v13, 5  ;;  %v749_v24 = vrot.slane %v747_v14, 4  ;;  %v756_v25 = vshll.u32 %v1859_v9, 16  ;;  %v1885_v4 = vld [vmem:[%s1767_s6 + $0x34] sm:$0x1] }
  0x2c   : > { %v739_v26 = vor.u32 %v738_v18, %v735_v12  ;;  %v752_v27 = vrot.slane %v750_v19, 5  ;;  %v359_v29 = vshrl.u32 %v291_v15, 16  ;;  %v362_v30 = vshll.u32 %v291_v15, 16  ;;  %v295_v16 = vld [vmem:[%s1767_s6 + $0x30] sm:$0xf] }
  0x2d   : > { %v550_v31 = vpack.c.b16 %v544_v11, %v543_v8  ;;  %v758_v32 = vrot.slane %v756_v25, 5  ;;  %v368_v33 = vshll.u32 %v292_v20, 16  ;;  %v373_v34 = vshrl.u32 %v293_v21, 16 }
  0x2e   : > { %v740_v35 = vrot.slane %v739_v26, 4  ;;  %v753_v36 = vor.u32 %v752_v27, %v749_v24  ;;  %v361_v38 = vrot.slane %v359_v29, 4  ;;  %v364_v39 = vrot.slane %v362_v30, 5  ;;  %v1901_v27 = vld [vmem:[%s1767_s6 + $0x34] sm:$0x1] }
  0x2f   : > { %v425_v41 = vpack.c.b16 %v419_v22, %v418_v17  ;;  %v375_v42 = vrot.slane %v373_v34, 4  ;;  %v376_v43 = vshll.u32 %v293_v21, 16  ;;  %v382_v44 = vshll.u32 %v294_v28, 16 }
  0x30   : > { %v745_v45 = vsel %vm1804_vm7, %v740_v35, %v744_v23  ;;  %v754_v46 = vrot.slane %v753_v36, 4  ;;  %v365_v47 = vor.u32 %v364_v39, %v361_v38  ;;  %v370_v48 = vrot.slane %v368_v33, 5  ;;  %v298_v35 = vld [vmem:[%s1767_s6 + $0x3c] sm:$0x1] }
  0x31   : > { %v820_v50 = vunpack.c.l.b16 %v745_v45  ;;  %v378_v51 = vrot.slane %v376_v43, 5  ;;  %v1517_v52 = vrot.slane %v484_v40, 9  ;;  %v525_v53 = vrot.slane %v292_v20, 5  ;;  %v297_v20 = vld [vmem:[%s1767_s6 + $0x38] sm:$0xf] }
  0x32   : > { %v759_v57 = vsel %vm1804_vm7, %v754_v46, %v758_v32  ;;  %v366_v58 = vrot.slane %v365_v47, 4  ;;  %v384_v59 = vrot.slane %v382_v44, 5  ;;  %v1518_v62 = vrot.slane %v485_v49, 9  ;;  %v1545_v44 = vld [vmem:[%s1767_s6 + $0x28] sm:$0xf] }
  0x33   : > { %v821_v60 = vunpack.c.l.b16 %v759_v57  ;;  %v379_v61 = vor.u32 %v378_v51, %v375_v42  ;;  %v529_v0 = vrot.slane %v294_v28, 5  ;;  %v761_v6 = vshrl.u32 %v1563_v56, 16  ;;  %v1678_v45 = vld [vmem:[%s1767_s6 + $0x2c] sm:$0xf0]  ;;  %v1567_v51 = vld [vmem:[%s1767_s6 + $0x38] sm:$0xf] }
  0x34   : > { %1510 = vmatmul.msk.bf16.gmra.mxu1 %vm229_vm1, %v425_v41  ;;  %1523 = vmatmul.msk.bf16.gmra.mxu2 %vm229_vm1, %v550_v31  ;;  %v371_v8 = vsel %vm1804_vm7, %v366_v58, %v370_v48  ;;  %v526_v11 = vsel %vm1790_vm5, %v1517_v52, %v525_v53  ;;  %v764_v13 = vshll.u32 %v1563_v56, 16  ;;  %v770_v14 = vshll.u32 %v1879_v1, 16  ;;  %v487_v58 = vld [vmem:[%s1767_s6 + $0x38] sm:$0xe] }
  0x35   : > { %1552 = vmatmul.msk.bf16.gmra.mxu3 %vm229_vm1, %v1542_v3  ;;  %v827_v7 = vpack.c.b16 %v821_v60, %v820_v50  ;;  %v380_v10 = vrot.slane %v379_v61, 4  ;;  %v763_v12 = vrot.slane %v761_v6, 4  ;;  %v775_v15 = vshrl.u32 %v1565_v2, 16  ;;  %v486_v50 = vld [vmem:[%s1767_s6 + $0x30] sm:$0xe] }
  0x36   : > { %v530_v17 = vsel %vm1790_vm5, %v1518_v62, %v529_v0  ;;  %v778_v18 = vshll.u32 %v1565_v2, 16  ;;  %v784_v19 = vshll.u32 %v1885_v4, 16  ;;  %v420_v21 = vunpack.c.l.b16 %v371_v8  ;;  %v1915_v6 = vld [vmem:[%s1767_s6 + $0x3c] sm:$0x1] }
  0x37   : > { %v385_v3 = vsel %vm1804_vm7, %v380_v10, %v384_v59  ;;  %v545_v22 = vunpack.c.l.b16 %v526_v11  ;;  %v766_v23 = vrot.slane %v764_v13, 5  ;;  %v777_v24 = vrot.slane %v775_v15, 4 }
  0x38   : > { %v421_v25 = vunpack.c.l.b16 %v385_v3  ;;  %v780_v26 = vrot.slane %v778_v18, 5  ;;  %v387_v28 = vshrl.u32 %v295_v16, 16  ;;  %v390_v29 = vshll.u32 %v295_v16, 16  ;;  %v1921_v3 = vld [vmem:[%s1767_s6 + $0x44] sm:$0x1] }
  0x39   : > { %1573 = vmatmul.msk.bf16.gmra.mxu0 %vm229_vm1, %v827_v7  ;;  %v767_v30 = vor.u32 %v766_v23, %v763_v12  ;;  %v772_v31 = vrot.slane %v770_v14, 5  ;;  %v786_v32 = vrot.slane %v784_v19, 5  ;;  %v401_v33 = vshrl.u32 %v297_v20, 16  ;;  %v1569_v7 = vld [vmem:[%s1767_s6 + $0x40] sm:$0xf] }
  0x3a   : > { %v781_v34 = vor.u32 %v780_v26, %v777_v24  ;;  %v389_v36 = vrot.slane %v387_v28, 4  ;;  %v392_v38 = vrot.slane %v390_v29, 5  ;;  %v404_v39 = vshll.u32 %v297_v20, 16  ;;  %v1626_v23 = vld [vmem:[%s1767_s6 + $0x10] sm:$0xf] }
  0x3b   : > { %v546_v40 = vunpack.c.l.b16 %v530_v17  ;;  %v768_v41 = vrot.slane %v767_v30, 4  ;;  %v396_v42 = vshll.u32 %v1901_v27, 16  ;;  %v403_v43 = vrot.slane %v401_v33, 4  ;;  %v1628_v28 = vld [vmem:[%s1767_s6 + $0x18] sm:$0xf] }
  0x3c   : > { %v782_v46 = vrot.slane %v781_v34, 4  ;;  %v406_v47 = vrot.slane %v404_v39, 5  ;;  %v410_v49 = vshll.u32 %v298_v35, 16  ;;  %v426_v52 = vpack.c.b16 %v421_v25, %v420_v21 }
  0x3d   : > { %v773_v48 = vsel %vm1804_vm7, %v768_v41, %v772_v31  ;;  %v393_v56 = vor.u32 %v392_v38, %v389_v36  ;;  %v551_v59 = vpack.c.b16 %v546_v40, %v545_v22  ;;  %v1546_v60 = vor.u32 %v1678_v45, %v1545_v44 }
  0x3e   : > { %v787_v53 = vsel %vm1804_vm7, %v782_v46, %v786_v32  ;;  %v407_v57 = vor.u32 %v406_v47, %v403_v43  ;;  %v398_v61 = vrot.slane %v396_v42, 5  ;;  %v822_v62 = vunpack.c.l.b16 %v773_v48  ;;  %v1549_v46 = vld [vmem:[%s1767_s6 + $0x38] sm:$0xf]  ;;  %v1679_v47 = vld [vmem:[%s1767_s6 + $0x3c] sm:$0xf0] }
  0x3f   : > { %v823_v0 = vunpack.c.l.b16 %v787_v53  ;;  %v1519_v2 = vrot.slane %v486_v50, 9  ;;  %v789_v8 = vshrl.u32 %v1567_v51, 16  ;;  %v412_v10 = vrot.slane %v410_v49, 5  ;;  %v1627_v50 = vld [vmem:[%s1767_s6 + $0x14] sm:$0x1] }
  0x40   : > { %v533_v11 = vrot.slane %v1901_v27, 5  ;;  %v1520_v12 = vrot.slane %v487_v58, 9  ;;  %v792_v13 = vshll.u32 %v1567_v51, 16  ;;  %v394_v14 = vrot.slane %v393_v56, 4 }
  0x41   : > { %v408_v15 = vrot.slane %v407_v57, 4  ;;  %v537_v16 = vrot.slane %v298_v35, 5  ;;  %v791_v17 = vrot.slane %v789_v8, 4  ;;  %v798_v19 = vshll.u32 %v1915_v6, 16  ;;  %v1629_v57 = vld [vmem:[%s1767_s6 + $0x1c] sm:$0x1] }
  0x42   : > { %v794_v18 = vrot.slane %v792_v13, 5  ;;  %v803_v20 = vshrl.u32 %v1569_v7, 16  ;;  %v806_v21 = vshll.u32 %v1569_v7, 16  ;;  %v828_v22 = vpack.c.b16 %v823_v0, %v822_v62  ;;  %v1576_v7 = vld [vmem:[%s1767_s6 + $0x8] sm:$0xe] }
  0x43   : > { %v812_v27 = vshll.u32 %v1921_v3, 16  ;;  %v399_v29 = vsel %vm1804_vm7, %v394_v14, %v398_v61  ;;  %v534_v30 = vsel %vm1790_vm5, %v1519_v2, %v533_v11  ;;  %v413_v31 = vsel %vm1804_vm7, %v408_v15, %v412_v10  ;;  %v1577_v8 = vld [vmem:[%s1767_s6 + $0x10] sm:$0xe] }
  0x44   : > { %1511 = vmatmul.msk.bf16.gmra.mxu1 %vm229_vm1, %v426_v52  ;;  %1524 = vmatmul.msk.bf16.gmra.mxu2 %vm229_vm1, %v551_v59  ;;  %v795_v24 = vor.u32 %v794_v18, %v791_v17  ;;  %v805_v25 = vrot.slane %v803_v20, 4  ;;  %v808_v26 = vrot.slane %v806_v21, 5  ;;  %v538_v32 = vsel %vm1790_vm5, %v1520_v12, %v537_v16  ;;  %v1630_v18 = vld [vmem:[%s1767_s6 + $0x20] sm:$0xf] }
  0x45   : > { %1553 = vmatmul.msk.bf16.gmra.mxu3 %vm229_vm1, %v1546_v60  ;;  %v800_v33 = vrot.slane %v798_v19, 5  ;;  %v1104_v36 = vshrl.u32 %v1626_v23, 16  ;;  %v1107_v38 = vshll.u32 %v1626_v23, 16  ;;  %v1118_v39 = vshrl.u32 %v1628_v28, 16  ;;  %v1632_v23 = vld [vmem:[%s1767_s6 + $0x28] sm:$0xf] }
  0x46   : > { %v809_v34 = vor.u32 %v808_v26, %v805_v25  ;;  %v796_v35 = vrot.slane %v795_v24, 4  ;;  %v814_v41 = vrot.slane %v812_v27, 5  ;;  %v422_v42 = vunpack.c.l.b16 %v399_v29  ;;  %v1647_v24 = vld [vmem:[%s1767_s6 + $0x10] sm:$0xe]  ;;  %v1648_v25 = vld [vmem:[%s1767_s6 + $0x18] sm:$0xe] }
  0x47   : > { %v423_v43 = vunpack.c.l.b16 %v413_v31  ;;  %v547_v44 = vunpack.c.l.b16 %v534_v30  ;;  %v548_v45 = vunpack.c.l.b16 %v538_v32  ;;  %v1121_v48 = vshll.u32 %v1628_v28, 16 }
  0x48   : > { %v810_v40 = vrot.slane %v809_v34, 4  ;;  %v801_v49 = vsel %vm1804_vm7, %v796_v35, %v800_v33  ;;  %v1106_v51 = vrot.slane %v1104_v36, 4  ;;  %v1109_v52 = vrot.slane %v1107_v38, 5 }
  0x49   : > { %1574 = vmatmul.msk.bf16.gmra.mxu0 %vm229_vm1, %v828_v22  ;;  %v1120_v53 = vrot.slane %v1118_v39, 4  ;;  %v1123_v58 = vrot.slane %v1121_v48, 5  ;;  %v427_v59 = vpack.c.b16 %v423_v43, %v422_v42  ;;  %v552_v60 = vpack.c.b16 %v548_v45, %v547_v44  ;;  %v1631_v43 = vld [vmem:[%s1767_s6 + $0x24] sm:$0x1]  ;;  %v1633_v48 = vld [vmem:[%s1767_s6 + $0x2c] sm:$0x1] }
  0x4a   : > { %v815_v56 = vsel %vm1804_vm7, %v810_v40, %v814_v41  ;;  %v1550_v61 = vor.u32 %v1679_v47, %v1549_v46  ;;  %v824_v62 = vunpack.c.l.b16 %v801_v49  ;;  %v1113_v0 = vshll.u32 %v1627_v50, 16  ;;  %v1608_v46 = vld [vmem:[%s1767_s6 + $0x10] sm:$0xf]  ;;  %v1680_v47 = vld [vmem:[%s1767_s6 + $0x14] sm:$0xf0] }
  0x4b   : > { %v825_v2 = vunpack.c.l.b16 %v815_v56  ;;  %v1110_v10 = vor.u32 %v1109_v52, %v1106_v51  ;;  %v1124_v11 = vor.u32 %v1123_v58, %v1120_v53  ;;  %v1127_v12 = vshll.u32 %v1629_v57, 16  ;;  %v1578_v52 = vld [vmem:[%s1767_s6 + $0x18] sm:$0xe] }
  0x4c   : > { %v908_v13 = vrot.slane %v1800_v54, 5  ;;  %v912_v14 = vrot.slane %v1815_v5, 5  ;;  %v1584_v15 = vrot.slane %v1576_v7, 9  ;;  %v1585_v16 = vrot.slane %v1577_v8, 9 }
  0x4d   : > { %v1115_v17 = vrot.slane %v1113_v0, 5  ;;  %v829_v19 = vpack.c.b16 %v825_v2, %v824_v62  ;;  %v1111_v20 = vrot.slane %v1110_v10, 4  ;;  %v1125_v21 = vrot.slane %v1124_v11, 4 }
  0x4e   : > { %v1129_v22 = vrot.slane %v1127_v12, 5  ;;  %v1132_v54 = vshrl.u32 %v1630_v18, 16  ;;  %v1135_v26 = vshll.u32 %v1630_v18, 16  ;;  %v909_v5 = vsel %vm1790_vm5, %v1584_v15, %v908_v13  ;;  %v1634_v15 = vld [vmem:[%s1767_s6 + $0x30] sm:$0xf] }
  0x4f   : > { %v913_v27 = vsel %vm1790_vm5, %v1585_v16, %v912_v14  ;;  %v1146_v28 = vshrl.u32 %v1632_v23, 16  ;;  %v1149_v29 = vshll.u32 %v1632_v23, 16  ;;  %v1116_v30 = vsel %vm1804_vm7, %v1111_v20, %v1115_v17  ;;  %v1636_v17 = vld [vmem:[%s1767_s6 + $0x38] sm:$0xf]  ;;  %v1650_v20 = vld [vmem:[%s1767_s6 + $0x28] sm:$0xe] }
  0x50   : > { %v1130_v31 = vsel %vm1804_vm7, %v1125_v21, %v1129_v22  ;;  %v1655_v32 = vrot.slane %v1647_v24, 9  ;;  %v1307_v33 = vrot.slane %v1627_v50, 5  ;;  %v1656_v34 = vrot.slane %v1648_v25, 9 }
  0x51   : > { %v1311_v35 = vrot.slane %v1629_v57, 5  ;;  %v940_v36 = vunpack.c.l.b16 %v909_v5  ;;  %v941_v38 = vunpack.c.l.b16 %v913_v27  ;;  %v1134_v39 = vrot.slane %v1132_v54, 4 }
  0x52   : > { %v1137_v40 = vrot.slane %v1135_v26, 5  ;;  %v1217_v41 = vunpack.c.l.b16 %v1116_v30  ;;  %v1218_v42 = vunpack.c.l.b16 %v1130_v31  ;;  %v1148_v44 = vrot.slane %v1146_v28, 4  ;;  %v1612_v30 = vld [vmem:[%s1767_s6 + $0x20] sm:$0xf]  ;;  %v1681_v31 = vld [vmem:[%s1767_s6 + $0x24] sm:$0xf0] }
  0x53   : > { %v1151_v45 = vrot.slane %v1149_v29, 5  ;;  %v1308_v49 = vsel %vm1790_vm5, %v1655_v32, %v1307_v33  ;;  %v1312_v50 = vsel %vm1790_vm5, %v1656_v34, %v1311_v35  ;;  %v948_v51 = vpack.c.b16 %v941_v38, %v940_v36  ;;  %v1635_v34 = vld [vmem:[%s1767_s6 + $0x34] sm:$0x1] }
  0x54   : > { %1512 = vmatmul.msk.bf16.gmra.mxu1 %vm229_vm1, %v427_v59  ;;  %1525 = vmatmul.msk.bf16.gmra.mxu2 %vm229_vm1, %v552_v60  ;;  %v1138_v53 = vor.u32 %v1137_v40, %v1134_v39  ;;  %v1141_v56 = vshll.u32 %v1631_v43, 16  ;;  %v1609_v57 = vor.u32 %v1680_v47, %v1608_v46  ;;  %v1225_v58 = vpack.c.b16 %v1218_v42, %v1217_v41  ;;  %v1579_v59 = vld [vmem:[%s1767_s6 + $0x20] sm:$0xe]  ;;  %v1637_v40 = vld [vmem:[%s1767_s6 + $0x3c] sm:$0x1] }
  0x55   : > { %1554 = vmatmul.msk.bf16.gmra.mxu3 %vm229_vm1, %v1550_v61  ;;  %v1152_v60 = vor.u32 %v1151_v45, %v1148_v44  ;;  %v1155_v61 = vshll.u32 %v1633_v48, 16  ;;  %v1339_v62 = vunpack.c.l.b16 %v1308_v49  ;;  %v1340_v0 = vunpack.c.l.b16 %v1312_v50  ;;  %v1580_v47 = vld [vmem:[%s1767_s6 + $0x28] sm:$0xe] }
  0x56   : > { %v1586_v2 = vrot.slane %v1578_v52, 9  ;;  %v916_v7 = vrot.slane %v1849_v63, 5  ;;  %v1587_v8 = vrot.slane %v1579_v59, 9  ;;  %v920_v10 = vrot.slane %v1859_v9, 5 }
  0x57   : > { %v1139_v11 = vrot.slane %v1138_v53, 4  ;;  %v1143_v12 = vrot.slane %v1141_v56, 5  ;;  %v1153_v13 = vrot.slane %v1152_v60, 4  ;;  %v1157_v14 = vrot.slane %v1155_v61, 5 }
  0x58   : > { %v1347_v16 = vpack.c.b16 %v1340_v0, %v1339_v62  ;;  %v917_v63 = vsel %vm1790_vm5, %v1586_v2, %v916_v7  ;;  %v921_v18 = vsel %vm1790_vm5, %v1587_v8, %v920_v10  ;;  %v1160_v21 = vshrl.u32 %v1634_v15, 16  ;;  %v1651_v2 = vld [vmem:[%s1767_s6 + $0x30] sm:$0xe]  ;;  %v1652_v8 = vld [vmem:[%s1767_s6 + $0x38] sm:$0xe] }
  0x59   : > { %1575 = vmatmul.msk.bf16.gmra.mxu0 %vm229_vm1, %v829_v19  ;;  %v1144_v9 = vsel %vm1804_vm7, %v1139_v11, %v1143_v12  ;;  %v1649_v19 = vld [vmem:[%s1767_s6 + $0x20] sm:$0xe]  ;;  %v1158_v22 = vsel %vm1804_vm7, %v1153_v13, %v1157_v14  ;;  %v1163_v23 = vshll.u32 %v1634_v15, 16  ;;  %v1174_v24 = vshrl.u32 %v1636_v17, 16  ;;  %v1640_v11 = vld [vmem:[%s1767_s6 + $0x48] sm:$0xf] }
  0x5a   : > { %v1177_v25 = vshll.u32 %v1636_v17, 16  ;;  %v1657_v54 = vrot.slane %v1649_v19, 9  ;;  %v1315_v26 = vrot.slane %v1631_v43, 5  ;;  %v1658_v5 = vrot.slane %v1650_v20, 9  ;;  %v1638_v10 = vld [vmem:[%s1767_s6 + $0x40] sm:$0xf] }
  0x5b   : > { %v1319_v27 = vrot.slane %v1633_v48, 5  ;;  %v942_v28 = vunpack.c.l.b16 %v917_v63  ;;  %v943_v29 = vunpack.c.l.b16 %v921_v18  ;;  %v1219_v32 = vunpack.c.l.b16 %v1144_v9  ;;  %v1581_v48 = vld [vmem:[%s1767_s6 + $0x30] sm:$0xe] }
  0x5c   : > { %v1220_v33 = vunpack.c.l.b16 %v1158_v22  ;;  %v1162_v35 = vrot.slane %v1160_v21, 4  ;;  %v1165_v36 = vrot.slane %v1163_v23, 5  ;;  %v1176_v38 = vrot.slane %v1174_v24, 4  ;;  %v1616_v22 = vld [vmem:[%s1767_s6 + $0x30] sm:$0xf] }
  0x5d   : > { %v1179_v39 = vrot.slane %v1177_v25, 5  ;;  %v1316_v41 = vsel %vm1790_vm5, %v1657_v54, %v1315_v26  ;;  %v1320_v42 = vsel %vm1790_vm5, %v1658_v5, %v1319_v27  ;;  %v949_v43 = vpack.c.b16 %v943_v29, %v942_v28  ;;  %v1682_v26 = vld [vmem:[%s1767_s6 + $0x34] sm:$0xf0] }
  0x5e   : > { %v1613_v44 = vor.u32 %v1681_v31, %v1612_v30  ;;  %v1169_v45 = vshll.u32 %v1635_v34, 16  ;;  %v1226_v46 = vpack.c.b16 %v1220_v33, %v1219_v32  ;;  %v1166_v49 = vor.u32 %v1165_v36, %v1162_v35  ;;  %v1639_v30 = vld [vmem:[%s1767_s6 + $0x44] sm:$0x1]  ;;  %v1641_v31 = vld [vmem:[%s1767_s6 + $0x4c] sm:$0x1] }
  0x5f   : > { %v1180_v50 = vor.u32 %v1179_v39, %v1176_v38  ;;  %v1341_v52 = vunpack.c.l.b16 %v1316_v41  ;;  %v1342_v53 = vunpack.c.l.b16 %v1320_v42  ;;  %v1588_v56 = vrot.slane %v1580_v47, 9  ;;  %v1582_v38 = vld [vmem:[%s1767_s6 + $0x38] sm:$0xe]  ;;  %v1583_v39 = vld [vmem:[%s1767_s6 + $0x40] sm:$0xe] }
  0x60   : > { %v928_v59 = vrot.slane %v1885_v4, 5  ;;  %v1167_v60 = vrot.slane %v1166_v49, 4  ;;  %v1171_v61 = vrot.slane %v1169_v45, 5  ;;  %v1659_v12 = vrot.slane %v1651_v2, 9 }
  0x61   : > { %v1181_v62 = vrot.slane %v1180_v50, 4  ;;  %v1348_v7 = vpack.c.b16 %v1342_v53, %v1341_v52  ;;  %v1323_v13 = vrot.slane %v1635_v34, 5  ;;  %v1327_v17 = vrot.slane %v1637_v40, 5  ;;  %v1653_v53 = vld [vmem:[%s1767_s6 + $0x40] sm:$0xe] }
  0x62   : > { %v1172_v14 = vsel %vm1804_vm7, %v1167_v60, %v1171_v61  ;;  %v1188_v63 = vshrl.u32 %v1638_v10, 16  ;;  %v1191_v18 = vshll.u32 %v1638_v10, 16  ;;  %v1202_v9 = vshrl.u32 %v1640_v11, 16  ;;  %v1620_v10 = vld [vmem:[%s1767_s6 + $0x40] sm:$0xf] }
  0x63   : > { %v1205_v19 = vshll.u32 %v1640_v11, 16  ;;  %v1221_v23 = vunpack.c.l.b16 %v1172_v14  ;;  %v1324_v25 = vsel %vm1790_vm5, %v1659_v12, %v1323_v13  ;;  %v1617_v35 = vor.u32 %v1682_v26, %v1616_v22  ;;  %v1683_v11 = vld [vmem:[%s1767_s6 + $0x44] sm:$0xf0]  ;;  %v192_v14 = vld [vmem:[%s2054_s14] sm:$0xff]  ;;  %v195_v22 = vld [vmem:[%s2054_s14 + $0x18] sm:$0xff] }
  0x64   : > { %1593 = vmatmul.msk.bf16.vlgmr.msra.gmra.mxu1 %vm229_vm1, %v948_v51  ;;  %1622 = vmatmul.msk.bf16.vlgmr.msra.gmra.mxu2 %vm229_vm1, %v1609_v57  ;;  %v1183_v51 = vshll.u32 %v1637_v40, 16  ;;  %v924_v57 = vrot.slane %v1879_v1, 5  ;;  %v1190_v5 = vrot.slane %v1188_v63, 4  ;;  %v1193_v27 = vrot.slane %v1191_v18, 5 }
  0x65   : > { %1643 = vmatmul.msk.bf16.vlgmr.msra.gmra.mxu3 %vm229_vm1, %v1225_v58  ;;  %v1589_v58 = vrot.slane %v1581_v48, 9  ;;  %v1204_v28 = vrot.slane %v1202_v9, 4  ;;  %v1207_v29 = vrot.slane %v1205_v19, 5  ;;  %v1343_v33 = vunpack.c.l.b16 %v1324_v25 }
  0x66   : > { %v1185_v0 = vrot.slane %v1183_v51, 5  ;;  %v925_v1 = vsel %vm1790_vm5, %v1588_v56, %v924_v57  ;;  %v1194_v40 = vor.u32 %v1193_v27, %v1190_v5  ;;  %v1197_v41 = vshll.u32 %v1639_v30, 16  ;;  %v1654_v56 = vld [vmem:[%s1767_s6 + $0x48] sm:$0xe] }
  0x67   : > { %v929_v4 = vsel %vm1790_vm5, %v1589_v58, %v928_v59  ;;  %v944_v20 = vunpack.c.l.b16 %v925_v1  ;;  %v1208_v42 = vor.u32 %v1207_v29, %v1204_v28  ;;  %v1590_v45 = vrot.slane %v1582_v38, 9  ;;  %v193_v5 = vld [vmem:[%s2054_s14 + $0x8] sm:$0xff] }
  0x68   : > { %v1186_v15 = vsel %vm1804_vm7, %v1181_v62, %v1185_v0  ;;  %v945_v21 = vunpack.c.l.b16 %v929_v4  ;;  %v1591_v47 = vrot.slane %v1583_v39, 9  ;;  %v936_v48 = vrot.slane %v1921_v3, 5 }
  0x69   : > { %1664 = vmatmul.msk.bf16.vlgmr.msra.gmra.mxu0 %vm229_vm1, %v1347_v16  ;;  %v1660_v16 = vrot.slane %v1652_v8, 9  ;;  %v1222_v24 = vunpack.c.l.b16 %v1186_v15  ;;  %v1195_v49 = vrot.slane %v1194_v40, 4  ;;  %v1199_v50 = vrot.slane %v1197_v41, 5 }
  0x6a   : > { %v950_v32 = vpack.c.b16 %v945_v21, %v944_v20  ;;  %v1209_v51 = vrot.slane %v1208_v42, 4  ;;  %v937_v58 = vsel %vm1790_vm5, %v1591_v47, %v936_v48  ;;  %v1661_v59 = vrot.slane %v1653_v53, 9  ;;  %v196_v20 = vld [vmem:[%s2054_s14 + $0x20] sm:$0xff]  ;;  %v198_v21 = vld [vmem:[%s2054_s14 + $0x30] sm:$0xff] }
  0x6b   : > { %v1328_v54 = vsel %vm1790_vm5, %v1660_v16, %v1327_v17  ;;  %v1227_v36 = vpack.c.b16 %v1222_v24, %v1221_v23  ;;  %v1331_v60 = vrot.slane %v1639_v30, 5  ;;  %v1662_v61 = vrot.slane %v1654_v56, 9  ;;  %v197_v30 = vld [vmem:[%s2054_s14 + $0x28] sm:$0xff] }
  0x6c   : > { %v1344_v34 = vunpack.c.l.b16 %v1328_v54  ;;  %v1335_v62 = vrot.slane %v1641_v31, 5  ;;  %v947_v2 = vunpack.c.l.b16 %v937_v58  ;;  %v1621_v15 = vor.u32 %v1683_v11, %v1620_v10 }
  0x6d   : > { %v1332_v1 = vsel %vm1790_vm5, %v1661_v59, %v1331_v60 }
  0x6e   : > { %v1336_v4 = vsel %vm1790_vm5, %v1662_v61, %v1335_v62  ;;  %v1345_v63 = vunpack.c.l.b16 %v1332_v1 }
  0x6f   : > { %v1346_v18 = vunpack.c.l.b16 %v1336_v4 }
  0x71   : > { %v1350_v37 = vpack.c.b16 %v1346_v18, %v1345_v63 }
  0x74   : > { %1594 = vmatmul.msk.bf16.gmra.mxu1 %vm229_vm1, %v949_v43  ;;  %1623 = vmatmul.msk.bf16.gmra.mxu2 %vm229_vm1, %v1613_v44  ;;  %v1211_v43 = vshll.u32 %v1641_v31, 16  ;;  %v1349_v44 = vpack.c.b16 %v1344_v34, %v1343_v33  ;;  %v199_v31 = vld [vmem:[%s2054_s14 + $0x38] sm:$0xff] }
  0x75   : > { %1644 = vmatmul.msk.bf16.gmra.mxu3 %vm229_vm1, %v1226_v46  ;;  %v932_v46 = vrot.slane %v1915_v6, 5  ;;  %v1200_v6 = vsel %vm1804_vm7, %v1195_v49, %v1199_v50 }
  0x76   : > { %v1213_v52 = vrot.slane %v1211_v43, 5 }
  0x77   : > { %v933_v57 = vsel %vm1790_vm5, %v1590_v45, %v932_v46 }
  0x78   : > { %v1214_v3 = vsel %vm1804_vm7, %v1209_v51, %v1213_v52  ;;  %v946_v0 = vunpack.c.l.b16 %v933_v57 }
  0x79   : > { %1665 = vmatmul.msk.bf16.gmra.mxu0 %vm229_vm1, %v1348_v7  ;;  %v1223_v7 = vunpack.c.l.b16 %v1200_v6  ;;  %v1224_v8 = vunpack.c.l.b16 %v1214_v3 }
  0x7a   : > { %v951_v12 = vpack.c.b16 %v947_v2, %v946_v0 }
  0x7b   : > { %v1228_v16 = vpack.c.b16 %v1224_v8, %v1223_v7 }
  0x84   : > { %1595 = vmatmul.msk.bf16.gmra.mxu1 %vm229_vm1, %v950_v32  ;;  %1624 = vmatmul.msk.bf16.gmra.mxu2 %vm229_vm1, %v1617_v35 }
  0x85   : > { %1645 = vmatmul.msk.bf16.gmra.mxu3 %vm229_vm1, %v1227_v36 }
  0x89   : > { %1666 = vmatmul.msk.bf16.gmra.mxu0 %vm229_vm1, %v1349_v44 }
  0x91   : > { %v260_v13 = vpop.f32.mrf.mxu1 }
  0x92   : > { %v2064_v17 = vadd.f32 %v260_v13, %v194_v55 }
  0x93   : > { %v255_v9 = vpop.f32.mrf.mxu0 }
  0x94   : > { %v275_v19 = vadd.f32 %v255_v9, %v192_v14  ;;  %1596 = vmatmul.msk.bf16.gmra.mxu1 %vm229_vm1, %v951_v12  ;;  %1625 = vmatmul.msk.bf16.gmra.mxu2 %vm229_vm1, %v1621_v15 }
  0x95   : > { %1646 = vmatmul.msk.bf16.gmra.mxu3 %vm229_vm1, %v1228_v16 }
  0x97   : > { %v265_v23 = vpop.f32.mrf.mxu2 }
  0x98   : > { %v270_v24 = vpop.f32.mrf.mxu3  ;;  %v2072_v25 = vadd.f32 %v265_v23, %v196_v20 }
  0x99   : > { %v2074_v54 = vadd.f32 %v270_v24, %v198_v21  ;;  %v262_v26 = vpop.f32.mrf.mxu1  ;;  %1667 = vmatmul.msk.bf16.gmra.mxu0 %vm229_vm1, %v1350_v37 }
  0x9a   : > { %v2078_v27 = vadd.f32 %v262_v26, %v195_v22 }
  0x9b   : > { %v257_v28 = vpop.f32.mrf.mxu0 }
  0x9c   : > { %v276_v29 = vadd.f32 %v257_v28, %v193_v5 }
  0x9f   : > { %v267_v32 = vpop.f32.mrf.mxu2 }
  0xa0   : > { %v272_v33 = vpop.f32.mrf.mxu3  ;;  %v2082_v34 = vadd.f32 %v267_v32, %v197_v30 }
  0xa1   : > { %v2084_v35 = vadd.f32 %v272_v33, %v199_v31  ;;  %v452_v36 = vpop.f32.mrf.mxu1 }
  0xa2   : > { %v472_v8 = vadd.f32 %v452_v36, %v275_v19 }
  0xa6   : > { %v854_v38 = vpop.f32.mrf.mxu0 }
  0xa7   : > { %v577_v39 = vpop.f32.mrf.mxu2 }
  0xa8   : > { %v660_v40 = vpop.f32.mrf.mxu3  ;;  %v597_v10 = vadd.f32 %v577_v39, %v472_v8 }
  0xa9   : > { %v454_v41 = vpop.f32.mrf.mxu1 }
  0xaa   : > { %v680_v4 = vadd.f32 %v660_v40, %v597_v10  ;;  %v473_v13 = vadd.f32 %v454_v41, %v276_v29 }
  0xac   : > { %v874_v15 = vadd.f32 %v854_v38, %v680_v4 }
  0xae   : > { %v856_v42 = vpop.f32.mrf.mxu0 }
  0xaf   : > { %v579_v43 = vpop.f32.mrf.mxu2 }
  0xb0   : > { %v662_v44 = vpop.f32.mrf.mxu3  ;;  %v598_v14 = vadd.f32 %v579_v43, %v473_v13 }
  0xb1   : > { %v457_v45 = vpop.f32.mrf.mxu1 }
  0xb2   : > { %v681_v37 = vadd.f32 %v662_v44, %v598_v14  ;;  %v474_v21 = vadd.f32 %v457_v45, %v2064_v17 }
  0xb4   : > { %v875_v26 = vadd.f32 %v856_v42, %v681_v37 }
  0xb6   : > { %v859_v46 = vpop.f32.mrf.mxu0 }
  0xb7   : > { %v582_v47 = vpop.f32.mrf.mxu2 }
  0xb8   : > { %v665_v48 = vpop.f32.mrf.mxu3  ;;  %v599_v23 = vadd.f32 %v582_v47, %v474_v21 }
  0xb9   : > { %v459_v49 = vpop.f32.mrf.mxu1 }
  0xba   : > { %v682_v31 = vadd.f32 %v665_v48, %v599_v23  ;;  %v475_v33 = vadd.f32 %v459_v49, %v2078_v27 }
  0xbc   : > { %v876_v40 = vadd.f32 %v859_v46, %v682_v31 }
  0xbe   : > { %v2086_v50 = vpop.f32.mrf.mxu0 }
  0xbf   : > { %v584_v51 = vpop.f32.mrf.mxu2 }
  0xc0   : > { %v667_v52 = vpop.f32.mrf.mxu3  ;;  %v600_v38 = vadd.f32 %v584_v51, %v475_v33 }
  0xc1   : > { %v462_v53 = vpop.f32.mrf.mxu1 }
  0xc2   : > { %v683_v45 = vadd.f32 %v667_v52, %v600_v38  ;;  %v476_v48 = vadd.f32 %v462_v53, %v2072_v25 }
  0xc4   : > { %v877_v49 = vadd.f32 %v2086_v50, %v683_v45 }
  0xc6   : > { %v2088_v56 = vpop.f32.mrf.mxu0 }
  0xc7   : > { %v587_v57 = vpop.f32.mrf.mxu2 }
  0xc8   : > { %v2090_v58 = vpop.f32.mrf.mxu3  ;;  %v601_v4 = vadd.f32 %v587_v57, %v476_v48 }
  0xc9   : > { %v2092_v6 = vpop.f32.mrf.mxu1 }
  0xca   : > { %v684_v14 = vadd.f32 %v2090_v58, %v601_v4 }
  0xcc   : > { %v878_v50 = vadd.f32 %v2088_v56, %v684_v14 }
  0xce   : > { %v2094_v3 = vpop.f32.mrf.mxu0 }
  0xcf   : > { %v2096_v59 = vpop.f32.mrf.mxu2 }
  0xd0   : > { %v2098_v60 = vpop.f32.mrf.mxu3 }
  0xd1   : > { %v2100_v61 = vpop.f32.mrf.mxu1 }
  0xd6   : > { %v2102_v62 = vpop.f32.mrf.mxu0 }
  0xd7   : > { %v2104_v0 = vpop.f32.mrf.mxu2 }
  0xd8   : > { %v2106_v2 = vpop.f32.mrf.mxu3 }
  0xd9   : > { %v2108_v7 = vpop.f32.mrf.mxu1 }
  0xde   : > { %v2110_v11 = vpop.f32.mrf.mxu0 }
  0xdf   : > { %v2112_v55 = vpop.f32.mrf.mxu2 }
  0xe0   : > { %v2114_v1 = vpop.f32.mrf.mxu3 }
  0xe1   : > { %v976_v12 = vpop.f32.mrf.mxu1 }
  0xe2   : > { %v996_v16 = vadd.f32 %v976_v12, %v874_v15 }
  0xe6   : > { %v1375_v63 = vpop.f32.mrf.mxu0 }
  0xe7   : > { %v1059_v18 = vpop.f32.mrf.mxu2 }
  0xe8   : > { %v1253_v9 = vpop.f32.mrf.mxu3  ;;  %v1079_v20 = vadd.f32 %v1059_v18, %v996_v16  ;;  %v477_v16 = vadd.f32 %v2092_v6, %v2082_v34  ;;  %v478_v34 = vadd.f32 %v2100_v61, %v2074_v54  ;;  %v479_v54 = vadd.f32 %v2108_v7, %v2084_v35 }
  0xe9   : > { %v978_v19 = vpop.f32.mrf.mxu1 }
  0xea   : > { %v1273_v22 = vadd.f32 %v1253_v9, %v1079_v20  ;;  %v997_v5 = vadd.f32 %v978_v19, %v875_v26  ;;  %v602_v53 = vadd.f32 %v2096_v59, %v477_v16  ;;  %v603_v59 = vadd.f32 %v2104_v0, %v478_v34 }
  0xeb   : > { %v604_v0 = vadd.f32 %v2112_v55, %v479_v54 }
  0xec   : > { %v1395_v24 = vadd.f32 %v1375_v63, %v1273_v22  ;;  %v685_v58 = vadd.f32 %v2098_v60, %v602_v53  ;;  %v686_v60 = vadd.f32 %v2106_v2, %v603_v59 }
  0xed   : > { %v687_v2 = vadd.f32 %v2114_v1, %v604_v0 }
  0xee   : > { %1403 = vst.msk [vmem:[%s2122_s17] sm:$0xff] %vm229_vm1, %v1395_v24  ;;  %v1377_v28 = vpop.f32.mrf.mxu0  ;;  %v879_v56 = vadd.f32 %v2094_v3, %v685_v58  ;;  %v880_v3 = vadd.f32 %v2102_v62, %v686_v60 }
  0xef   : > { %v1061_v29 = vpop.f32.mrf.mxu2  ;;  %v881_v7 = vadd.f32 %v2110_v11, %v687_v2 }
  0xf0   : > { %v1255_v30 = vpop.f32.mrf.mxu3  ;;  %v1080_v17 = vadd.f32 %v1061_v29, %v997_v5 }
  0xf1   : > { %v981_v32 = vpop.f32.mrf.mxu1 }
  0xf2   : > { %v1274_v36 = vadd.f32 %v1255_v30, %v1080_v17  ;;  %v998_v41 = vadd.f32 %v981_v32, %v876_v40 }
  0xf4   : > { %v1396_v39 = vadd.f32 %v1377_v28, %v1274_v36 }
  0xf6   : > { %1404 = vst.msk [vmem:[%s2122_s17 + $0x8] sm:$0xff] %vm229_vm1, %v1396_v39  ;;  %v1380_v42 = vpop.f32.mrf.mxu0 }
  0xf7   : > { %v1064_v43 = vpop.f32.mrf.mxu2 }
  0xf8   : > { %v1258_v44 = vpop.f32.mrf.mxu3  ;;  %v1081_v47 = vadd.f32 %v1064_v43, %v998_v41 }
  0xf9   : > { %v983_v8 = vpop.f32.mrf.mxu1 }
  0xfa   : > { %v1275_v10 = vadd.f32 %v1258_v44, %v1081_v47  ;;  %v999_v46 = vadd.f32 %v983_v8, %v877_v49 }
  0xfc   : > { %v1397_v27 = vadd.f32 %v1380_v42, %v1275_v10 }
  0xfe   : > { %1405 = vst.msk [vmem:[%s2122_s17 + $0x10] sm:$0xff] %vm229_vm1, %v1397_v27  ;;  %v1382_v51 = vpop.f32.mrf.mxu0 }
  0xff   : > { %v1066_v12 = vpop.f32.mrf.mxu2 }
 0x100   : > { %v1260_v13 = vpop.f32.mrf.mxu3  ;;  %v1082_v15 = vadd.f32 %v1066_v12, %v999_v46 }
 0x101   : > { %v986_v52 = vpop.f32.mrf.mxu1 }
 0x102   : > { %v1276_v25 = vadd.f32 %v1260_v13, %v1082_v15  ;;  %v1000_v63 = vadd.f32 %v986_v52, %v878_v50 }
 0x104   : > { %v1398_v57 = vadd.f32 %v1382_v51, %v1276_v25 }
 0x106   : > { %1406 = vst.msk [vmem:[%s2122_s17 + $0x18] sm:$0xff] %vm229_vm1, %v1398_v57  ;;  %v1385_v18 = vpop.f32.mrf.mxu0 }
 0x107   : > { %v1069_v9 = vpop.f32.mrf.mxu2 }
 0x108   : > { %v1263_v37 = vpop.f32.mrf.mxu3  ;;  %v1083_v20 = vadd.f32 %v1069_v9, %v1000_v63 }
 0x109   : > { %v988_v19 = vpop.f32.mrf.mxu1 }
 0x10a   : > { %v1277_v6 = vadd.f32 %v1263_v37, %v1083_v20  ;;  %v1001_v22 = vadd.f32 %v988_v19, %v879_v56 }
 0x10c   : > { %v1399_v21 = vadd.f32 %v1385_v18, %v1277_v6 }
 0x10e   : > { %1407 = vst.msk [vmem:[%s2122_s17 + $0x20] sm:$0xff] %vm229_vm1, %v1399_v21  ;;  %v1387_v23 = vpop.f32.mrf.mxu0 }
 0x10f   : > { %v1071_v24 = vpop.f32.mrf.mxu2 }
 0x110   : > { %v1265_v26 = vpop.f32.mrf.mxu3  ;;  %v1084_v5 = vadd.f32 %v1071_v24, %v1001_v22 }
 0x111   : > { %v991_v28 = vpop.f32.mrf.mxu1 }
 0x112   : > { %v1278_v61 = vadd.f32 %v1265_v26, %v1084_v5  ;;  %v1002_v30 = vadd.f32 %v991_v28, %v880_v3 }
 0x114   : > { %v1400_v29 = vadd.f32 %v1387_v23, %v1278_v61 }
 0x116   : > { %1408 = vst.msk [vmem:[%s2122_s17 + $0x28] sm:$0xff] %vm229_vm1, %v1400_v29  ;;  %v1390_v33 = vpop.f32.mrf.mxu0 }
 0x117   : > { %v1074_v31 = vpop.f32.mrf.mxu2 }
 0x118   : > { %v1268_v17 = vpop.f32.mrf.mxu3  ;;  %v1085_v32 = vadd.f32 %v1074_v31, %v1002_v30 }
 0x119   : > { %v993_v38 = vpop.f32.mrf.mxu1 }
 0x11a   : > { %v1279_v36 = vadd.f32 %v1268_v17, %v1085_v32  ;;  %v1003_v55 = vadd.f32 %v993_v38, %v881_v7 }
 0x11c   : > { %v1401_v35 = vadd.f32 %v1390_v33, %v1279_v36 }
 0x11e   : > { %1409 = vst.msk [vmem:[%s2122_s17 + $0x30] sm:$0xff] %vm229_vm1, %v1401_v35  ;;  %v1392_v42 = vpop.f32.mrf.mxu0 }
 0x11f   : > { %v1076_v39 = vpop.f32.mrf.mxu2 }
 0x120   : > { %v1086_v62 = vadd.f32 %v1076_v39, %v1003_v55  ;;  %v1270_v40 = vpop.f32.mrf.mxu3 }
 0x122   : > { %v1280_v41 = vadd.f32 %v1270_v40, %v1086_v62 }
 0x124   : > { %v1402_v43 = vadd.f32 %v1392_v42, %v1280_v41 }
 0x126   : > { %1410 = vst.msk [vmem:[%s2122_s17 + $0x38] sm:$0xff] %vm229_vm1, %v1402_v43 }
 0x127 PF: > { %s13_s12 = sadd.s32 1, %s1702_s12  }
 0x128   : > { %p10_p4 = scmp.ge.s32.totalorder %s13_s12, 4  }
 0x12a   :  { %12 = sbr.rel (!%p10_p4) target bundleno = 1 (0x1), region = 75 }

</bundles_post_ra>
